<compile_context>
chip_gen: v5e
topology: v5e:2x2
jax: 0.10.0
libtpu: 0.0.40
codegen_flags: <defaults>
</compile_context>

<pallas_src>
import math
from functools import partial

import jax
import jax.numpy as jnp
from jax import lax
from jax.experimental import pallas as pl
from jax.experimental.pallas import tpu as pltpu


# --------------------------------------------------------------------------- #
# Fused kernel: per grid step (one batch element), all 4 branches are processed.
# --------------------------------------------------------------------------- #
def _fused_kernel(x1_ref, x2_ref, x3_ref, x4_ref, wkv_ref, base_ref, q_ref,
                  o1_ref, o2_ref, o3_ref, o4_ref, *, d_model):
    # x*_ref:   [C, HW]        per-branch, per-batch channel-major features (f32)
    # wkv_ref:  [2D, C]  bf16  [(Wproj Wk)^T ; (Wproj Wv Wo)^T]      (resident)
    # base_ref: [2D, HW] f32   [((pos+b)Wk)^T ; bcast(b Wv Wo)]      (resident)
    # q_ref:    [NQp, D] bf16  (query_embed_pad @ Wq) / sqrt(D)      (resident)
    # o*_ref:   [D, NQp] f32   transposed attention output (lane-dense)
    wkv = wkv_ref[...]
    base = base_ref[...]
    q = q_ref[...]

    # statically unrolled over the 4 branches -> one fat grid step
    for x_ref, o_ref in ((x1_ref, o1_ref), (x2_ref, o2_ref),
                         (x3_ref, o3_ref), (x4_ref, o4_ref)):
        x = x_ref[...].astype(jnp.bfloat16)                           # [C, HW]

        # k^T and (v@Wo)^T from one merged matmul (conv + out-proj folded in)
        kv = jnp.dot(wkv, x, preferred_element_type=jnp.float32) + base  # [2D, HW]
        kv = kv.astype(jnp.bfloat16)
        k_t = kv[:d_model]                                            # [D, HW]
        v_t = kv[d_model:]                                            # [D, HW]

        # scores: plain matmul, lane-dense [NQp, HW]
        s = jnp.dot(q, k_t, preferred_element_type=jnp.float32)

        # numerically stable softmax over keys (mask is all-False -> no masking)
        m = jnp.max(s, axis=-1, keepdims=True)
        p = jnp.exp(s - m)
        denom = jnp.sum(p, axis=-1, keepdims=True)
        p = (p * pl.reciprocal(denom, approx=True)).astype(jnp.bfloat16)

        # o^T = v^T @ p^T  -> [D, NQp]  (lane-dense writeback, last dim 128)
        o_ref[...] = lax.dot_general(v_t, p, (((1,), (1,)), ((), ())),
                                     preferred_element_type=jnp.float32)


def fused_cross_attention(xs, wkv, base, q_scaled, *, d_model):
    """xs: 4 arrays [B, C, HW]; returns 4 arrays [B, D, NQ_pad] (transposed)."""
    B, C, HW = xs[0].shape
    NQp = q_scaled.shape[0]
    D = d_model

    x_spec = pl.BlockSpec((None, C, HW), lambda b: (b, 0, 0))
    o_spec = pl.BlockSpec((None, D, NQp), lambda b: (b, 0, 0))
    out_shape = tuple(jax.ShapeDtypeStruct((B, D, NQp), jnp.float32)
                      for _ in range(4))

    return pl.pallas_call(
        partial(_fused_kernel, d_model=D),
        out_shape=out_shape,
        grid_spec=pltpu.PrefetchScalarGridSpec(
            num_scalar_prefetch=0,
            grid=(B,),
            in_specs=[
                x_spec, x_spec, x_spec, x_spec,
                pl.BlockSpec((2 * D, C), lambda b: (0, 0)),   # resident constants
                pl.BlockSpec((2 * D, HW), lambda b: (0, 0)),
                pl.BlockSpec((NQp, D), lambda b: (0, 0)),
            ],
            out_specs=(o_spec, o_spec, o_spec, o_spec),
        ),
        compiler_params=pltpu.CompilerParams(
            dimension_semantics=("parallel",)),   # >=2 steps -> both v7x TCs get work
    )(*xs, wkv, base, q_scaled)


# --------------------------------------------------------------------------- #
# Backbone stand-in: identity features + DETR-style sinusoidal position embed.
# --------------------------------------------------------------------------- #
def sine_pos_embed(H, W, D):
    half = D // 2
    y = jnp.arange(H, dtype=jnp.float32)[:, None]
    x = jnp.arange(W, dtype=jnp.float32)[None, :]
    dim_t = jnp.arange(half, dtype=jnp.float32)
    dim_t = 10000.0 ** (2.0 * (dim_t // 2) / half)
    even = (jnp.arange(half) % 2 == 0)

    pos_x = x[:, :, None] / dim_t
    pos_y = y[:, :, None] / dim_t
    pos_x = jnp.where(even, jnp.sin(pos_x), jnp.cos(pos_x))
    pos_y = jnp.where(even, jnp.sin(pos_y), jnp.cos(pos_y))
    pos_x = jnp.broadcast_to(pos_x, (H, W, half))
    pos_y = jnp.broadcast_to(pos_y, (H, W, half))
    pos = jnp.concatenate([pos_y, pos_x], axis=-1)
    return pos.reshape(H * W, D).astype(jnp.float32)


# --------------------------------------------------------------------------- #
# Jitted forward: layout glue + one-time weight fusion + one pallas_call.
# --------------------------------------------------------------------------- #
@partial(jax.jit, static_argnums=(0,))
def _inverse_net_forward(num_queries, s1, s2, s3, s4,
                         proj_w, proj_b, query_pad, wq, wk, wv, wo):
    B, C, H, W = s1.shape
    D = wq.shape[0]
    HW = H * W

    # pure reshape NCHW -> [B, C, HW]: channel-major, no relayout, lane-dense HW
    xs = tuple(s.reshape(B, C, HW) for s in (s1, s2, s3, s4))

    # batch/branch-invariant precompute, done exactly once (tiny matmuls)
    pos = sine_pos_embed(H, W, D)                              # [HW, D]; mask all-False
    wvo = wv @ wo                                              # [D, D]
    wkv = jnp.concatenate([(proj_w @ wk).T,
                           (proj_w @ wvo).T], axis=0).astype(jnp.bfloat16)   # [2D, C]
    k_base_t = ((pos + proj_b[None, :]) @ wk).T                # [D, HW]
    vo_base_t = jnp.broadcast_to((proj_b @ wvo)[:, None], (D, HW))
    base = jnp.concatenate([k_base_t, vo_base_t], axis=0)      # [2D, HW] f32
    q_scaled = ((query_pad @ wq) * (1.0 / math.sqrt(D))).astype(jnp.bfloat16)  # [NQp, D]

    o1, o2, o3, o4 = fused_cross_attention(xs, wkv, base, q_scaled, d_model=D)

    def finish(o_t):
        # [B, D, NQ_pad] -> drop query padding, un-transpose, add L=1 layer dim
        return jnp.transpose(o_t, (0, 2, 1))[:, :num_queries, :][:, None]

    return finish(o1), finish(o2), finish(o3), finish(o4)


# --------------------------------------------------------------------------- #
# InverseNet forward
# --------------------------------------------------------------------------- #
class InverseNetPallas:
    def __init__(self, num_channels, hidden_dim, num_queries=100, seed=0):
        key = jax.random.PRNGKey(seed)
        ks = jax.random.split(key, 7)
        s = 0.02
        # input_proj: Conv2d(num_channels, hidden_dim, kernel_size=1) -> [C, D] + bias
        self.proj_w = (s * jax.random.normal(ks[0], (num_channels, hidden_dim))).astype(jnp.float32)
        self.proj_b = (s * jax.random.normal(ks[1], (hidden_dim,))).astype(jnp.float32)
        # query_embed: Embedding(100, hidden_dim)
        self.query_embed = jax.random.normal(ks[2], (num_queries, hidden_dim)).astype(jnp.float32)
        # transformer (stand-in) projection weights
        self.wq = (s * jax.random.normal(ks[3], (hidden_dim, hidden_dim))).astype(jnp.float32)
        self.wk = (s * jax.random.normal(ks[4], (hidden_dim, hidden_dim))).astype(jnp.float32)
        self.wv = (s * jax.random.normal(ks[5], (hidden_dim, hidden_dim))).astype(jnp.float32)
        self.wo = (s * jax.random.normal(ks[6], (hidden_dim, hidden_dim))).astype(jnp.float32)
        self.hidden_dim = hidden_dim
        self.num_queries = num_queries
        # pad queries 100 -> 128 so q/score/output tiles are (8,128)-aligned
        nq_pad = ((num_queries + 127) // 128) * 128
        self.query_pad = (
            jnp.zeros((nq_pad, hidden_dim), jnp.float32)
            .at[:num_queries].set(self.query_embed)
        )

    def __call__(self, samples1, samples2, samples3, samples4):
        return _inverse_net_forward(
            self.num_queries, samples1, samples2, samples3, samples4,
            self.proj_w, self.proj_b, self.query_pad,
            self.wq, self.wk, self.wv, self.wo)


if __name__ == "__main__":
    B, C, H, W = 2, 4, 16, 16
    hidden_dim = 32

    key = jax.random.PRNGKey(0)
    k1, k2, k3, k4 = jax.random.split(key, 4)
    samples1 = jax.random.normal(k1, (B, C, H, W), dtype=jnp.float32)
    samples2 = jax.random.normal(k2, (B, C, H, W), dtype=jnp.float32)
    samples3 = jax.random.normal(k3, (B, C, H, W), dtype=jnp.float32)
    samples4 = jax.random.normal(k4, (B, C, H, W), dtype=jnp.float32)

    model = InverseNetPallas(num_channels=C, hidden_dim=hidden_dim, num_queries=100)
    hs1, hs2, hs3, hs4 = model(samples1, samples2, samples3, samples4)
    jax.block_until_ready((hs1, hs2, hs3, hs4))

    assert hs1.shape == (B, 1, 100, hidden_dim), hs1.shape
    assert all(h.shape == hs1.shape for h in (hs2, hs3, hs4))
    assert all(bool(jnp.all(jnp.isfinite(h))) for h in (hs1, hs2, hs3, hs4))
    print("KERNEL_OK")
</pallas_src>

<mosaic_0001>
module attributes {stable_mosaic.version = 11 : i64} {
  func.func @_fused_kernel(%arg0: i32, %arg1: memref<1x4x256xf32, #tpu.memory_space<vmem>>, %arg2: memref<1x4x256xf32, #tpu.memory_space<vmem>>, %arg3: memref<1x4x256xf32, #tpu.memory_space<vmem>>, %arg4: memref<1x4x256xf32, #tpu.memory_space<vmem>>, %arg5: memref<64x4xbf16, #tpu.memory_space<vmem>>, %arg6: memref<64x256xf32, #tpu.memory_space<vmem>>, %arg7: memref<128x32xbf16, #tpu.memory_space<vmem>>, %arg8: memref<1x32x128xf32, #tpu.memory_space<vmem>>, %arg9: memref<1x32x128xf32, #tpu.memory_space<vmem>>, %arg10: memref<1x32x128xf32, #tpu.memory_space<vmem>>, %arg11: memref<1x32x128xf32, #tpu.memory_space<vmem>>) attributes {dimension_semantics = [#tpu.dimension_semantics<parallel>], iteration_bounds = array<i64: 2>, scalar_prefetch = 0 : i64, scratch_operands = 0 : i64, tpu.core_type = #tpu.core_type<tc>, window_params = [{transform_indices = @transform_0, window_bounds = array<i64: 1, 4, 256>}, {transform_indices = @transform_1, window_bounds = array<i64: 1, 4, 256>}, {transform_indices = @transform_2, window_bounds = array<i64: 1, 4, 256>}, {transform_indices = @transform_3, window_bounds = array<i64: 1, 4, 256>}, {pipeline_mode = #tpu.pipeline_mode<synchronous>, transform_indices = @transform_4, window_bounds = array<i64: 64, 4>}, {pipeline_mode = #tpu.pipeline_mode<synchronous>, transform_indices = @transform_5, window_bounds = array<i64: 64, 256>}, {pipeline_mode = #tpu.pipeline_mode<synchronous>, transform_indices = @transform_6, window_bounds = array<i64: 128, 32>}, {transform_indices = @transform_7, window_bounds = array<i64: 1, 32, 128>}, {transform_indices = @transform_8, window_bounds = array<i64: 1, 32, 128>}, {transform_indices = @transform_9, window_bounds = array<i64: 1, 32, 128>}, {transform_indices = @transform_10, window_bounds = array<i64: 1, 32, 128>}]} {
    %c0 = arith.constant 0 : index
    %c0_0 = arith.constant 0 : index
    %0 = vector.load %arg5[%c0, %c0_0] : memref<64x4xbf16, #tpu.memory_space<vmem>>, vector<64x4xbf16>
    %c0_1 = arith.constant 0 : index
    %c0_2 = arith.constant 0 : index
    %1 = vector.load %arg6[%c0_1, %c0_2] : memref<64x256xf32, #tpu.memory_space<vmem>>, vector<64x256xf32>
    %c0_3 = arith.constant 0 : index
    %c0_4 = arith.constant 0 : index
    %2 = vector.load %arg7[%c0_3, %c0_4] : memref<128x32xbf16, #tpu.memory_space<vmem>>, vector<128x32xbf16>
    %c0_5 = arith.constant 0 : index
    %c0_6 = arith.constant 0 : index
    %c0_7 = arith.constant 0 : index
    %3 = vector.load %arg1[%c0_5, %c0_6, %c0_7] : memref<1x4x256xf32, #tpu.memory_space<vmem>>, vector<1x4x256xf32>
    %4 = vector.shape_cast %3 : vector<1x4x256xf32> to vector<4x256xf32>
    %5 = arith.truncf %4 : vector<4x256xf32> to vector<4x256xbf16>
    %cst = arith.constant dense<0.000000e+00> : vector<64x256xf32>
    %6 = tpu.matmul %0, %5, %cst {dimension_numbers = #tpu.dot_dimension_numbers<[1], [0], [0], [1], [0, 0, 1, 1], [], []>} : vector<64x4xbf16>, vector<4x256xbf16>, vector<64x256xf32> -> vector<64x256xf32>
    %7 = arith.addf %6, %1 : vector<64x256xf32>
    %8 = arith.truncf %7 : vector<64x256xf32> to vector<64x256xbf16>
    %9 = vector.extract_strided_slice %8 {offsets = [0, 0], sizes = [32, 256], strides = [1, 1]} : vector<64x256xbf16> to vector<32x256xbf16>
    %10 = vector.extract_strided_slice %8 {offsets = [32, 0], sizes = [32, 256], strides = [1, 1]} : vector<64x256xbf16> to vector<32x256xbf16>
    %cst_8 = arith.constant dense<0.000000e+00> : vector<128x256xf32>
    %11 = tpu.matmul %2, %9, %cst_8 {dimension_numbers = #tpu.dot_dimension_numbers<[1], [0], [0], [1], [0, 0, 1, 1], [], []>} : vector<128x32xbf16>, vector<32x256xbf16>, vector<128x256xf32> -> vector<128x256xf32>
    %cst_9 = arith.constant dense<0xFF800000> : vector<128xf32>
    %12 = vector.multi_reduction <maximumf>, %11, %cst_9 [1] : vector<128x256xf32> to vector<128xf32>
    %13 = vector.shape_cast %12 : vector<128xf32> to vector<128x1xf32>
    %14 = vector.broadcast %13 : vector<128x1xf32> to vector<128x256xf32>
    %15 = arith.subf %11, %14 : vector<128x256xf32>
    %16 = math.exp %15 : vector<128x256xf32>
    %cst_10 = arith.constant dense<0.000000e+00> : vector<128xf32>
    %17 = vector.multi_reduction <add>, %16, %cst_10 [1] : vector<128x256xf32> to vector<128xf32>
    %18 = vector.shape_cast %17 : vector<128xf32> to vector<128x1xf32>
    %19 = tpu.reciprocal %18 {approx = true} : vector<128x1xf32> -> vector<128x1xf32>
    %20 = vector.broadcast %19 : vector<128x1xf32> to vector<128x256xf32>
    %21 = arith.mulf %16, %20 : vector<128x256xf32>
    %22 = arith.truncf %21 : vector<128x256xf32> to vector<128x256xbf16>
    %cst_11 = arith.constant dense<0.000000e+00> : vector<32x128xf32>
    %23 = tpu.matmul %10, %22, %cst_11 {dimension_numbers = #tpu.dot_dimension_numbers<[1], [1], [0], [0], [0, 0, 1, 0], [], []>} : vector<32x256xbf16>, vector<128x256xbf16>, vector<32x128xf32> -> vector<32x128xf32>
    %c0_12 = arith.constant 0 : index
    %c0_13 = arith.constant 0 : index
    %c0_14 = arith.constant 0 : index
    %24 = vector.load %arg8[%c0_12, %c0_13, %c0_14] : memref<1x32x128xf32, #tpu.memory_space<vmem>>, vector<1x32x128xf32>
    %25 = vector.shape_cast %24 : vector<1x32x128xf32> to vector<32x128xf32>
    %26 = vector.shape_cast %23 : vector<32x128xf32> to vector<1x32x128xf32>
    tpu.vector_store %arg8[%c0_12, %c0_13, %c0_14], %26 {strides = array<i32>} : memref<1x32x128xf32, #tpu.memory_space<vmem>>, vector<1x32x128xf32>,
    %c0_15 = arith.constant 0 : index
    %c0_16 = arith.constant 0 : index
    %c0_17 = arith.constant 0 : index
    %27 = vector.load %arg2[%c0_15, %c0_16, %c0_17] : memref<1x4x256xf32, #tpu.memory_space<vmem>>, vector<1x4x256xf32>
    %28 = vector.shape_cast %27 : vector<1x4x256xf32> to vector<4x256xf32>
    %29 = arith.truncf %28 : vector<4x256xf32> to vector<4x256xbf16>
    %cst_18 = arith.constant dense<0.000000e+00> : vector<64x256xf32>
    %30 = tpu.matmul %0, %29, %cst_18 {dimension_numbers = #tpu.dot_dimension_numbers<[1], [0], [0], [1], [0, 0, 1, 1], [], []>} : vector<64x4xbf16>, vector<4x256xbf16>, vector<64x256xf32> -> vector<64x256xf32>
    %31 = arith.addf %30, %1 : vector<64x256xf32>
    %32 = arith.truncf %31 : vector<64x256xf32> to vector<64x256xbf16>
    %33 = vector.extract_strided_slice %32 {offsets = [0, 0], sizes = [32, 256], strides = [1, 1]} : vector<64x256xbf16> to vector<32x256xbf16>
    %34 = vector.extract_strided_slice %32 {offsets = [32, 0], sizes = [32, 256], strides = [1, 1]} : vector<64x256xbf16> to vector<32x256xbf16>
    %cst_19 = arith.constant dense<0.000000e+00> : vector<128x256xf32>
    %35 = tpu.matmul %2, %33, %cst_19 {dimension_numbers = #tpu.dot_dimension_numbers<[1], [0], [0], [1], [0, 0, 1, 1], [], []>} : vector<128x32xbf16>, vector<32x256xbf16>, vector<128x256xf32> -> vector<128x256xf32>
    %cst_20 = arith.constant dense<0xFF800000> : vector<128xf32>
    %36 = vector.multi_reduction <maximumf>, %35, %cst_20 [1] : vector<128x256xf32> to vector<128xf32>
    %37 = vector.shape_cast %36 : vector<128xf32> to vector<128x1xf32>
    %38 = vector.broadcast %37 : vector<128x1xf32> to vector<128x256xf32>
    %39 = arith.subf %35, %38 : vector<128x256xf32>
    %40 = math.exp %39 : vector<128x256xf32>
    %cst_21 = arith.constant dense<0.000000e+00> : vector<128xf32>
    %41 = vector.multi_reduction <add>, %40, %cst_21 [1] : vector<128x256xf32> to vector<128xf32>
    %42 = vector.shape_cast %41 : vector<128xf32> to vector<128x1xf32>
    %43 = tpu.reciprocal %42 {approx = true} : vector<128x1xf32> -> vector<128x1xf32>
    %44 = vector.broadcast %43 : vector<128x1xf32> to vector<128x256xf32>
    %45 = arith.mulf %40, %44 : vector<128x256xf32>
    %46 = arith.truncf %45 : vector<128x256xf32> to vector<128x256xbf16>
    %cst_22 = arith.constant dense<0.000000e+00> : vector<32x128xf32>
    %47 = tpu.matmul %34, %46, %cst_22 {dimension_numbers = #tpu.dot_dimension_numbers<[1], [1], [0], [0], [0, 0, 1, 0], [], []>} : vector<32x256xbf16>, vector<128x256xbf16>, vector<32x128xf32> -> vector<32x128xf32>
    %c0_23 = arith.constant 0 : index
    %c0_24 = arith.constant 0 : index
    %c0_25 = arith.constant 0 : index
    %48 = vector.load %arg9[%c0_23, %c0_24, %c0_25] : memref<1x32x128xf32, #tpu.memory_space<vmem>>, vector<1x32x128xf32>
    %49 = vector.shape_cast %48 : vector<1x32x128xf32> to vector<32x128xf32>
    %50 = vector.shape_cast %47 : vector<32x128xf32> to vector<1x32x128xf32>
    tpu.vector_store %arg9[%c0_23, %c0_24, %c0_25], %50 {strides = array<i32>} : memref<1x32x128xf32, #tpu.memory_space<vmem>>, vector<1x32x128xf32>,
    %c0_26 = arith.constant 0 : index
    %c0_27 = arith.constant 0 : index
    %c0_28 = arith.constant 0 : index
    %51 = vector.load %arg3[%c0_26, %c0_27, %c0_28] : memref<1x4x256xf32, #tpu.memory_space<vmem>>, vector<1x4x256xf32>
    %52 = vector.shape_cast %51 : vector<1x4x256xf32> to vector<4x256xf32>
    %53 = arith.truncf %52 : vector<4x256xf32> to vector<4x256xbf16>
    %cst_29 = arith.constant dense<0.000000e+00> : vector<64x256xf32>
    %54 = tpu.matmul %0, %53, %cst_29 {dimension_numbers = #tpu.dot_dimension_numbers<[1], [0], [0], [1], [0, 0, 1, 1], [], []>} : vector<64x4xbf16>, vector<4x256xbf16>, vector<64x256xf32> -> vector<64x256xf32>
    %55 = arith.addf %54, %1 : vector<64x256xf32>
    %56 = arith.truncf %55 : vector<64x256xf32> to vector<64x256xbf16>
    %57 = vector.extract_strided_slice %56 {offsets = [0, 0], sizes = [32, 256], strides = [1, 1]} : vector<64x256xbf16> to vector<32x256xbf16>
    %58 = vector.extract_strided_slice %56 {offsets = [32, 0], sizes = [32, 256], strides = [1, 1]} : vector<64x256xbf16> to vector<32x256xbf16>
    %cst_30 = arith.constant dense<0.000000e+00> : vector<128x256xf32>
    %59 = tpu.matmul %2, %57, %cst_30 {dimension_numbers = #tpu.dot_dimension_numbers<[1], [0], [0], [1], [0, 0, 1, 1], [], []>} : vector<128x32xbf16>, vector<32x256xbf16>, vector<128x256xf32> -> vector<128x256xf32>
    %cst_31 = arith.constant dense<0xFF800000> : vector<128xf32>
    %60 = vector.multi_reduction <maximumf>, %59, %cst_31 [1] : vector<128x256xf32> to vector<128xf32>
    %61 = vector.shape_cast %60 : vector<128xf32> to vector<128x1xf32>
    %62 = vector.broadcast %61 : vector<128x1xf32> to vector<128x256xf32>
    %63 = arith.subf %59, %62 : vector<128x256xf32>
    %64 = math.exp %63 : vector<128x256xf32>
    %cst_32 = arith.constant dense<0.000000e+00> : vector<128xf32>
    %65 = vector.multi_reduction <add>, %64, %cst_32 [1] : vector<128x256xf32> to vector<128xf32>
    %66 = vector.shape_cast %65 : vector<128xf32> to vector<128x1xf32>
    %67 = tpu.reciprocal %66 {approx = true} : vector<128x1xf32> -> vector<128x1xf32>
    %68 = vector.broadcast %67 : vector<128x1xf32> to vector<128x256xf32>
    %69 = arith.mulf %64, %68 : vector<128x256xf32>
    %70 = arith.truncf %69 : vector<128x256xf32> to vector<128x256xbf16>
    %cst_33 = arith.constant dense<0.000000e+00> : vector<32x128xf32>
    %71 = tpu.matmul %58, %70, %cst_33 {dimension_numbers = #tpu.dot_dimension_numbers<[1], [1], [0], [0], [0, 0, 1, 0], [], []>} : vector<32x256xbf16>, vector<128x256xbf16>, vector<32x128xf32> -> vector<32x128xf32>
    %c0_34 = arith.constant 0 : index
    %c0_35 = arith.constant 0 : index
    %c0_36 = arith.constant 0 : index
    %72 = vector.load %arg10[%c0_34, %c0_35, %c0_36] : memref<1x32x128xf32, #tpu.memory_space<vmem>>, vector<1x32x128xf32>
    %73 = vector.shape_cast %72 : vector<1x32x128xf32> to vector<32x128xf32>
    %74 = vector.shape_cast %71 : vector<32x128xf32> to vector<1x32x128xf32>
    tpu.vector_store %arg10[%c0_34, %c0_35, %c0_36], %74 {strides = array<i32>} : memref<1x32x128xf32, #tpu.memory_space<vmem>>, vector<1x32x128xf32>,
    %c0_37 = arith.constant 0 : index
    %c0_38 = arith.constant 0 : index
    %c0_39 = arith.constant 0 : index
    %75 = vector.load %arg4[%c0_37, %c0_38, %c0_39] : memref<1x4x256xf32, #tpu.memory_space<vmem>>, vector<1x4x256xf32>
    %76 = vector.shape_cast %75 : vector<1x4x256xf32> to vector<4x256xf32>
    %77 = arith.truncf %76 : vector<4x256xf32> to vector<4x256xbf16>
    %cst_40 = arith.constant dense<0.000000e+00> : vector<64x256xf32>
    %78 = tpu.matmul %0, %77, %cst_40 {dimension_numbers = #tpu.dot_dimension_numbers<[1], [0], [0], [1], [0, 0, 1, 1], [], []>} : vector<64x4xbf16>, vector<4x256xbf16>, vector<64x256xf32> -> vector<64x256xf32>
    %79 = arith.addf %78, %1 : vector<64x256xf32>
    %80 = arith.truncf %79 : vector<64x256xf32> to vector<64x256xbf16>
    %81 = vector.extract_strided_slice %80 {offsets = [0, 0], sizes = [32, 256], strides = [1, 1]} : vector<64x256xbf16> to vector<32x256xbf16>
    %82 = vector.extract_strided_slice %80 {offsets = [32, 0], sizes = [32, 256], strides = [1, 1]} : vector<64x256xbf16> to vector<32x256xbf16>
    %cst_41 = arith.constant dense<0.000000e+00> : vector<128x256xf32>
    %83 = tpu.matmul %2, %81, %cst_41 {dimension_numbers = #tpu.dot_dimension_numbers<[1], [0], [0], [1], [0, 0, 1, 1], [], []>} : vector<128x32xbf16>, vector<32x256xbf16>, vector<128x256xf32> -> vector<128x256xf32>
    %cst_42 = arith.constant dense<0xFF800000> : vector<128xf32>
    %84 = vector.multi_reduction <maximumf>, %83, %cst_42 [1] : vector<128x256xf32> to vector<128xf32>
    %85 = vector.shape_cast %84 : vector<128xf32> to vector<128x1xf32>
    %86 = vector.broadcast %85 : vector<128x1xf32> to vector<128x256xf32>
    %87 = arith.subf %83, %86 : vector<128x256xf32>
    %88 = math.exp %87 : vector<128x256xf32>
    %cst_43 = arith.constant dense<0.000000e+00> : vector<128xf32>
    %89 = vector.multi_reduction <add>, %88, %cst_43 [1] : vector<128x256xf32> to vector<128xf32>
    %90 = vector.shape_cast %89 : vector<128xf32> to vector<128x1xf32>
    %91 = tpu.reciprocal %90 {approx = true} : vector<128x1xf32> -> vector<128x1xf32>
    %92 = vector.broadcast %91 : vector<128x1xf32> to vector<128x256xf32>
    %93 = arith.mulf %88, %92 : vector<128x256xf32>
    %94 = arith.truncf %93 : vector<128x256xf32> to vector<128x256xbf16>
    %cst_44 = arith.constant dense<0.000000e+00> : vector<32x128xf32>
    %95 = tpu.matmul %82, %94, %cst_44 {dimension_numbers = #tpu.dot_dimension_numbers<[1], [1], [0], [0], [0, 0, 1, 0], [], []>} : vector<32x256xbf16>, vector<128x256xbf16>, vector<32x128xf32> -> vector<32x128xf32>
    %c0_45 = arith.constant 0 : index
    %c0_46 = arith.constant 0 : index
    %c0_47 = arith.constant 0 : index
    %96 = vector.load %arg11[%c0_45, %c0_46, %c0_47] : memref<1x32x128xf32, #tpu.memory_space<vmem>>, vector<1x32x128xf32>
    %97 = vector.shape_cast %96 : vector<1x32x128xf32> to vector<32x128xf32>
    %98 = vector.shape_cast %95 : vector<32x128xf32> to vector<1x32x128xf32>
    tpu.vector_store %arg11[%c0_45, %c0_46, %c0_47], %98 {strides = array<i32>} : memref<1x32x128xf32, #tpu.memory_space<vmem>>, vector<1x32x128xf32>,
    return
  }
  func.func @transform_0(%arg0: i32) -> (i32, i32, i32) {
    %c0_i32 = arith.constant 0 : i32
    %c0_i32_0 = arith.constant 0 : i32
    %c0_i32_1 = arith.constant 0 : i32
    return %arg0, %c0_i32, %c0_i32_0 : i32, i32, i32
  }
  func.func @transform_1(%arg0: i32) -> (i32, i32, i32) {
    %c0_i32 = arith.constant 0 : i32
    %c0_i32_0 = arith.constant 0 : i32
    %c0_i32_1 = arith.constant 0 : i32
    return %arg0, %c0_i32, %c0_i32_0 : i32, i32, i32
  }
  func.func @transform_2(%arg0: i32) -> (i32, i32, i32) {
    %c0_i32 = arith.constant 0 : i32
    %c0_i32_0 = arith.constant 0 : i32
    %c0_i32_1 = arith.constant 0 : i32
    return %arg0, %c0_i32, %c0_i32_0 : i32, i32, i32
  }
  func.func @transform_3(%arg0: i32) -> (i32, i32, i32) {
    %c0_i32 = arith.constant 0 : i32
    %c0_i32_0 = arith.constant 0 : i32
    %c0_i32_1 = arith.constant 0 : i32
    return %arg0, %c0_i32, %c0_i32_0 : i32, i32, i32
  }
  func.func @transform_4(%arg0: i32) -> (i32, i32) {
    %c0_i32 = arith.constant 0 : i32
    %c0_i32_0 = arith.constant 0 : i32
    %c0_i32_1 = arith.constant 0 : i32
    return %c0_i32, %c0_i32_0 : i32, i32
  }
  func.func @transform_5(%arg0: i32) -> (i32, i32) {
    %c0_i32 = arith.constant 0 : i32
    %c0_i32_0 = arith.constant 0 : i32
    %c0_i32_1 = arith.constant 0 : i32
    return %c0_i32, %c0_i32_0 : i32, i32
  }
  func.func @transform_6(%arg0: i32) -> (i32, i32) {
    %c0_i32 = arith.constant 0 : i32
    %c0_i32_0 = arith.constant 0 : i32
    %c0_i32_1 = arith.constant 0 : i32
    return %c0_i32, %c0_i32_0 : i32, i32
  }
  func.func @transform_7(%arg0: i32) -> (i32, i32, i32) {
    %c0_i32 = arith.constant 0 : i32
    %c0_i32_0 = arith.constant 0 : i32
    %c0_i32_1 = arith.constant 0 : i32
    return %arg0, %c0_i32, %c0_i32_0 : i32, i32, i32
  }
  func.func @transform_8(%arg0: i32) -> (i32, i32, i32) {
    %c0_i32 = arith.constant 0 : i32
    %c0_i32_0 = arith.constant 0 : i32
    %c0_i32_1 = arith.constant 0 : i32
    return %arg0, %c0_i32, %c0_i32_0 : i32, i32, i32
  }
  func.func @transform_9(%arg0: i32) -> (i32, i32, i32) {
    %c0_i32 = arith.constant 0 : i32
    %c0_i32_0 = arith.constant 0 : i32
    %c0_i32_1 = arith.constant 0 : i32
    return %arg0, %c0_i32, %c0_i32_0 : i32, i32, i32
  }
  func.func @transform_10(%arg0: i32) -> (i32, i32, i32) {
    %c0_i32 = arith.constant 0 : i32
    %c0_i32_0 = arith.constant 0 : i32
    %c0_i32_1 = arith.constant 0 : i32
    return %arg0, %c0_i32, %c0_i32_0 : i32, i32, i32
  }
}

</mosaic_0001>

<bundles_post_ra>
// kernel: _inverse_net_forward.1
= control target key start
LH: loop header
LB: loop body
LE: loop exit
PB: predicated region body
PF: predicated region fallthrough
CT: control target
= control target key end

     0   :  { %s3529_s13 = smov 0   ;;  %s5102_s0 = inlined_call_operand.vmem [shape: f32[2,4,256], index: 0, kind: input, shape index: {}]   ;;  %s5103_s1 = inlined_call_operand.vmem [shape: f32[2,4,256], index: 1, kind: input, shape index: {}]   ;;  %s5104_s2 = inlined_call_operand.vmem [shape: f32[2,4,256], index: 2, kind: input, shape index: {}]   ;;  %s5105_s3 = inlined_call_operand.vmem [shape: f32[2,4,256], index: 3, kind: input, shape index: {}]   ;;  %s5106_s4 = inlined_call_operand.vmem [shape: bf16[64,4], index: 4, kind: input, shape index: {}]   ;;  %s5107_s5 = inlined_call_operand.vmem [shape: f32[64,256], index: 5, kind: input, shape index: {}]   ;;  %s5108_s6 = inlined_call_operand.vmem [shape: bf16[128,32], index: 6, kind: input, shape index: {}]   ;;  %s5109_s7 = inlined_call_operand.vmem [shape: f32[2,32,128], index: 7, kind: output, shape index: {0}]   ;;  %s5110_s8 = inlined_call_operand.vmem [shape: f32[2,32,128], index: 8, kind: output, shape index: {1}]   ;;  %s5111_s9 = inlined_call_operand.vmem [shape: f32[2,32,128], index: 9, kind: output, shape index: {2}]   ;;  %s5112_s10 = inlined_call_operand.vmem [shape: f32[2,32,128], index: 10, kind: output, shape index: {3}]  }
   0x1 LB: > { %s2855_s14 = sadd.s32 4294967295, %s3472_s13   ;;  %p2859_p0 = scmp.ge.s32.totalorder %s3472_s13, 1  ;;  %s3472_s13 = sphi %s3529_s13, %s21_s13  }
   0x2   : > { %p349_p1 = scmp.lt.s32.totalorder %s3472_s13, 3 }
   0x4   : > { %p350_p2 = pnand %p2859_p0, %p349_p1 }
   0x6   : > { %353 = sbr.rel (%p350_p2) target bundleno = 3303 (0xce7), region = 48 }
   0xb   : > { %p417_p3 = scmp.lt.s32.totalorder %s2855_s14, 1  ;;  %vm540_vm0 = vcmask 1041408   ;;  %v3555_v8 = vld [vmem:[%s5106_s4] sm:$0xff]  ;;  %vm527_vm1 = vcmask 31744   ;;  %v3564_v9 = vld [vmem:[%s5106_s4 + $0x8] sm:$0xff]  ;;  %v3583_v18 = vld [vmem:[%s5107_s5 + $0x10] sm:$0xff] }
   0xc   : > { %v3573_v16 = vld [vmem:[%s5107_s5 + $0x20] sm:$0xff]  ;;  %v3578_v17 = vld [vmem:[%s5107_s5 + $0x28] sm:$0xff]  ;;  %v3588_v19 = vld [vmem:[%s5107_s5 + $0x18] sm:$0xff]  ;;  %vm673_vm2 = vcmask 261120  }
   0xd   : > { %s5177_s14 = smov (!%p417_p3, %s2855_s14), 1  ;;  %v3593_v20 = vld [vmem:[%s5107_s5] sm:$0xff]  ;;  %v3598_v21 = vld [vmem:[%s5107_s5 + $0x8] sm:$0xff]  ;;  %v3605_v24 = vld [vmem:[%s5107_s5 + $0x30] sm:$0xff] }
   0xe   : > { %s3540_s15 = sshll.u32 %s5177_s14, 3  ;;  %v3610_v25 = vld [vmem:[%s5107_s5 + $0x38] sm:$0xff]  ;;  %v3621_v50 = vld [vmem:[%s5108_s6] sm:$0xff]  ;;  %v3630_v51 = vld [vmem:[%s5108_s6 + $0x8] sm:$0xff]  ;;  %s4077_s30 = sshll.u32 %s5177_s14, 5 }
   0xf   : > { %s421_s18 = scalar_lea.vmem %s5102_s0, %s3540_s15  ;;  %s426_s21 = scalar_lea.vmem %s5103_s1, %s3540_s15  ;;  %v3639_v52 = vld [vmem:[%s5108_s6 + $0x10] sm:$0xff]  ;;  %v3648_v53 = vld [vmem:[%s5108_s6 + $0x18] sm:$0xff]  ;;  %v3657_v54 = vld [vmem:[%s5108_s6 + $0x20] sm:$0xff] }
  0x10   : > { %v498_v0 = vld [vmem:[%s421_s18] sm:$0xff]  ;;  %v3666_v55 = vld [vmem:[%s5108_s6 + $0x28] sm:$0xff]  ;;  %v3675_v56 = vld [vmem:[%s5108_s6 + $0x30] sm:$0xff]  ;;  %s431_s26 = scalar_lea.vmem %s5104_s2, %s3540_s15  ;;  %s441_s16 = scalar_lea.vmem %s5109_s7, %s4077_s30 }
  0x11   : > { %500 = vst [vmem:[#allocation1] ss:$2 sm:$0xff] %v498_v0  ;;  %v1114_v1 = vld [vmem:[%s426_s21] sm:$0xff]  ;;  %v3684_v57 = vld [vmem:[%s5108_s6 + $0x38] sm:$0xff]  ;;  %s436_s18 = scalar_lea.vmem %s5105_s3, %s3540_s15  ;;  %s446_s28 = scalar_lea.vmem %s5110_s8, %s4077_s30 }
  0x12   : > { %5140 = vst [vmem:[#allocation2_spill] sm:$0xff] %v3684_v57  ;;  %s451_s25 = scalar_lea.vmem %s5111_s9, %s4077_s30 }
  0x18   : > { %v501_v2 = vld.sshfl [vmem:[#allocation1] sm:$0xff pattern:$0x75316420]  ;;  %v502_v3 = vld.sshfl [vmem:[#allocation1 + $0x8] sm:$0xff pattern:$0x75316420] }
  0x19   : > { %v505_v4 = vpack.c.bf16 %v501_v2, %v501_v2  ;;  %v506_v5 = vpack.c.bf16 %v502_v3, %v502_v3  ;;  %1116 = vst [vmem:[#allocation1] ss:$2 sm:$0xff] %v1114_v1 }
  0x1b   : > { %v542_v6 = vsel %vm540_vm0, %v505_v4, 0  ;;  %v545_v7 = vsel %vm540_vm0, %v506_v5, 0 }
  0x1c   : > { %554 = vmatpush.bf16.msra.mxu0 %v542_v6  ;;  %583 = vmatpush.bf16.msra.mxu1 %v545_v7 }
  0x1f   : > { %2892 = vmatmul.msk.bf16.vlgmr.msra.gmra.mxu0 %vm527_vm1, %v3555_v8  ;;  %2896 = vmatmul.msk.bf16.vlgmr.msra.gmra.mxu1 %vm527_vm1, %v3555_v8 }
  0x2f   : > { %2893 = vmatmul.msk.bf16.gmra.mxu0 %vm527_vm1, %v3564_v9  ;;  %2897 = vmatmul.msk.bf16.gmra.mxu1 %vm527_vm1, %v3564_v9 }
  0x9c   : > { %v556_v10 = vpop.f32.mrf.mxu0  ;;  %v585_v11 = vpop.f32.mrf.mxu1 }
  0x9d   : > { %v557_v28 = vadd.f32 %v556_v10, %v3593_v20  ;;  %v586_v29 = vadd.f32 %v585_v11, %v3598_v21 }
  0x9f   : > { %v605_v37 = vpack.c.bf16 %v586_v29, %v557_v28 }
  0xa1   : > { %v657_v46 = vunpack.c.l.b16 %v605_v37  ;;  %v658_v47 = vunpack.c.h.b16 %v605_v37 }
  0xa4   : > { %v558_v12 = vpop.f32.mrf.mxu0  ;;  %v587_v13 = vpop.f32.mrf.mxu1 }
  0xa5   : > { %v559_v26 = vadd.f32 %v558_v12, %v3583_v18  ;;  %v588_v27 = vadd.f32 %v587_v13, %v3588_v19 }
  0xa7   : > { %v606_v35 = vpack.c.bf16 %v588_v27, %v559_v26 }
  0xa9   : > { %v659_v44 = vunpack.c.l.b16 %v606_v35  ;;  %v660_v45 = vunpack.c.h.b16 %v606_v35 }
  0xab   : > { %v665_v48 = vpack.c.b16 %v659_v44, %v657_v46  ;;  %v666_v49 = vpack.c.b16 %v660_v45, %v658_v47 }
  0xac   : > { %v561_v14 = vpop.f32.mrf.mxu0  ;;  %v590_v15 = vpop.f32.mrf.mxu1 }
  0xad   : > { %v562_v22 = vadd.f32 %v561_v14, %v3573_v16  ;;  %v591_v23 = vadd.f32 %v590_v15, %v3578_v17 }
  0xaf   : > { %v607_v32 = vpack.c.bf16 %v591_v23, %v562_v22 }
  0xb1   : > { %v661_v38 = vunpack.c.l.b16 %v607_v32  ;;  %v662_v40 = vunpack.c.h.b16 %v607_v32 }
  0xb4   : > { %v563_v30 = vpop.f32.mrf.mxu0  ;;  %v592_v31 = vpop.f32.mrf.mxu1 }
  0xb5   : > { %v564_v33 = vadd.f32 %v563_v30, %v3605_v24  ;;  %v593_v34 = vadd.f32 %v592_v31, %v3610_v25 }
  0xb7   : > { %v608_v36 = vpack.c.bf16 %v593_v34, %v564_v33 }
  0xb9   : > { %v663_v39 = vunpack.c.l.b16 %v608_v36  ;;  %v664_v41 = vunpack.c.h.b16 %v608_v36 }
  0xbb   : > { %v667_v42 = vpack.c.b16 %v663_v39, %v661_v38  ;;  %v668_v43 = vpack.c.b16 %v664_v41, %v662_v40 }
  0xbd   : > { %704 = vmatpush.bf16.msra.mxu2 %v667_v42  ;;  %753 = vmatpush.bf16.msra.mxu3 %v668_v43 }
  0xc1   : > { %705 = vmatpush.bf16.msra.mxu2 %v665_v48  ;;  %754 = vmatpush.bf16.msra.mxu3 %v666_v49 }
  0xc4   : > { %2932 = vmatmul.msk.bf16.vlgmr.msra.gmra.mxu2 %vm673_vm2, %v3621_v50  ;;  %2940 = vmatmul.msk.bf16.vlgmr.msra.gmra.mxu3 %vm673_vm2, %v3621_v50 }
  0xd4   : > { %2933 = vmatmul.msk.bf16.gmra.mxu2 %vm673_vm2, %v3630_v51  ;;  %2941 = vmatmul.msk.bf16.gmra.mxu3 %vm673_vm2, %v3630_v51 }
  0xe4   : > { %2934 = vmatmul.msk.bf16.gmra.mxu2 %vm673_vm2, %v3639_v52  ;;  %2942 = vmatmul.msk.bf16.gmra.mxu3 %vm673_vm2, %v3639_v52 }
  0xf4   : > { %2935 = vmatmul.msk.bf16.gmra.mxu2 %vm673_vm2, %v3648_v53  ;;  %2943 = vmatmul.msk.bf16.gmra.mxu3 %vm673_vm2, %v3648_v53 }
 0x104   : > { %2936 = vmatmul.msk.bf16.gmra.mxu2 %vm673_vm2, %v3657_v54  ;;  %2944 = vmatmul.msk.bf16.gmra.mxu3 %vm673_vm2, %v3657_v54 }
 0x114   : > { %2937 = vmatmul.msk.bf16.gmra.mxu2 %vm673_vm2, %v3666_v55  ;;  %2945 = vmatmul.msk.bf16.gmra.mxu3 %vm673_vm2, %v3666_v55 }
 0x124   : > { %2938 = vmatmul.msk.bf16.gmra.mxu2 %vm673_vm2, %v3675_v56  ;;  %2946 = vmatmul.msk.bf16.gmra.mxu3 %vm673_vm2, %v3675_v56 }
 0x134   : > { %2939 = vmatmul.msk.bf16.gmra.mxu2 %vm673_vm2, %v3684_v57  ;;  %2947 = vmatmul.msk.bf16.gmra.mxu3 %vm673_vm2, %v3684_v57 }
 0x147   : > { %v3690_v58 = vpop.f32.mrf.mxu2  ;;  %v3692_v59 = vpop.f32.mrf.mxu3 }
 0x148   : > { %v796_v48 = vmax.f32 %v3690_v58, %v3692_v59 }
 0x14f   : > { %v3694_v60 = vpop.f32.mrf.mxu2  ;;  %v3696_v61 = vpop.f32.mrf.mxu3 }
 0x157   : > { %v3698_v62 = vpop.f32.mrf.mxu2  ;;  %v3700_v63 = vpop.f32.mrf.mxu3 }
 0x15f   : > { %v3702_v0 = vpop.f32.mrf.mxu2  ;;  %v3704_v1 = vpop.f32.mrf.mxu3 }
 0x160   : > { %v805_v46 = vmax.f32 %v3702_v0, %v3704_v1 }
 0x167   : > { %v3706_v2 = vpop.f32.mrf.mxu2  ;;  %v3708_v3 = vpop.f32.mrf.mxu3 }
 0x168   : > { %v808_v44 = vmax.f32 %v3706_v2, %v3708_v3 }
 0x16f   : > { %v3710_v4 = vpop.f32.mrf.mxu2  ;;  %v3712_v5 = vpop.f32.mrf.mxu3 }
 0x170   : > { %v811_v36 = vmax.f32 %v3710_v4, %v3712_v5 }
 0x177   : > { %v3714_v6 = vpop.f32.mrf.mxu2  ;;  %v3716_v7 = vpop.f32.mrf.mxu3 }
 0x178   : > { %v814_v32 = vmax.f32 %v3714_v6, %v3716_v7 }
 0x17f   : > { %v3718_v10 = vpop.f32.mrf.mxu2  ;;  %v3720_v11 = vpop.f32.mrf.mxu3 }
 0x180   : > { %v817_v49 = vmax.f32 %v3718_v10, %v3720_v11 }
 0x187   : > { %v3722_v12 = vpop.f32.mrf.mxu2  ;;  %v3724_v13 = vpop.f32.mrf.mxu3 }
 0x188   : > { %v820_v47 = vmax.f32 %v3722_v12, %v3724_v13 }
 0x18f   : > { %v3726_v14 = vpop.f32.mrf.mxu2  ;;  %v3728_v15 = vpop.f32.mrf.mxu3 }
 0x190   : > { %v823_v40 = vmax.f32 %v3726_v14, %v3728_v15 }
 0x197   : > { %v3730_v22 = vpop.f32.mrf.mxu2  ;;  %v3732_v23 = vpop.f32.mrf.mxu3 }
 0x198   : > { %v826_v26 = vmax.f32 %v3730_v22, %v3732_v23 }
 0x19a   : > { %827 = vmax.xlane.f32.xlu2 %v826_v26  ;;  %v802_v26 = vmax.f32 %v3698_v62, %v3700_v63 }
 0x19f   : > { %v3736_v27 = vpop.f32.mrf.mxu2  ;;  %v3738_v28 = vpop.f32.mrf.mxu3 }
 0x1a0   : > { %v829_v29 = vmax.f32 %v3736_v27, %v3738_v28 }
 0x1a2   : > { %830 = vmax.xlane.f32.xlu2 %v829_v29 }
 0x1a7   : > { %v3742_v30 = vpop.f32.mrf.mxu2  ;;  %v3744_v31 = vpop.f32.mrf.mxu3 }
 0x1a8   : > { %v832_v33 = vmax.f32 %v3742_v30, %v3744_v31 }
 0x1aa   : > { %815 = vmax.xlane.f32.xlu2 %v814_v32  ;;  %833 = vmax.xlane.f32.xlu1 %v832_v33 }
 0x1af   : > { %v739_v34 = vpop.f32.mrf.mxu2  ;;  %v788_v35 = vpop.f32.mrf.mxu3 }
 0x1b0   : > { %v835_v37 = vmax.f32 %v739_v34, %v788_v35 }
 0x1b2   : > { %812 = vmax.xlane.f32.xlu2 %v811_v36  ;;  %836 = vmax.xlane.f32.xlu1 %v835_v37 }
 0x1b7   : > { %v742_v38 = vpop.f32.mrf.mxu2  ;;  %v791_v39 = vpop.f32.mrf.mxu3 }
 0x1b8   : > { %v838_v41 = vmax.f32 %v742_v38, %v791_v39 }
 0x1ba   : > { %824 = vmax.xlane.f32.xlu1 %v823_v40  ;;  %839 = vmax.xlane.f32.xlu0 %v838_v41 }
 0x1bf   : > { %v744_v42 = vpop.f32.mrf.mxu2  ;;  %v793_v43 = vpop.f32.mrf.mxu3 }
 0x1c0   : > { %v841_v45 = vmax.f32 %v744_v42, %v793_v43 }
 0x1c2   : > { %809 = vmax.xlane.f32.xlu1 %v808_v44  ;;  %842 = vmax.xlane.f32.xlu0 %v841_v45 }
 0x1ca   : > { %806 = vmax.xlane.f32.xlu1 %v805_v46  ;;  %821 = vmax.xlane.f32.xlu0 %v820_v47 }
 0x1d2   : > { %797 = vmax.xlane.f32.xlu1 %v796_v48  ;;  %818 = vmax.xlane.f32.xlu0 %v817_v49 }
 0x1da   : > { %803 = vmax.xlane.f32.xlu0 %v802_v26 }
 0x20d   : > { %v828_v44 = vpop.xlane.xlu2 %827 }
 0x21d   : > { %v834_v29 = vpop.xlane.xlu1 %833 }
 0x225   : > { %v837_v32 = vpop.xlane.xlu1 %836 }
 0x226   : > { %v870_v33 = vsub.f32 %v739_v34, %v837_v32  ;;  %v871_v36 = vsub.f32 %v788_v35, %v837_v32 }
 0x228   : > { %v928_v37 = vmul.f32 1.442695, %v870_v33  ;;  %v930_v40 = vmul.f32 1.442695, %v871_v36  ;;  %v864_v33 = vsub.f32 %v3730_v22, %v828_v44  ;;  %v831_v36 = vpop.xlane.xlu2 %830 }
 0x22a   : > { %3054 = vpow2.f32 %v928_v37 }
 0x22b   : > { %3056 = vpow2.f32 %v930_v40 }
 0x22d   : > { %v840_v41 = vpop.xlane.xlu0 %839  ;;  %v825_v37 = vpop.xlane.xlu1 %824 }
 0x22e   : > { %v872_v45 = vsub.f32 %v742_v38, %v840_v41  ;;  %v873_v46 = vsub.f32 %v791_v39, %v840_v41  ;;  %v865_v39 = vsub.f32 %v3732_v23, %v828_v44 }
 0x230   : > { %v932_v47 = vmul.f32 1.442695, %v872_v45  ;;  %v934_v57 = vmul.f32 1.442695, %v873_v46  ;;  %v3766_v48 = vpop.eup %3054  ;;  %v868_v45 = vsub.f32 %v3742_v30, %v834_v29  ;;  %v918_v22 = vmul.f32 1.442695, %v865_v39 }
 0x231   : > { %v3768_v49 = vpop.eup %3056  ;;  %v866_v30 = vsub.f32 %v3736_v27, %v831_v36  ;;  %v799_v27 = vmax.f32 %v3694_v60, %v3696_v61 }
 0x232   : > { %3058 = vpow2.f32 %v932_v47  ;;  %v979_v26 = vadd.f32 %v3768_v49, %v3766_v48  ;;  %v916_v47 = vmul.f32 1.442695, %v864_v33  ;;  %v816_v33 = vpop.xlane.xlu2 %815 }
 0x233   : > { %3060 = vpow2.f32 %v934_v57  ;;  %v869_v57 = vsub.f32 %v3744_v31, %v834_v29  ;;  %v867_v31 = vsub.f32 %v3738_v28, %v831_v36 }
 0x234   : > { %980 = vadd.xlane.f32.xlu1 %v979_v26  ;;  %v924_v26 = vmul.f32 1.442695, %v868_v45 }
 0x235   : > { %v843_v34 = vpop.xlane.xlu0 %842  ;;  %v922_v36 = vmul.f32 1.442695, %v867_v31 }
 0x236   : > { %v874_v35 = vsub.f32 %v744_v42, %v843_v34  ;;  %v875_v32 = vsub.f32 %v793_v43, %v843_v34  ;;  %v926_v34 = vmul.f32 1.442695, %v869_v57 }
 0x238   : > { %v936_v38 = vmul.f32 1.442695, %v874_v35  ;;  %v938_v40 = vmul.f32 1.442695, %v875_v32  ;;  %v3774_v41 = vpop.eup %3058 }
 0x239   : > { %v3777_v46 = vpop.eup %3060 }
 0x23a   : > { %3062 = vpow2.f32 %v936_v38  ;;  %v982_v42 = vadd.f32 %v3777_v46, %v3774_v41  ;;  %v862_v38 = vsub.f32 %v3726_v14, %v825_v37  ;;  %v856_v14 = vsub.f32 %v3714_v6, %v816_v33 }
 0x23b   : > { %3064 = vpow2.f32 %v938_v40  ;;  %v920_v40 = vmul.f32 1.442695, %v866_v30 }
 0x23c   : > { %983 = vadd.xlane.f32.xlu2 %v982_v42  ;;  %3066 = vpow2.f32 %v916_v47  ;;  %v912_v47 = vmul.f32 1.442695, %v862_v38  ;;  %v857_v42 = vsub.f32 %v3716_v7, %v816_v33 }
 0x23d   : > { %v822_v43 = vpop.xlane.xlu0 %821  ;;  %3068 = vpow2.f32 %v918_v22 }
 0x23e   : > { %v860_v23 = vsub.f32 %v3722_v12, %v822_v43  ;;  %v861_v44 = vsub.f32 %v3724_v13, %v822_v43  ;;  %3070 = vpow2.f32 %v924_v26  ;;  %v863_v12 = vsub.f32 %v3728_v15, %v825_v37  ;;  %v810_v13 = vpop.xlane.xlu1 %809 }
 0x23f   : > { %3072 = vpow2.f32 %v926_v34  ;;  %v853_v6 = vsub.f32 %v3708_v3, %v810_v13 }
 0x240   : > { %v908_v35 = vmul.f32 1.442695, %v860_v23  ;;  %v910_v29 = vmul.f32 1.442695, %v861_v44  ;;  %v3786_v32 = vpop.eup %3062  ;;  %v914_v22 = vmul.f32 1.442695, %v863_v12  ;;  %v852_v23 = vsub.f32 %v3706_v2, %v810_v13  ;;  %v813_v2 = vpop.xlane.xlu2 %812 }
 0x241   : > { %v3789_v39 = vpop.eup %3064  ;;  %v894_v38 = vmul.f32 1.442695, %v853_v6 }
 0x242   : > { %3074 = vpow2.f32 %v908_v35  ;;  %v985_v28 = vadd.f32 %v3789_v39, %v3786_v32  ;;  %v3796_v57 = vpop.eup %3066  ;;  %v900_v35 = vmul.f32 1.442695, %v856_v14 }
 0x243   : > { %3076 = vpow2.f32 %v910_v29  ;;  %v3800_v37 = vpop.eup %3068  ;;  %v892_v29 = vmul.f32 1.442695, %v852_v23 }
 0x244   : > { %800 = vmax.xlane.f32.xlu2 %v799_v27  ;;  %986 = vadd.xlane.f32.xlu0 %v985_v28  ;;  %v3804_v26 = vpop.eup %3070  ;;  %3078 = vpow2.f32 %v920_v40  ;;  %v970_v31 = vadd.f32 %v3800_v37, %v3796_v57 }
 0x245   : > { %v819_v45 = vpop.xlane.xlu0 %818  ;;  %v3807_v34 = vpop.eup %3072  ;;  %3080 = vpow2.f32 %v922_v36  ;;  %v3831_v36 = vld [vmem:[%s5106_s4 + $0x10] sm:$0xff] }
 0x246   : > { %v858_v15 = vsub.f32 %v3718_v10, %v819_v45  ;;  %v859_v43 = vsub.f32 %v3720_v11, %v819_v45  ;;  %3082 = vpow2.f32 %v912_v47  ;;  %v902_v11 = vmul.f32 1.442695, %v857_v42  ;;  %v807_v12 = vpop.xlane.xlu1 %806  ;;  %v1117_v45 = vld.sshfl [vmem:[#allocation1] sm:$0xff pattern:$0x75316420]  ;;  %2894 = vmatmul.msk.bf16.gmra.mxu0 %vm527_vm1, %v3831_v36  ;;  %2898 = vmatmul.msk.bf16.gmra.mxu1 %vm527_vm1, %v3831_v36 }
 0x247   : > { %3084 = vpow2.f32 %v914_v22  ;;  %v976_v33 = vadd.f32 %v3807_v34, %v3804_v26  ;;  %v854_v47 = vsub.f32 %v3710_v4, %v813_v2  ;;  %v1118_v42 = vld.sshfl [vmem:[#allocation1 + $0x8] sm:$0xff pattern:$0x75316420]  ;;  %v1631_v22 = vld [vmem:[%s431_s26] sm:$0xff]  ;;  %v855_v4 = vsub.f32 %v3712_v5, %v813_v2 }
 0x248   : > { %v904_v44 = vmul.f32 1.442695, %v858_v15  ;;  %v906_v10 = vmul.f32 1.442695, %v859_v43  ;;  %v3810_v30 = vpop.eup %3074  ;;  %v1121_v15 = vpack.c.bf16 %v1117_v45, %v1117_v45  ;;  %v1122_v23 = vpack.c.bf16 %v1118_v42, %v1118_v42  ;;  %1633 = vst [vmem:[#allocation1] ss:$2 sm:$0xff] %v1631_v22 }
 0x249   : > { %v3812_v7 = vpop.eup %3076  ;;  %v896_v5 = vmul.f32 1.442695, %v854_v47 }
 0x24a   : > { %3086 = vpow2.f32 %v904_v44  ;;  %v964_v3 = vadd.f32 %v3812_v7, %v3810_v30  ;;  %v3824_v40 = vpop.eup %3078  ;;  %v1124_v6 = vsel %vm540_vm0, %v1121_v15, 0 }
 0x24b   : > { %3088 = vpow2.f32 %v906_v10  ;;  %v3833_v14 = vpop.eup %3080  ;;  %1136 = vmatpush.bf16.msrb.mxu0 %v1124_v6 }
 0x24c   : > { %3090 = vpow2.f32 %v900_v35  ;;  %971 = vadd.xlane.f32.xlu2 %v970_v31  ;;  %977 = vadd.xlane.f32.xlu0 %v976_v33  ;;  %v3836_v43 = vpop.eup %3082  ;;  %v850_v35 = vsub.f32 %v3702_v0, %v807_v12 }
 0x24d   : > { %v804_v13 = vpop.xlane.xlu0 %803  ;;  %3092 = vpow2.f32 %v902_v11  ;;  %965 = vadd.xlane.f32.xlu1 %v964_v3  ;;  %v3842_v44 = vpop.eup %3084  ;;  %v1127_v11 = vsel %vm540_vm0, %v1122_v23, 0  ;;  %v973_v3 = vadd.f32 %v3833_v14, %v3824_v40 }
 0x24e   : > { %v848_v27 = vsub.f32 %v3698_v62, %v804_v13  ;;  %v849_v28 = vsub.f32 %v3700_v63, %v804_v13  ;;  %3094 = vpow2.f32 %v892_v29  ;;  %v851_v29 = vsub.f32 %v3704_v1, %v807_v12  ;;  %1165 = vmatpush.bf16.msrb.mxu1 %v1127_v11  ;;  %v798_v45 = vpop.xlane.xlu1 %797 }
 0x24f   : > { %3096 = vpow2.f32 %v894_v38  ;;  %v967_v2 = vadd.f32 %v3842_v44, %v3836_v43  ;;  %v898_v13 = vmul.f32 1.442695, %v855_v4  ;;  %v888_v1 = vmul.f32 1.442695, %v850_v35  ;;  %v3033_v4 = vld [vmem:[%s5106_s4 + $0x18] sm:$0xff] }
 0x250   : > { %v884_v62 = vmul.f32 1.442695, %v848_v27  ;;  %v886_v63 = vmul.f32 1.442695, %v849_v28  ;;  %v3846_v10 = vpop.eup %3086  ;;  %v890_v28 = vmul.f32 1.442695, %v851_v29  ;;  %v844_v42 = vsub.f32 %v3690_v58, %v798_v45 }
 0x251   : > { %v3850_v31 = vpop.eup %3088  ;;  %v845_v22 = vsub.f32 %v3692_v59, %v798_v45 }
 0x252   : > { %3098 = vpow2.f32 %v884_v62  ;;  %v3853_v33 = vpop.eup %3090  ;;  %v961_v0 = vadd.f32 %v3850_v31, %v3846_v10  ;;  %v876_v35 = vmul.f32 1.442695, %v844_v42 }
 0x253   : > { %3100 = vpow2.f32 %v886_v63  ;;  %v3861_v38 = vpop.eup %3092  ;;  %v878_v59 = vmul.f32 1.442695, %v845_v22 }
 0x254   : > { %v3863_v27 = vpop.eup %3094  ;;  %968 = vadd.xlane.f32.xlu2 %v967_v2  ;;  %974 = vadd.xlane.f32.xlu0 %v973_v3  ;;  %3102 = vpow2.f32 %v896_v5  ;;  %v958_v23 = vadd.f32 %v3861_v38, %v3853_v33 }
 0x255   : > { %v3865_v12 = vpop.eup %3096  ;;  %962 = vadd.xlane.f32.xlu1 %v961_v0  ;;  %3104 = vpow2.f32 %v898_v13 }
 0x256   : > { %3106 = vpow2.f32 %v888_v1  ;;  %v952_v63 = vadd.f32 %v3865_v12, %v3863_v27  ;;  %2895 = vmatmul.msk.bf16.gmra.mxu0 %vm527_vm1, %v3033_v4  ;;  %2899 = vmatmul.msk.bf16.gmra.mxu1 %vm527_vm1, %v3033_v4 }
 0x257   : > { %3108 = vpow2.f32 %v890_v28 }
 0x258   : > { %v3867_v47 = vpop.eup %3098  ;;  %3110 = vpow2.f32 %v876_v35 }
 0x259   : > { %v3869_v15 = vpop.eup %3100  ;;  %3112 = vpow2.f32 %v878_v59 }
 0x25a   : > { %v946_v62 = vadd.f32 %v3869_v15, %v3867_v47  ;;  %v3882_v6 = vpop.eup %3102 }
 0x25b   : > { %v3884_v58 = vpop.eup %3104 }
 0x25c   : > { %953 = vadd.xlane.f32.xlu2 %v952_v63  ;;  %959 = vadd.xlane.f32.xlu0 %v958_v23  ;;  %v3886_v11 = vpop.eup %3106  ;;  %v955_v2 = vadd.f32 %v3884_v58, %v3882_v6 }
 0x25d   : > { %947 = vadd.xlane.f32.xlu1 %v946_v62  ;;  %v3890_v29 = vpop.eup %3108 }
 0x25e   : > { %v949_v5 = vadd.f32 %v3890_v29, %v3886_v11  ;;  %v3896_v3 = vpop.eup %3110 }
 0x25f   : > { %v3898_v0 = vpop.eup %3112 }
 0x260   : > { %v940_v13 = vadd.f32 %v3898_v0, %v3896_v3 }
 0x264   : > { %950 = vadd.xlane.f32.xlu2 %v949_v5  ;;  %956 = vadd.xlane.f32.xlu0 %v955_v2 }
 0x266   : > { %2948 = vmatmul.msk.bf16.vlgmr.msrb.gmra.mxu0 %vm527_vm1, %v3555_v8  ;;  %2952 = vmatmul.msk.bf16.vlgmr.msrb.gmra.mxu1 %vm527_vm1, %v3555_v8 }
 0x26c   : > { %941 = vadd.xlane.f32.xlu0 %v940_v13 }
 0x276   : > { %2949 = vmatmul.msk.bf16.gmra.mxu0 %vm527_vm1, %v3564_v9  ;;  %2953 = vmatmul.msk.bf16.gmra.mxu1 %vm527_vm1, %v3564_v9 }
 0x286   : > { %2950 = vmatmul.msk.bf16.gmra.mxu0 %vm527_vm1, %v3831_v36  ;;  %2954 = vmatmul.msk.bf16.gmra.mxu1 %vm527_vm1, %v3831_v36 }
 0x296   : > { %2951 = vmatmul.msk.bf16.gmra.mxu0 %vm527_vm1, %v3033_v4  ;;  %2955 = vmatmul.msk.bf16.gmra.mxu1 %vm527_vm1, %v3033_v4 }
 0x2a7   : > { %v981_v63 = vpop.xlane.xlu1 %980 }
 0x2af   : > { %v984_v1 = vpop.xlane.xlu2 %983 }
 0x2b0   : > { %3114 = vrcp.f32 %v984_v1 }
 0x2b6   : > { %v3115_v62 = vpop.eup %3114 }
 0x2b7   : > { %v801_v28 = vpop.xlane.xlu2 %800  ;;  %v987_v8 = vpop.xlane.xlu0 %986  ;;  %v1032_v35 = vmul.f32 %v3115_v62, %v3774_v41  ;;  %v1033_v59 = vmul.f32 %v3115_v62, %v3777_v46 }
 0x2b8   : > { %v846_v45 = vsub.f32 %v3694_v60, %v801_v28  ;;  %v847_v42 = vsub.f32 %v3696_v61, %v801_v28  ;;  %3116 = vrcp.f32 %v987_v8 }
 0x2ba   : > { %v880_v9 = vmul.f32 1.442695, %v846_v45  ;;  %v882_v22 = vmul.f32 1.442695, %v847_v42 }
 0x2bc   : > { %3118 = vpow2.f32 %v880_v9 }
 0x2bd   : > { %3120 = vpow2.f32 %v882_v22 }
 0x2be   : > { %v3117_v36 = vpop.eup %3116  ;;  %3122 = vrcp.f32 %v981_v63 }
 0x2bf   : > { %v978_v23 = vpop.xlane.xlu0 %977  ;;  %v1034_v4 = vmul.f32 %v3117_v36, %v3786_v32  ;;  %v1035_v5 = vmul.f32 %v3117_v36, %v3789_v39  ;;  %v972_v60 = vpop.xlane.xlu2 %971 }
 0x2c0   : > { %3124 = vrcp.f32 %v978_v23  ;;  %v966_v9 = vpop.xlane.xlu1 %965 }
 0x2c1   : > { %v1050_v61 = vpack.c.bf16 %v1034_v4, %v1032_v35  ;;  %v1051_v2 = vpack.c.bf16 %v1035_v5, %v1033_v59  ;;  %3126 = vrcp.f32 %v972_v60 }
 0x2c2   : > { %v3922_v13 = vpop.eup %3118 }
 0x2c3   : > { %v3924_v1 = vpop.eup %3120  ;;  %1072 = vmatpush.bf16.xpose.msrb.mxu2 %v1050_v61  ;;  %1091 = vmatpush.bf16.xpose.msrb.mxu3 %v1051_v2  ;;  %v3939_v61 = vld [vmem:[%s5107_s5 + $0x40] sm:$0xff]  ;;  %v566_v2 = vpop.f32.mrf.mxu0 }
 0x2c4   : > { %v943_v41 = vadd.f32 %v3924_v1, %v3922_v13  ;;  %v3123_v28 = vpop.eup %3122 }
 0x2c5   : > { %v1030_v8 = vmul.f32 %v3123_v28, %v3766_v48  ;;  %v1031_v42 = vmul.f32 %v3123_v28, %v3768_v49 }
 0x2c6   : > { %944 = vadd.xlane.f32.xlu1 %v943_v41  ;;  %v3125_v46 = vpop.eup %3124 }
 0x2c7   : > { %v975_v32 = vpop.xlane.xlu0 %974  ;;  %v1028_v39 = vmul.f32 %v3125_v46, %v3804_v26  ;;  %v1029_v45 = vmul.f32 %v3125_v46, %v3807_v34  ;;  %v969_v22 = vpop.xlane.xlu2 %968 }
 0x2c8   : > { %3128 = vrcp.f32 %v975_v32  ;;  %v3127_v36 = vpop.eup %3126  ;;  %v963_v60 = vpop.xlane.xlu1 %962 }
 0x2c9   : > { %v1048_v62 = vpack.c.bf16 %v1030_v8, %v1028_v39  ;;  %v1049_v63 = vpack.c.bf16 %v1031_v42, %v1029_v45  ;;  %3130 = vrcp.f32 %v969_v22  ;;  %v1024_v26 = vmul.f32 %v3127_v36, %v3796_v57  ;;  %v3944_v57 = vld [vmem:[%s5107_s5 + $0x48] sm:$0xff] }
 0x2ca   : > { %3132 = vrcp.f32 %v966_v9  ;;  %v1025_v34 = vmul.f32 %v3127_v36, %v3800_v37  ;;  %v595_v37 = vpop.f32.mrf.mxu1 }
 0x2cb   : > { %1073 = vmatpush.bf16.xpose.msrb.mxu2 %v1048_v62  ;;  %1092 = vmatpush.bf16.xpose.msrb.mxu3 %v1049_v63  ;;  %v596_v41 = vadd.f32 %v595_v37, %v3944_v57  ;;  %v3954_v63 = vpop.f32.mrf.mxu0 }
 0x2ce   : > { %v3129_v23 = vpop.eup %3128 }
 0x2cf   : > { %v960_v35 = vpop.xlane.xlu0 %959  ;;  %v1026_v48 = vmul.f32 %v3129_v23, %v3824_v40  ;;  %v1027_v49 = vmul.f32 %v3129_v23, %v3833_v14  ;;  %v3131_v5 = vpop.eup %3130  ;;  %v567_v14 = vadd.f32 %v566_v2, %v3939_v61 }
 0x2d0   : > { %v3133_v40 = vpop.eup %3132  ;;  %3134 = vrcp.f32 %v960_v35  ;;  %v1022_v28 = vmul.f32 %v3131_v5, %v3836_v43  ;;  %v1023_v32 = vmul.f32 %v3131_v5, %v3842_v44  ;;  %v954_v39 = vpop.xlane.xlu2 %953 }
 0x2d1   : > { %v1046_v4 = vpack.c.bf16 %v1026_v48, %v1024_v26  ;;  %v1047_v59 = vpack.c.bf16 %v1027_v49, %v1025_v34  ;;  %3136 = vrcp.f32 %v963_v60  ;;  %v3950_v46 = vpack.c.bf16 %v596_v41, %v567_v14  ;;  %v3965_v34 = vld [vmem:[%s5107_s5 + $0x60] sm:$0xff]  ;;  %v3970_v49 = vld [vmem:[%s5107_s5 + $0x68] sm:$0xff] }
 0x2d2   : > { %v1020_v8 = vmul.f32 %v3133_v40, %v3810_v30  ;;  %v1021_v45 = vmul.f32 %v3133_v40, %v3812_v7  ;;  %v3956_v36 = vpop.f32.mrf.mxu1 }
 0x2d3   : > { %1074 = vmatpush.bf16.xpose.msrb.mxu2 %v1046_v4  ;;  %1093 = vmatpush.bf16.xpose.msrb.mxu3 %v1047_v59 }
 0x2d4   : > { %v1044_v9 = vpack.c.bf16 %v1022_v28, %v1020_v8  ;;  %v1045_v22 = vpack.c.bf16 %v1023_v32, %v1021_v45 }
 0x2d6   : > { %v3135_v62 = vpop.eup %3134 }
 0x2d7   : > { %v957_v42 = vpop.xlane.xlu0 %956  ;;  %v3137_v43 = vpop.eup %3136  ;;  %v1016_v44 = vmul.f32 %v3135_v62, %v3853_v33  ;;  %v1017_v23 = vmul.f32 %v3135_v62, %v3861_v38 }
 0x2d8   : > { %3138 = vrcp.f32 %v957_v42  ;;  %v1018_v30 = vmul.f32 %v3137_v43, %v3846_v10  ;;  %v1019_v7 = vmul.f32 %v3137_v43, %v3850_v31  ;;  %v951_v35 = vpop.xlane.xlu2 %950  ;;  %v948_v38 = vpop.xlane.xlu1 %947 }
 0x2d9   : > { %3140 = vrcp.f32 %v954_v39  ;;  %v571_v10 = vpop.f32.mrf.mxu0 }
 0x2da   : > { %v1042_v26 = vpack.c.bf16 %v1018_v30, %v1016_v44  ;;  %v1043_v48 = vpack.c.bf16 %v1019_v7, %v1017_v23  ;;  %v600_v4 = vpop.f32.mrf.mxu1  ;;  %3142 = vrcp.f32 %v951_v35  ;;  %v572_v59 = vadd.f32 %v571_v10, %v3965_v34 }
 0x2db   : > { %1075 = vmatpush.bf16.xpose.msrb.mxu2 %v1044_v9  ;;  %1094 = vmatpush.bf16.xpose.msrb.mxu3 %v1045_v22  ;;  %v601_v5 = vadd.f32 %v600_v4, %v3970_v49  ;;  %3144 = vrcp.f32 %v948_v38 }
 0x2dd   : > { %v3976_v37 = vpack.c.bf16 %v601_v5, %v572_v59 }
 0x2de   : > { %v3139_v33 = vpop.eup %3138 }
 0x2df   : > { %v3141_v31 = vpop.eup %3140  ;;  %v1014_v60 = vmul.f32 %v3139_v33, %v3882_v6  ;;  %v1015_v2 = vmul.f32 %v3139_v33, %v3884_v58 }
 0x2e0   : > { %v1012_v40 = vmul.f32 %v3141_v31, %v3863_v27  ;;  %v1013_v14 = vmul.f32 %v3141_v31, %v3865_v12  ;;  %v3143_v32 = vpop.eup %3142 }
 0x2e1   : > { %v3145_v39 = vpop.eup %3144  ;;  %v1010_v8 = vmul.f32 %v3143_v32, %v3886_v11  ;;  %v1011_v45 = vmul.f32 %v3143_v32, %v3890_v29  ;;  %v3984_v42 = vpop.f32.mrf.mxu0  ;;  %v4008_v32 = vld [vmem:[%s5107_s5 + $0x58] sm:$0xff] }
 0x2e2   : > { %v1040_v41 = vpack.c.bf16 %v1014_v60, %v1012_v40  ;;  %v1041_v28 = vpack.c.bf16 %v1015_v2, %v1013_v14  ;;  %v1008_v6 = vmul.f32 %v3145_v39, %v3867_v47  ;;  %v1009_v58 = vmul.f32 %v3145_v39, %v3869_v15  ;;  %v3986_v9 = vpop.f32.mrf.mxu1 }
 0x2e3   : > { %1076 = vmatpush.bf16.xpose.msrb.mxu2 %v1042_v26  ;;  %1095 = vmatpush.bf16.xpose.msrb.mxu3 %v1043_v48 }
 0x2e4   : > { %v1038_v27 = vpack.c.bf16 %v1010_v8, %v1008_v6  ;;  %v1039_v12 = vpack.c.bf16 %v1011_v45, %v1009_v58 }
 0x2e9   : > { %v1138_v22 = vpop.f32.mrf.mxu0 }
 0x2ea   : > { %v1167_v62 = vpop.f32.mrf.mxu1  ;;  %v1139_v33 = vadd.f32 %v1138_v22, %v3593_v20 }
 0x2eb   : > { %1077 = vmatpush.bf16.xpose.msrb.mxu2 %v1040_v41  ;;  %1096 = vmatpush.bf16.xpose.msrb.mxu3 %v1041_v28  ;;  %v1168_v38 = vadd.f32 %v1167_v62, %v3598_v21  ;;  %v4003_v28 = vld [vmem:[%s5107_s5 + $0x50] sm:$0xff] }
 0x2ec   : > { %v569_v8 = vadd.f32 %v3954_v63, %v4003_v28 }
 0x2ed   : > { %v1187_v5 = vpack.c.bf16 %v1168_v38, %v1139_v33 }
 0x2ef   : > { %v1200_v40 = vunpack.c.h.b16 %v1187_v5 }
 0x2f1   : > { %v1140_v43 = vpop.f32.mrf.mxu0 }
 0x2f2   : > { %v1169_v44 = vpop.f32.mrf.mxu1  ;;  %v1141_v10 = vadd.f32 %v1140_v43, %v3583_v18  ;;  %v942_v18 = vpop.xlane.xlu0 %941 }
 0x2f3   : > { %1078 = vmatpush.bf16.xpose.msrb.mxu2 %v1038_v27  ;;  %1097 = vmatpush.bf16.xpose.msrb.mxu3 %v1039_v12  ;;  %v1170_v4 = vadd.f32 %v1169_v44, %v3588_v19  ;;  %3146 = vrcp.f32 %v942_v18  ;;  %v4032_v44 = vld [vmem:[%s5107_s5 + $0x78] sm:$0xff] }
 0x2f5   : > { %v1188_v60 = vpack.c.bf16 %v1170_v4, %v1141_v10 }
 0x2f7   : > { %v1201_v14 = vunpack.c.l.b16 %v1188_v60  ;;  %v1202_v41 = vunpack.c.h.b16 %v1188_v60 }
 0x2f9   : > { %v1143_v23 = vpop.f32.mrf.mxu0  ;;  %v1208_v21 = vpack.c.b16 %v1202_v41, %v1200_v40  ;;  %v3147_v39 = vpop.eup %3146 }
 0x2fa   : > { %v1172_v11 = vpop.f32.mrf.mxu1  ;;  %v1144_v29 = vadd.f32 %v1143_v23, %v3573_v16  ;;  %v1004_v6 = vmul.f32 %v3147_v39, %v3896_v3  ;;  %v1005_v27 = vmul.f32 %v3147_v39, %v3898_v0  ;;  %v1057_v3 = vunpack.c.h.b16 %v3950_v46 }
 0x2fb   : > { %v1173_v47 = vadd.f32 %v1172_v11, %v3578_v17  ;;  %v603_v23 = vadd.f32 %v3986_v9, %v4032_v44 }
 0x2fd   : > { %v1189_v26 = vpack.c.bf16 %v1173_v47, %v1144_v29  ;;  %v1060_v29 = vunpack.c.l.b16 %v3976_v37 }
 0x2ff   : > { %v1203_v31 = vunpack.c.l.b16 %v1189_v26  ;;  %v1204_v59 = vunpack.c.h.b16 %v1189_v26 }
 0x301   : > { %v1145_v30 = vpop.f32.mrf.mxu0 }
 0x302   : > { %v1174_v15 = vpop.f32.mrf.mxu1  ;;  %v1146_v7 = vadd.f32 %v1145_v30, %v3605_v24  ;;  %v1061_v30 = vunpack.c.h.b16 %v3976_v37 }
 0x303   : > { %v1175_v35 = vadd.f32 %v1174_v15, %v3610_v25  ;;  %v1199_v25 = vunpack.c.l.b16 %v1187_v5 }
 0x305   : > { %v1190_v48 = vpack.c.bf16 %v1175_v35, %v1146_v7  ;;  %v1207_v20 = vpack.c.b16 %v1201_v14, %v1199_v25 }
 0x307   : > { %v1205_v16 = vunpack.c.l.b16 %v1190_v48  ;;  %v1206_v17 = vunpack.c.h.b16 %v1190_v48 }
 0x309   : > { %v1209_v2 = vpack.c.b16 %v1205_v16, %v1203_v31  ;;  %v1210_v24 = vpack.c.b16 %v1206_v17, %v1204_v59 }
 0x30b   : > { %1221 = vmatpush.bf16.msra.mxu0 %v1209_v2  ;;  %1270 = vmatpush.bf16.msra.mxu1 %v1210_v24 }
 0x30f   : > { %1222 = vmatpush.bf16.msra.mxu0 %v1207_v20  ;;  %1271 = vmatpush.bf16.msra.mxu1 %v1208_v21 }
 0x312   : > { %2956 = vmatmul.msk.bf16.vlgmr.msra.gmra.mxu0 %vm673_vm2, %v3621_v50  ;;  %2964 = vmatmul.msk.bf16.vlgmr.msra.gmra.mxu1 %vm673_vm2, %v3621_v50  ;;  %v598_v50 = vadd.f32 %v3956_v36, %v4008_v32  ;;  %v1056_v36 = vunpack.c.l.b16 %v3950_v46 }
 0x314   : > { %v610_v22 = vpack.c.bf16 %v598_v50, %v569_v8 }
 0x316   : > { %v1059_v43 = vunpack.c.h.b16 %v610_v22 }
 0x322   : > { %2957 = vmatmul.msk.bf16.gmra.mxu0 %vm673_vm2, %v3630_v51  ;;  %2965 = vmatmul.msk.bf16.gmra.mxu1 %vm673_vm2, %v3630_v51  ;;  %v4027_v51 = vld [vmem:[%s5107_s5 + $0x70] sm:$0xff] }
 0x323   : > { %v574_v46 = vadd.f32 %v3984_v42, %v4027_v51 }
 0x325   : > { %v612_v11 = vpack.c.bf16 %v603_v23, %v574_v46 }
 0x327   : > { %v1062_v47 = vunpack.c.l.b16 %v612_v11  ;;  %v1063_v15 = vunpack.c.h.b16 %v612_v11 }
 0x329   : > { %v1066_v7 = vpack.c.b16 %v1062_v47, %v1060_v29  ;;  %v1067_v35 = vpack.c.b16 %v1063_v15, %v1061_v30 }
 0x332   : > { %2958 = vmatmul.msk.bf16.gmra.mxu0 %vm673_vm2, %v3639_v52  ;;  %2966 = vmatmul.msk.bf16.gmra.mxu1 %vm673_vm2, %v3639_v52  ;;  %v5141_v52 = vld [vmem:[#allocation2_spill] sm:$0xff] }
 0x339   : > { %v945_v19 = vpop.xlane.xlu1 %944 }
 0x33a   : > { %3148 = vrcp.f32 %v945_v19 }
 0x340   : > { %v3149_v45 = vpop.eup %3148 }
 0x341   : > { %v1006_v58 = vmul.f32 %v3149_v45, %v3922_v13  ;;  %v1007_v12 = vmul.f32 %v3149_v45, %v3924_v1  ;;  %v1058_v13 = vunpack.c.l.b16 %v610_v22  ;;  %v1065_v1 = vpack.c.b16 %v1059_v43, %v1057_v3 }
 0x342   : > { %2959 = vmatmul.msk.bf16.gmra.mxu0 %vm673_vm2, %v3648_v53  ;;  %2967 = vmatmul.msk.bf16.gmra.mxu1 %vm673_vm2, %v3648_v53  ;;  %v1148_v53 = vpop.f32.mrf.mxu0 }
 0x343   : > { %v1036_v63 = vpack.c.bf16 %v1006_v58, %v1004_v6  ;;  %v1037_v62 = vpack.c.bf16 %v1007_v12, %v1005_v27  ;;  %v1064_v0 = vpack.c.b16 %v1058_v13, %v1056_v36  ;;  %v1149_v37 = vadd.f32 %v1148_v53, %v3939_v61 }
 0x345   : > { %1079 = vmatpush.bf16.xpose.msrb.mxu2 %v1036_v63  ;;  %1098 = vmatpush.bf16.xpose.msrb.mxu3 %v1037_v62 }
 0x34a   : > { %v4068_v9 = vpop.f32.mrf.mxu0 }
 0x34c   : > { %1080 = vmatmul.bf16.vlgmr.msrb.gmra.mxu2 %v1064_v0  ;;  %1099 = vmatmul.bf16.vlgmr.msrb.gmra.mxu3 %v1065_v1 }
 0x34d   : > { %3042 = vmatpush.bf16.msra.mxu2 %v1209_v2  ;;  %3044 = vmatpush.bf16.msra.mxu3 %v1210_v24 }
 0x351   : > { %3043 = vmatpush.bf16.msra.mxu2 %v1207_v20  ;;  %3045 = vmatpush.bf16.msra.mxu3 %v1208_v21 }
 0x352   : > { %v1153_v48 = vpop.f32.mrf.mxu0 }
 0x353   : > { %v1154_v33 = vadd.f32 %v1153_v48, %v3965_v34 }
 0x35a   : > { %v4083_v31 = vpop.f32.mrf.mxu0 }
 0x35c   : > { %1085 = vmatmul.bf16.gmra.mxu2 %v1066_v7  ;;  %1104 = vmatmul.bf16.gmra.mxu3 %v1067_v35 }
 0x36c   : > { %2960 = vmatmul.msk.bf16.vlgmr.msra.gmra.mxu2 %vm673_vm2, %v3657_v54  ;;  %2968 = vmatmul.msk.bf16.vlgmr.msra.gmra.mxu3 %vm673_vm2, %v3657_v54  ;;  %v1177_v54 = vpop.f32.mrf.mxu1 }
 0x36d   : > { %v1178_v42 = vadd.f32 %v1177_v54, %v3944_v57 }
 0x374   : > { %v4070_v26 = vpop.f32.mrf.mxu1 }
 0x37c   : > { %2961 = vmatmul.msk.bf16.gmra.mxu2 %vm673_vm2, %v3666_v55  ;;  %2969 = vmatmul.msk.bf16.gmra.mxu3 %vm673_vm2, %v3666_v55  ;;  %v4066_v55 = vpack.c.bf16 %v1178_v42, %v1149_v37 }
 0x38c   : > { %2962 = vmatmul.msk.bf16.gmra.mxu2 %vm673_vm2, %v3675_v56  ;;  %2970 = vmatmul.msk.bf16.gmra.mxu3 %vm673_vm2, %v3675_v56  ;;  %v1182_v56 = vpop.f32.mrf.mxu1 }
 0x38d   : > { %v1183_v38 = vadd.f32 %v1182_v56, %v3970_v49 }
 0x38f   : > { %v4074_v10 = vpack.c.bf16 %v1183_v38, %v1154_v33  ;;  %v4087_v17 = vpop.f32.mrf.mxu0 }
 0x394   : > { %v4085_v16 = vpop.f32.mrf.mxu1 }
 0x397   : > { %v4091_v41 = vpop.f32.mrf.mxu0 }
 0x39c   : > { %2963 = vmatmul.msk.bf16.gmra.mxu2 %vm673_vm2, %v5141_v52  ;;  %2971 = vmatmul.msk.bf16.gmra.mxu3 %vm673_vm2, %v5141_v52  ;;  %v4089_v5 = vpop.f32.mrf.mxu1 }
 0x39f   : > { %v4099_v19 = vpop.f32.mrf.mxu0 }
 0x3a4   : > { %v4093_v20 = vpop.f32.mrf.mxu1 }
 0x3a7   : > { %v4107_v45 = vpop.f32.mrf.mxu0 }
 0x3ac   : > { %v4101_v39 = vpop.f32.mrf.mxu1 }
 0x3af   : > { %v4115_v12 = vpop.f32.mrf.mxu0 }
 0x3b4   : > { %v4109_v6 = vpop.f32.mrf.mxu1 }
 0x3b7   : > { %v4129_v43 = vpop.f32.mrf.mxu0 }
 0x3bc   : > { %v4117_v22 = vpop.f32.mrf.mxu1 }
 0x3bf   : > { %v4135_v11 = vpop.f32.mrf.mxu0 }
 0x3c4   : > { %v4131_v0 = vpop.f32.mrf.mxu1 }
 0x3c5   : > { %v1328_v35 = vmax.f32 %v4129_v43, %v4131_v0 }
 0x3c7   : > { %v4147_v56 = vpop.f32.mrf.mxu0 }
 0x3cc   : > { %v4137_v29 = vpop.f32.mrf.mxu1 }
 0x3cd   : > { %v1331_v47 = vmax.f32 %v4135_v11, %v4137_v29 }
 0x3cf   : > { %v1081_v61 = vpop.f32.mrf.mxu2  ;;  %v1100_v57 = vpop.f32.mrf.mxu3 }
 0x3d0   : > { %v1101_v4 = vadd.f32 %v1100_v57, %v1081_v61  ;;  %v1319_v57 = vmax.f32 %v4099_v19, %v4101_v39 }
 0x3d2   : > { %1110 = vst [vmem:[%s441_s16] sm:$0xff] %v1101_v4  ;;  %v1325_v4 = vmax.f32 %v4115_v12, %v4117_v22 }
 0x3d4   : > { %v4149_v33 = vpop.f32.mrf.mxu1 }
 0x3d5   : > { %v1334_v38 = vmax.f32 %v4147_v56, %v4149_v33 }
 0x3d7   : > { %v1083_v34 = vpop.f32.mrf.mxu2  ;;  %v1102_v59 = vpop.f32.mrf.mxu3 }
 0x3d8   : > { %v1103_v49 = vadd.f32 %v1102_v59, %v1083_v34  ;;  %v1322_v34 = vmax.f32 %v4107_v45, %v4109_v6  ;;  %v1313_v59 = vmax.f32 %v4087_v17, %v4089_v5 }
 0x3da   : > { %1111 = vst [vmem:[%s441_s16 + $0x8] sm:$0xff] %v1103_v49 }
 0x3df   : > { %v1086_v60 = vpop.f32.mrf.mxu2  ;;  %v1105_v2 = vpop.f32.mrf.mxu3 }
 0x3e0   : > { %v1106_v24 = vadd.f32 %v1105_v2, %v1086_v60 }
 0x3e2   : > { %1112 = vst [vmem:[%s441_s16 + $0x10] sm:$0xff] %v1106_v24 }
 0x3e7   : > { %v1088_v25 = vpop.f32.mrf.mxu2  ;;  %v1107_v40 = vpop.f32.mrf.mxu3 }
 0x3e8   : > { %v1108_v14 = vadd.f32 %v1107_v40, %v1088_v25 }
 0x3ea   : > { %1113 = vst [vmem:[%s441_s16 + $0x18] sm:$0xff] %v1108_v14 }
 0x3ef   : > { %v4095_v21 = vpop.f32.mrf.mxu2  ;;  %v4097_v18 = vpop.f32.mrf.mxu3 }
 0x3f0   : > { %v1337_v42 = vmax.f32 %v4095_v21, %v4097_v18 }
 0x3f7   : > { %v4103_v8 = vpop.f32.mrf.mxu2  ;;  %v4105_v50 = vpop.f32.mrf.mxu3 }
 0x3f8   : > { %v1340_v61 = vmax.f32 %v4103_v8, %v4105_v50 }
 0x3ff   : > { %v4111_v58 = vpop.f32.mrf.mxu2  ;;  %v4113_v27 = vpop.f32.mrf.mxu3 }
 0x400   : > { %v1343_v48 = vmax.f32 %v4111_v58, %v4113_v27 }
 0x407   : > { %v4119_v63 = vpop.f32.mrf.mxu2  ;;  %v4121_v62 = vpop.f32.mrf.mxu3 }
 0x408   : > { %v1346_v23 = vmax.f32 %v4119_v63, %v4121_v62 }
 0x40f   : > { %v4123_v36 = vpop.f32.mrf.mxu2  ;;  %v4125_v3 = vpop.f32.mrf.mxu3 }
 0x410   : > { %v1349_v13 = vmax.f32 %v4123_v36, %v4125_v3 }
 0x412   : > { %1350 = vmax.xlane.f32.xlu1 %v1349_v13 }
 0x417   : > { %v1256_v1 = vpop.f32.mrf.mxu2  ;;  %v1305_v46 = vpop.f32.mrf.mxu3 }
 0x418   : > { %v1352_v54 = vmax.f32 %v1256_v1, %v1305_v46 }
 0x41a   : > { %1347 = vmax.xlane.f32.xlu1 %v1346_v23 }
 0x41f   : > { %v1259_v30 = vpop.f32.mrf.mxu2  ;;  %v1308_v15 = vpop.f32.mrf.mxu3 }
 0x420   : > { %v1355_v7 = vmax.f32 %v1259_v30, %v1308_v15 }
 0x422   : > { %1332 = vmax.xlane.f32.xlu1 %v1331_v47  ;;  %1356 = vmax.xlane.f32.xlu2 %v1355_v7 }
 0x427   : > { %v1261_v52 = vpop.f32.mrf.mxu2  ;;  %v1310_v53 = vpop.f32.mrf.mxu3 }
 0x428   : > { %v1358_v37 = vmax.f32 %v1261_v52, %v1310_v53 }
 0x42a   : > { %1329 = vmax.xlane.f32.xlu1 %v1328_v35  ;;  %1353 = vmax.xlane.f32.xlu2 %v1352_v54 }
 0x42b   : > { %1359 = vmax.xlane.f32.xlu0 %v1358_v37 }
 0x432   : > { %1338 = vmax.xlane.f32.xlu2 %v1337_v42 }
 0x433   : > { %1344 = vmax.xlane.f32.xlu0 %v1343_v48 }
 0x43a   : > { %1335 = vmax.xlane.f32.xlu2 %v1334_v38 }
 0x43b   : > { %1341 = vmax.xlane.f32.xlu0 %v1340_v61 }
 0x442   : > { %1320 = vmax.xlane.f32.xlu2 %v1319_v57 }
 0x443   : > { %1326 = vmax.xlane.f32.xlu0 %v1325_v4 }
 0x44b   : > { %1323 = vmax.xlane.f32.xlu0 %v1322_v34 }
 0x453   : > { %1314 = vmax.xlane.f32.xlu0 %v1313_v59 }
 0x485   : > { %v1351_v25 = vpop.xlane.xlu1 %1350 }
 0x486   : > { %v1385_v54 = vsub.f32 %v4123_v36, %v1351_v25  ;;  %v1386_v42 = vsub.f32 %v4125_v3, %v1351_v25 }
 0x488   : > { %v1441_v4 = vmul.f32 1.442695, %v1385_v54 }
 0x48d   : > { %v1348_v61 = vpop.xlane.xlu1 %1347 }
 0x495   : > { %v1357_v49 = vpop.xlane.xlu2 %1356 }
 0x496   : > { %v1389_v60 = vsub.f32 %v1259_v30, %v1357_v49  ;;  %v1390_v2 = vsub.f32 %v1308_v15, %v1357_v49  ;;  %v1383_v49 = vsub.f32 %v4119_v63, %v1348_v61 }
 0x498   : > { %v1449_v24 = vmul.f32 1.442695, %v1389_v60  ;;  %v1451_v40 = vmul.f32 1.442695, %v1390_v2 }
 0x49a   : > { %3150 = vpow2.f32 %v1449_v24  ;;  %v1384_v24 = vsub.f32 %v4121_v62, %v1348_v61 }
 0x49b   : > { %3152 = vpow2.f32 %v1451_v40 }
 0x49c   : > { %v1439_v62 = vmul.f32 1.442695, %v1384_v24 }
 0x49d   : > { %v1354_v14 = vpop.xlane.xlu2 %1353 }
 0x49e   : > { %v1387_v13 = vsub.f32 %v1256_v1, %v1354_v14  ;;  %v1388_v23 = vsub.f32 %v1305_v46, %v1354_v14  ;;  %v1360_v47 = vpop.xlane.xlu0 %1359  ;;  %v1443_v46 = vmul.f32 1.442695, %v1386_v42 }
 0x49f   : > { %v1391_v7 = vsub.f32 %v1261_v52, %v1360_v47  ;;  %v1392_v35 = vsub.f32 %v1310_v53, %v1360_v47 }
 0x4a0   : > { %v1445_v37 = vmul.f32 1.442695, %v1387_v13  ;;  %v1447_v48 = vmul.f32 1.442695, %v1388_v23  ;;  %v4165_v38 = vpop.eup %3150  ;;  %v1333_v23 = vpop.xlane.xlu1 %1332 }
 0x4a1   : > { %v1453_v30 = vmul.f32 1.442695, %v1391_v7  ;;  %v4167_v15 = vpop.eup %3152  ;;  %v1455_v57 = vmul.f32 1.442695, %v1392_v35 }
 0x4a2   : > { %3154 = vpow2.f32 %v1445_v37  ;;  %v1499_v1 = vadd.f32 %v4167_v15, %v4165_v38 }
 0x4a3   : > { %3156 = vpow2.f32 %v1447_v48 }
 0x4a4   : > { %3158 = vpow2.f32 %v1453_v30  ;;  %1500 = vadd.xlane.f32.xlu1 %v1499_v1 }
 0x4a5   : > { %v1339_v52 = vpop.xlane.xlu2 %1338  ;;  %3160 = vpow2.f32 %v1455_v57 }
 0x4a6   : > { %v1377_v36 = vsub.f32 %v4095_v21, %v1339_v52  ;;  %v1378_v3 = vsub.f32 %v4097_v18, %v1339_v52  ;;  %v1345_v53 = vpop.xlane.xlu0 %1344  ;;  %3162 = vpow2.f32 %v1441_v4  ;;  %v1373_v4 = vsub.f32 %v4135_v11, %v1333_v23 }
 0x4a7   : > { %v1381_v34 = vsub.f32 %v4111_v58, %v1345_v53  ;;  %v1382_v59 = vsub.f32 %v4113_v27, %v1345_v53  ;;  %3164 = vpow2.f32 %v1443_v46  ;;  %v1437_v58 = vmul.f32 1.442695, %v1383_v49 }
 0x4a8   : > { %v1425_v60 = vmul.f32 1.442695, %v1377_v36  ;;  %v1427_v2 = vmul.f32 1.442695, %v1378_v3  ;;  %v4177_v14 = vpop.eup %3154  ;;  %v1316_v27 = vmax.f32 %v4091_v41, %v4093_v20  ;;  %v1417_v11 = vmul.f32 1.442695, %v1373_v4 }
 0x4a9   : > { %v1433_v25 = vmul.f32 1.442695, %v1381_v34  ;;  %v1435_v40 = vmul.f32 1.442695, %v1382_v59  ;;  %v4179_v21 = vpop.eup %3156 }
 0x4aa   : > { %3166 = vpow2.f32 %v1425_v60  ;;  %v4181_v18 = vpop.eup %3158  ;;  %v1496_v63 = vadd.f32 %v4179_v21, %v4177_v14 }
 0x4ab   : > { %3168 = vpow2.f32 %v1427_v2  ;;  %v4187_v13 = vpop.eup %3160 }
 0x4ac   : > { %3170 = vpow2.f32 %v1433_v25  ;;  %v4189_v7 = vpop.eup %3162  ;;  %1317 = vmax.xlane.f32.xlu1 %v1316_v27  ;;  %1497 = vadd.xlane.f32.xlu0 %v1496_v63  ;;  %v1502_v35 = vadd.f32 %v4187_v13, %v4181_v18 }
 0x4ad   : > { %3172 = vpow2.f32 %v1435_v40  ;;  %v1336_v47 = vpop.xlane.xlu2 %1335  ;;  %v4195_v48 = vpop.eup %3164 }
 0x4ae   : > { %v1375_v54 = vsub.f32 %v4147_v56, %v1336_v47  ;;  %v1376_v37 = vsub.f32 %v4149_v33, %v1336_v47  ;;  %v1342_v42 = vpop.xlane.xlu0 %1341  ;;  %3174 = vpow2.f32 %v1437_v58  ;;  %1503 = vadd.xlane.f32.xlu2 %v1502_v35  ;;  %v1374_v56 = vsub.f32 %v4137_v29, %v1333_v23  ;;  %v1330_v40 = vpop.xlane.xlu1 %1329 }
 0x4af   : > { %v1379_v30 = vsub.f32 %v4103_v8, %v1342_v42  ;;  %v1380_v61 = vsub.f32 %v4105_v50, %v1342_v42  ;;  %3176 = vpow2.f32 %v1439_v62  ;;  %v1493_v49 = vadd.f32 %v4195_v48, %v4189_v7 }
 0x4b0   : > { %v4199_v57 = vpop.eup %3166  ;;  %v1421_v1 = vmul.f32 1.442695, %v1375_v54  ;;  %v1423_v46 = vmul.f32 1.442695, %v1376_v37  ;;  %v1419_v34 = vmul.f32 1.442695, %v1374_v56  ;;  %v1371_v54 = vsub.f32 %v4129_v43, %v1330_v40 }
 0x4b1   : > { %v4202_v52 = vpop.eup %3168  ;;  %v1429_v33 = vmul.f32 1.442695, %v1379_v30  ;;  %v1431_v36 = vmul.f32 1.442695, %v1380_v61  ;;  %v1372_v42 = vsub.f32 %v4131_v0, %v1330_v40 }
 0x4b2   : > { %v4205_v3 = vpop.eup %3170  ;;  %3178 = vpow2.f32 %v1421_v1  ;;  %v1481_v8 = vadd.f32 %v4202_v52, %v4199_v57  ;;  %v1413_v61 = vmul.f32 1.442695, %v1371_v54 }
 0x4b3   : > { %v4209_v50 = vpop.eup %3172  ;;  %3180 = vpow2.f32 %v1423_v46 }
 0x4b4   : > { %3182 = vpow2.f32 %v1429_v33  ;;  %v1487_v53 = vadd.f32 %v4209_v50, %v4205_v3  ;;  %v4213_v29 = vpop.eup %3174  ;;  %1482 = vadd.xlane.f32.xlu0 %v1481_v8 }
 0x4b5   : > { %3184 = vpow2.f32 %v1431_v36  ;;  %v1321_v59 = vpop.xlane.xlu2 %1320  ;;  %v4219_v25 = vpop.eup %3176  ;;  %v1415_v36 = vmul.f32 1.442695, %v1372_v42 }
 0x4b6   : > { %1488 = vadd.xlane.f32.xlu1 %v1487_v53  ;;  %v1365_v60 = vsub.f32 %v4099_v19, %v1321_v59  ;;  %v1366_v2 = vsub.f32 %v4101_v39, %v1321_v59  ;;  %v1327_v24 = vpop.xlane.xlu0 %1326  ;;  %3186 = vpow2.f32 %v1417_v11  ;;  %1494 = vadd.xlane.f32.xlu2 %v1493_v49  ;;  %v1490_v43 = vadd.f32 %v4219_v25, %v4213_v29 }
 0x4b7   : > { %v1369_v58 = vsub.f32 %v4115_v12, %v1327_v24  ;;  %v1370_v27 = vsub.f32 %v4117_v22, %v1327_v24  ;;  %3188 = vpow2.f32 %v1419_v34 }
 0x4b8   : > { %v4223_v63 = vpop.eup %3178  ;;  %v1401_v62 = vmul.f32 1.442695, %v1365_v60  ;;  %v1403_v23 = vmul.f32 1.442695, %v1366_v2 }
 0x4b9   : > { %v4225_v47 = vpop.eup %3180  ;;  %v1409_v19 = vmul.f32 1.442695, %v1369_v58  ;;  %v1411_v35 = vmul.f32 1.442695, %v1370_v27 }
 0x4ba   : > { %v4227_v39 = vpop.eup %3182  ;;  %3190 = vpow2.f32 %v1401_v62  ;;  %v1478_v12 = vadd.f32 %v4225_v47, %v4223_v63 }
 0x4bb   : > { %v4232_v22 = vpop.eup %3184  ;;  %3192 = vpow2.f32 %v1403_v23 }
 0x4bc   : > { %3194 = vpow2.f32 %v1409_v19  ;;  %v1484_v37 = vadd.f32 %v4232_v22, %v4227_v39  ;;  %v4237_v30 = vpop.eup %3186  ;;  %1479 = vadd.xlane.f32.xlu0 %v1478_v12 }
 0x4bd   : > { %3196 = vpow2.f32 %v1411_v35  ;;  %v4241_v1 = vpop.eup %3188 }
 0x4be   : > { %1485 = vadd.xlane.f32.xlu1 %v1484_v37  ;;  %v1324_v4 = vpop.xlane.xlu0 %1323  ;;  %1491 = vadd.xlane.f32.xlu2 %v1490_v43  ;;  %3198 = vpow2.f32 %v1413_v61 }
 0x4bf   : > { %v1367_v46 = vsub.f32 %v4107_v45, %v1324_v4  ;;  %v1368_v56 = vsub.f32 %v4109_v6, %v1324_v4  ;;  %v1475_v6 = vadd.f32 %v4241_v1, %v4237_v30 }
 0x4c0   : > { %v4245_v33 = vpop.eup %3190 }
 0x4c1   : > { %v4247_v0 = vpop.eup %3192  ;;  %v1405_v8 = vmul.f32 1.442695, %v1367_v46  ;;  %v1407_v11 = vmul.f32 1.442695, %v1368_v56 }
 0x4c2   : > { %v4249_v53 = vpop.eup %3194  ;;  %v1463_v34 = vadd.f32 %v4247_v0, %v4245_v33 }
 0x4c3   : > { %v4253_v59 = vpop.eup %3196  ;;  %3200 = vpow2.f32 %v1405_v8 }
 0x4c4   : > { %3202 = vpow2.f32 %v1407_v11  ;;  %v1469_v45 = vadd.f32 %v4253_v59, %v4249_v53  ;;  %1464 = vadd.xlane.f32.xlu0 %v1463_v34  ;;  %v4261_v24 = vpop.eup %3198 }
 0x4c5   : > { %3204 = vpow2.f32 %v1415_v36 }
 0x4c6   : > { %1470 = vadd.xlane.f32.xlu1 %v1469_v45  ;;  %v1315_v49 = vpop.xlane.xlu0 %1314  ;;  %1476 = vadd.xlane.f32.xlu2 %v1475_v6 }
 0x4c7   : > { %v1361_v60 = vsub.f32 %v4087_v17, %v1315_v49  ;;  %v1362_v2 = vsub.f32 %v4089_v5, %v1315_v49 }
 0x4c9   : > { %v4263_v40 = vpop.eup %3200  ;;  %v1393_v58 = vmul.f32 1.442695, %v1361_v60  ;;  %v1395_v27 = vmul.f32 1.442695, %v1362_v2 }
 0x4ca   : > { %v4265_v62 = vpop.eup %3202 }
 0x4cb   : > { %v4267_v23 = vpop.eup %3204  ;;  %3206 = vpow2.f32 %v1393_v58  ;;  %v1466_v19 = vadd.f32 %v4265_v62, %v4263_v40 }
 0x4cc   : > { %3208 = vpow2.f32 %v1395_v27  ;;  %v1472_v17 = vadd.f32 %v4267_v23, %v4261_v24 }
 0x4ce   : > { %1467 = vadd.xlane.f32.xlu1 %v1466_v19  ;;  %1473 = vadd.xlane.f32.xlu2 %v1472_v17 }
 0x4d1   : > { %v4273_v5 = vpop.eup %3206 }
 0x4d2   : > { %v4275_v35 = vpop.eup %3208 }
 0x4d3   : > { %v1457_v54 = vadd.f32 %v4275_v35, %v4273_v5 }
 0x4d6   : > { %1458 = vadd.xlane.f32.xlu2 %v1457_v54 }
 0x517   : > { %v1501_v12 = vpop.xlane.xlu1 %1500 }
 0x518   : > { %3210 = vrcp.f32 %v1501_v12 }
 0x51e   : > { %v3211_v36 = vpop.eup %3210 }
 0x51f   : > { %v1318_v37 = vpop.xlane.xlu1 %1317  ;;  %v1498_v56 = vpop.xlane.xlu0 %1497  ;;  %v1549_v11 = vmul.f32 %v3211_v36, %v4165_v38  ;;  %v1550_v34 = vmul.f32 %v3211_v36, %v4167_v15 }
 0x520   : > { %v1363_v42 = vsub.f32 %v4091_v41, %v1318_v37  ;;  %v1364_v61 = vsub.f32 %v4093_v20, %v1318_v37 }
 0x521   : > { %v1504_v43 = vpop.xlane.xlu2 %1503 }
 0x522   : > { %v1397_v4 = vmul.f32 1.442695, %v1363_v42  ;;  %v1399_v46 = vmul.f32 1.442695, %v1364_v61  ;;  %3212 = vrcp.f32 %v1504_v43 }
 0x524   : > { %3214 = vpow2.f32 %v1397_v4 }
 0x525   : > { %3216 = vpow2.f32 %v1399_v46 }
 0x526   : > { %3218 = vrcp.f32 %v1498_v56 }
 0x527   : > { %v1483_v12 = vpop.xlane.xlu0 %1482 }
 0x528   : > { %v3213_v8 = vpop.eup %3212 }
 0x529   : > { %v1551_v45 = vmul.f32 %v3213_v8, %v4181_v18  ;;  %v1552_v41 = vmul.f32 %v3213_v8, %v4187_v13  ;;  %v1495_v6 = vpop.xlane.xlu2 %1494  ;;  %v1489_v20 = vpop.xlane.xlu1 %1488 }
 0x52a   : > { %v4285_v49 = vpop.eup %3214  ;;  %3220 = vrcp.f32 %v1495_v6 }
 0x52b   : > { %v4287_v60 = vpop.eup %3216  ;;  %v1567_v2 = vpack.c.bf16 %v1551_v45, %v1549_v11  ;;  %v1568_v58 = vpack.c.bf16 %v1552_v41, %v1550_v34  ;;  %3222 = vrcp.f32 %v1489_v20 }
 0x52c   : > { %v1460_v27 = vadd.f32 %v4287_v60, %v4285_v49  ;;  %v3219_v38 = vpop.eup %3218 }
 0x52d   : > { %1589 = vmatpush.bf16.xpose.msrb.mxu0 %v1567_v2  ;;  %1608 = vmatpush.bf16.xpose.msrb.mxu1 %v1568_v58  ;;  %v1547_v19 = vmul.f32 %v3219_v38, %v4177_v14  ;;  %v1548_v54 = vmul.f32 %v3219_v38, %v4179_v21 }
 0x52e   : > { %1461 = vadd.xlane.f32.xlu0 %v1460_v27 }
 0x52f   : > { %v1480_v11 = vpop.xlane.xlu0 %1479 }
 0x530   : > { %v3221_v15 = vpop.eup %3220 }
 0x531   : > { %v1492_v18 = vpop.xlane.xlu2 %1491  ;;  %v1545_v13 = vmul.f32 %v3221_v15, %v4189_v7  ;;  %v1546_v17 = vmul.f32 %v3221_v15, %v4195_v48  ;;  %v1486_v37 = vpop.xlane.xlu1 %1485 }
 0x532   : > { %3224 = vrcp.f32 %v1492_v18  ;;  %v3223_v43 = vpop.eup %3222 }
 0x533   : > { %v1565_v42 = vpack.c.bf16 %v1547_v19, %v1545_v13  ;;  %v1566_v61 = vpack.c.bf16 %v1548_v54, %v1546_v17  ;;  %3226 = vrcp.f32 %v1486_v37  ;;  %v1541_v7 = vmul.f32 %v3223_v43, %v4205_v3 }
 0x534   : > { %3228 = vrcp.f32 %v1483_v12  ;;  %v1542_v48 = vmul.f32 %v3223_v43, %v4209_v50 }
 0x535   : > { %1590 = vmatpush.bf16.xpose.msrb.mxu0 %v1565_v42  ;;  %1609 = vmatpush.bf16.xpose.msrb.mxu1 %v1566_v61 }
 0x537   : > { %v1465_v13 = vpop.xlane.xlu0 %1464 }
 0x538   : > { %v3225_v4 = vpop.eup %3224 }
 0x539   : > { %v1477_v46 = vpop.xlane.xlu2 %1476  ;;  %v1543_v14 = vmul.f32 %v3225_v4, %v4213_v29  ;;  %v1544_v21 = vmul.f32 %v3225_v4, %v4219_v25  ;;  %v3227_v8 = vpop.eup %3226 }
 0x53a   : > { %v3229_v34 = vpop.eup %3228  ;;  %3230 = vrcp.f32 %v1477_v46  ;;  %v1539_v45 = vmul.f32 %v3227_v8, %v4227_v39  ;;  %v1540_v41 = vmul.f32 %v3227_v8, %v4232_v22  ;;  %v1471_v3 = vpop.xlane.xlu1 %1470  ;;  %v1634_v46 = vld.sshfl [vmem:[#allocation1] sm:$0xff pattern:$0x75316420] }
 0x53b   : > { %v1563_v56 = vpack.c.bf16 %v1543_v14, %v1541_v7  ;;  %v1564_v36 = vpack.c.bf16 %v1544_v21, %v1542_v48  ;;  %3232 = vrcp.f32 %v1480_v11  ;;  %v1537_v29 = vmul.f32 %v3229_v34, %v4199_v57  ;;  %v2148_v7 = vld [vmem:[%s436_s18] sm:$0xff] }
 0x53c   : > { %v1538_v50 = vmul.f32 %v3229_v34, %v4202_v52  ;;  %v1638_v14 = vpack.c.bf16 %v1634_v46, %v1634_v46 }
 0x53d   : > { %1591 = vmatpush.bf16.xpose.msrb.mxu0 %v1563_v56  ;;  %1610 = vmatpush.bf16.xpose.msrb.mxu1 %v1564_v36  ;;  %v1561_v25 = vpack.c.bf16 %v1539_v45, %v1537_v29  ;;  %v1185_v29 = vadd.f32 %v4085_v16, %v4032_v44  ;;  %v4358_v44 = vld [vmem:[%s5106_s4 + $0x10] sm:$0xff] }
 0x53e   : > { %v1562_v20 = vpack.c.bf16 %v1540_v41, %v1538_v50 }
 0x540   : > { %v3231_v2 = vpop.eup %3230 }
 0x541   : > { %v1474_v6 = vpop.xlane.xlu2 %1473  ;;  %v3233_v58 = vpop.eup %3232  ;;  %v1533_v27 = vmul.f32 %v3231_v2, %v4237_v30  ;;  %v1534_v39 = vmul.f32 %v3231_v2, %v4241_v1 }
 0x542   : > { %3234 = vrcp.f32 %v1474_v6  ;;  %v1535_v22 = vmul.f32 %v3233_v58, %v4223_v63  ;;  %v1536_v38 = vmul.f32 %v3233_v58, %v4225_v47  ;;  %v1468_v57 = vpop.xlane.xlu1 %1467  ;;  %v1577_v6 = vunpack.c.l.b16 %v4074_v10 }
 0x543   : > { %3236 = vrcp.f32 %v1471_v3 }
 0x544   : > { %v1559_v15 = vpack.c.bf16 %v1535_v22, %v1533_v27  ;;  %v1560_v52 = vpack.c.bf16 %v1536_v38, %v1534_v39  ;;  %3238 = vrcp.f32 %v1468_v57  ;;  %v4340_v27 = vld [vmem:[%s5106_s4] sm:$0xff] }
 0x545   : > { %1592 = vmatpush.bf16.xpose.msrb.mxu0 %v1561_v25  ;;  %1611 = vmatpush.bf16.xpose.msrb.mxu1 %v1562_v20  ;;  %3240 = vrcp.f32 %v1465_v13  ;;  %v1578_v25 = vunpack.c.h.b16 %v4074_v10  ;;  %v4367_v10 = vld [vmem:[%s5106_s4 + $0x18] sm:$0xff] }
 0x548   : > { %v3235_v18 = vpop.eup %3234 }
 0x549   : > { %v3237_v19 = vpop.eup %3236  ;;  %v1531_v17 = vmul.f32 %v3235_v18, %v4261_v24  ;;  %v1532_v30 = vmul.f32 %v3235_v18, %v4267_v23 }
 0x54a   : > { %v1529_v1 = vmul.f32 %v3237_v19, %v4249_v53  ;;  %v1530_v63 = vmul.f32 %v3237_v19, %v4253_v59  ;;  %v3239_v12 = vpop.eup %3238  ;;  %v1459_v53 = vpop.xlane.xlu2 %1458 }
 0x54b   : > { %v3241_v37 = vpop.eup %3240  ;;  %v1527_v42 = vmul.f32 %v3239_v12, %v4263_v40  ;;  %v1528_v61 = vmul.f32 %v3239_v12, %v4265_v62  ;;  %3242 = vrcp.f32 %v1459_v53  ;;  %v1635_v40 = vld.sshfl [vmem:[#allocation1 + $0x8] sm:$0xff pattern:$0x75316420] }
 0x54c   : > { %v1557_v54 = vpack.c.bf16 %v1531_v17, %v1529_v1  ;;  %v1558_v47 = vpack.c.bf16 %v1532_v30, %v1530_v63  ;;  %v1525_v24 = vmul.f32 %v3241_v37, %v4245_v33  ;;  %v1526_v23 = vmul.f32 %v3241_v37, %v4247_v0  ;;  %2150 = vst [vmem:[#allocation1] ss:$2 sm:$0xff] %v2148_v7  ;;  %v4380_v37 = vld [vmem:[%s5107_s5 + $0x20] sm:$0xff] }
 0x54d   : > { %1593 = vmatpush.bf16.xpose.msrb.mxu0 %v1559_v15  ;;  %1612 = vmatpush.bf16.xpose.msrb.mxu1 %v1560_v52  ;;  %v1151_v33 = vadd.f32 %v4068_v9, %v4003_v28  ;;  %v1180_v0 = vadd.f32 %v4070_v26, %v4008_v32  ;;  %v1639_v48 = vpack.c.bf16 %v1635_v40, %v1635_v40  ;;  %v1641_v28 = vsel %vm540_vm0, %v1638_v14, 0  ;;  %v4410_v40 = vld [vmem:[%s5107_s5 + $0x8] sm:$0xff]  ;;  %v4416_v14 = vld [vmem:[%s5107_s5 + $0x30] sm:$0xff] }
 0x54e   : > { %v1555_v43 = vpack.c.bf16 %v1527_v42, %v1525_v24  ;;  %v1556_v4 = vpack.c.bf16 %v1528_v61, %v1526_v23  ;;  %v1573_v32 = vunpack.c.l.b16 %v4066_v55  ;;  %v1574_v26 = vunpack.c.h.b16 %v4066_v55  ;;  %v4386_v61 = vld [vmem:[%s5107_s5 + $0x28] sm:$0xff]  ;;  %v4392_v23 = vld [vmem:[%s5107_s5 + $0x10] sm:$0xff] }
 0x54f   : > { %v1192_v34 = vpack.c.bf16 %v1180_v0, %v1151_v33  ;;  %v1644_v9 = vsel %vm540_vm0, %v1639_v48, 0 }
 0x551   : > { %v3243_v62 = vpop.eup %3242  ;;  %v1576_v3 = vunpack.c.h.b16 %v1192_v34 }
 0x552   : > { %v1521_v56 = vmul.f32 %v3243_v62, %v4273_v5  ;;  %v1522_v8 = vmul.f32 %v3243_v62, %v4275_v35  ;;  %v1575_v5 = vunpack.c.l.b16 %v1192_v34 }
 0x554   : > { %v1581_v35 = vpack.c.b16 %v1575_v5, %v1573_v32 }
 0x555   : > { %1594 = vmatpush.bf16.xpose.msrb.mxu0 %v1557_v54  ;;  %1613 = vmatpush.bf16.xpose.msrb.mxu1 %v1558_v47 }
 0x55d   : > { %1595 = vmatpush.bf16.xpose.msrb.mxu0 %v1555_v43  ;;  %1614 = vmatpush.bf16.xpose.msrb.mxu1 %v1556_v4  ;;  %v4398_v4 = vld [vmem:[%s5107_s5 + $0x18] sm:$0xff] }
 0x5a1   : > { %v1462_v59 = vpop.xlane.xlu0 %1461 }
 0x5a2   : > { %3244 = vrcp.f32 %v1462_v59  ;;  %v4404_v59 = vld [vmem:[%s5107_s5] sm:$0xff] }
 0x5a8   : > { %v3245_v21 = vpop.eup %3244 }
 0x5a9   : > { %v1523_v36 = vmul.f32 %v3245_v21, %v4285_v49  ;;  %v1524_v11 = vmul.f32 %v3245_v21, %v4287_v60  ;;  %v1582_v49 = vpack.c.b16 %v1576_v3, %v1574_v26  ;;  %v1156_v60 = vadd.f32 %v4083_v31, %v4027_v51  ;;  %v4349_v51 = vld [vmem:[%s5106_s4 + $0x8] sm:$0xff]  ;;  %v4422_v21 = vld [vmem:[%s5107_s5 + $0x38] sm:$0xff] }
 0x5aa   : > { %5142 = vst [vmem:[#allocation2_spill] sm:$0xff] %v4422_v21 }
 0x5ab   : > { %v1553_v45 = vpack.c.bf16 %v1523_v36, %v1521_v56  ;;  %v1554_v41 = vpack.c.bf16 %v1524_v11, %v1522_v8  ;;  %v1194_v50 = vpack.c.bf16 %v1185_v29, %v1156_v60  ;;  %v4428_v29 = vld [vmem:[%s5108_s6] sm:$0xff] }
 0x5ac   : > { %5143 = vst [vmem:[#allocation3_spill] sm:$0xff] %v4428_v29 }
 0x5ad   : > { %1596 = vmatpush.bf16.xpose.msrb.mxu0 %v1553_v45  ;;  %1615 = vmatpush.bf16.xpose.msrb.mxu1 %v1554_v41  ;;  %v1579_v55 = vunpack.c.l.b16 %v1194_v50  ;;  %v1580_v20 = vunpack.c.h.b16 %v1194_v50  ;;  %v4437_v50 = vld [vmem:[%s5108_s6 + $0x8] sm:$0xff] }
 0x5ae   : > { %5144 = vst [vmem:[#allocation4_spill] sm:$0xff] %v4437_v50 }
 0x5af   : > { %v1583_v2 = vpack.c.b16 %v1579_v55, %v1577_v6  ;;  %v1584_v58 = vpack.c.b16 %v1580_v20, %v1578_v25  ;;  %v4446_v6 = vld [vmem:[%s5108_s6 + $0x10] sm:$0xff]  ;;  %v4455_v25 = vld [vmem:[%s5108_s6 + $0x18] sm:$0xff] }
 0x5b0   : > { %5145 = vst [vmem:[#allocation5_spill] sm:$0xff] %v4446_v6 }
 0x5b1   : > { %5146 = vst [vmem:[#allocation6_spill] sm:$0xff] %v4455_v25 }
 0x5b4   : > { %1597 = vmatmul.bf16.vlgmr.msrb.gmra.mxu0 %v1581_v35  ;;  %1616 = vmatmul.bf16.vlgmr.msrb.gmra.mxu1 %v1582_v49 }
 0x5b5   : > { %1653 = vmatpush.bf16.msra.mxu0 %v1641_v28  ;;  %1682 = vmatpush.bf16.msra.mxu1 %v1644_v9 }
 0x5c4   : > { %1602 = vmatmul.bf16.gmra.mxu0 %v1583_v2  ;;  %1621 = vmatmul.bf16.gmra.mxu1 %v1584_v58  ;;  %v4464_v2 = vld [vmem:[%s5107_s5 + $0x40] sm:$0xff] }
 0x5c5   : > { %5147 = vst [vmem:[#allocation7_spill] sm:$0xff] %v4464_v2 }
 0x5d4   : > { %2972 = vmatmul.msk.bf16.vlgmr.msra.gmra.mxu0 %vm527_vm1, %v4340_v27  ;;  %2976 = vmatmul.msk.bf16.vlgmr.msra.gmra.mxu1 %vm527_vm1, %v4340_v27 }
 0x5e4   : > { %2973 = vmatmul.msk.bf16.gmra.mxu0 %vm527_vm1, %v4349_v51  ;;  %2977 = vmatmul.msk.bf16.gmra.mxu1 %vm527_vm1, %v4349_v51 }
 0x5f4   : > { %2974 = vmatmul.msk.bf16.gmra.mxu0 %vm527_vm1, %v4358_v44  ;;  %2978 = vmatmul.msk.bf16.gmra.mxu1 %vm527_vm1, %v4358_v44 }
 0x604   : > { %2975 = vmatmul.msk.bf16.gmra.mxu0 %vm527_vm1, %v4367_v10  ;;  %2979 = vmatmul.msk.bf16.gmra.mxu1 %vm527_vm1, %v4367_v10 }
 0x631   : > { %v1598_v31 = vpop.f32.mrf.mxu0  ;;  %v1617_v16 = vpop.f32.mrf.mxu1 }
 0x632   : > { %v1618_v39 = vadd.f32 %v1617_v16, %v1598_v31  ;;  %v4470_v31 = vld [vmem:[%s5107_s5 + $0x48] sm:$0xff] }
 0x633   : > { %5148 = vst [vmem:[#allocation8_spill] sm:$0xff] %v4470_v31 }
 0x634   : > { %1627 = vst [vmem:[%s446_s28] sm:$0xff] %v1618_v39 }
 0x639   : > { %v1600_v22 = vpop.f32.mrf.mxu0  ;;  %v1619_v38 = vpop.f32.mrf.mxu1 }
 0x63a   : > { %v1620_v57 = vadd.f32 %v1619_v38, %v1600_v22 }
 0x63c   : > { %1628 = vst [vmem:[%s446_s28 + $0x8] sm:$0xff] %v1620_v57  ;;  %v4476_v57 = vld [vmem:[%s5107_s5 + $0x50] sm:$0xff] }
 0x63d   : > { %5149 = vst [vmem:[#allocation9_spill] sm:$0xff] %v4476_v57 }
 0x641   : > { %v1603_v15 = vpop.f32.mrf.mxu0  ;;  %v1622_v52 = vpop.f32.mrf.mxu1 }
 0x642   : > { %v1623_v18 = vadd.f32 %v1622_v52, %v1603_v15  ;;  %v4482_v52 = vld [vmem:[%s5107_s5 + $0x58] sm:$0xff] }
 0x643   : > { %5150 = vst [vmem:[#allocation10_spill] sm:$0xff] %v4482_v52 }
 0x644   : > { %1629 = vst [vmem:[%s446_s28 + $0x10] sm:$0xff] %v1623_v18 }
 0x649   : > { %v1605_v13 = vpop.f32.mrf.mxu0  ;;  %v1624_v19 = vpop.f32.mrf.mxu1 }
 0x64a   : > { %v1625_v17 = vadd.f32 %v1624_v19, %v1605_v13 }
 0x64c   : > { %1630 = vst [vmem:[%s446_s28 + $0x18] sm:$0xff] %v1625_v17  ;;  %s456_s28 = scalar_lea.vmem %s5112_s10, %s4077_s30 }
 0x651   : > { %v1655_v30 = vpop.f32.mrf.mxu0  ;;  %v1684_v1 = vpop.f32.mrf.mxu1 }
 0x652   : > { %v1656_v46 = vadd.f32 %v4404_v59, %v1655_v30  ;;  %v1685_v7 = vadd.f32 %v4410_v40, %v1684_v1 }
 0x654   : > { %v1704_v11 = vpack.c.bf16 %v1685_v7, %v1656_v46 }
 0x656   : > { %v1716_v3 = vunpack.c.l.b16 %v1704_v11  ;;  %v1717_v35 = vunpack.c.h.b16 %v1704_v11  ;;  %v4525_v11 = vld [vmem:[%s5108_s6 + $0x28] sm:$0xff] }
 0x657   : > { %5156 = vst [vmem:[#allocation16_spill] sm:$0xff] %v4525_v11 }
 0x659   : > { %v1657_v63 = vpop.f32.mrf.mxu0  ;;  %v1686_v54 = vpop.f32.mrf.mxu1 }
 0x65a   : > { %v1658_v43 = vadd.f32 %v4392_v23, %v1657_v63  ;;  %v1687_v53 = vadd.f32 %v4398_v4, %v1686_v54 }
 0x65c   : > { %v1705_v36 = vpack.c.bf16 %v1687_v53, %v1658_v43  ;;  %v4507_v53 = vld [vmem:[%s5107_s5 + $0x68] sm:$0xff] }
 0x65d   : > { %5153 = vst [vmem:[#allocation13_spill] sm:$0xff] %v4507_v53 }
 0x65e   : > { %v1718_v9 = vunpack.c.l.b16 %v1705_v36  ;;  %v1719_v32 = vunpack.c.h.b16 %v1705_v36 }
 0x660   : > { %v1724_v49 = vpack.c.b16 %v1718_v9, %v1716_v3  ;;  %v1725_v60 = vpack.c.b16 %v1719_v32, %v1717_v35 }
 0x661   : > { %v1660_v47 = vpop.f32.mrf.mxu0  ;;  %v1689_v12 = vpop.f32.mrf.mxu1 }
 0x662   : > { %v1661_v42 = vadd.f32 %v4380_v37, %v1660_v47  ;;  %v1690_v24 = vadd.f32 %v4386_v61, %v1689_v12  ;;  %v4492_v47 = vld [vmem:[%s5108_s6 + $0x20] sm:$0xff] }
 0x663   : > { %5151 = vst [vmem:[#allocation11_spill] sm:$0xff] %v4492_v47 }
 0x664   : > { %v1706_v0 = vpack.c.bf16 %v1690_v24, %v1661_v42  ;;  %v4501_v24 = vld [vmem:[%s5107_s5 + $0x60] sm:$0xff] }
 0x665   : > { %5152 = vst [vmem:[#allocation12_spill] sm:$0xff] %v4501_v24 }
 0x666   : > { %v1720_v34 = vunpack.c.l.b16 %v1706_v0  ;;  %v1721_v45 = vunpack.c.h.b16 %v1706_v0  ;;  %v4513_v0 = vld [vmem:[%s5107_s5 + $0x70] sm:$0xff] }
 0x667   : > { %5154 = vst [vmem:[#allocation14_spill] sm:$0xff] %v4513_v0 }
 0x669   : > { %v1662_v62 = vpop.f32.mrf.mxu0  ;;  %v1691_v33 = vpop.f32.mrf.mxu1 }
 0x66a   : > { %v1663_v48 = vadd.f32 %v4416_v14, %v1662_v62  ;;  %v1692_v56 = vadd.f32 %v4422_v21, %v1691_v33 }
 0x66c   : > { %v1707_v8 = vpack.c.bf16 %v1692_v56, %v1663_v48  ;;  %v4519_v56 = vld [vmem:[%s5107_s5 + $0x78] sm:$0xff] }
 0x66d   : > { %5155 = vst [vmem:[#allocation15_spill] sm:$0xff] %v4519_v56 }
 0x66e   : > { %v1722_v41 = vunpack.c.l.b16 %v1707_v8  ;;  %v1723_v28 = vunpack.c.h.b16 %v1707_v8 }
 0x670   : > { %v1726_v26 = vpack.c.b16 %v1722_v41, %v1720_v34  ;;  %v1727_v5 = vpack.c.b16 %v1723_v28, %v1721_v45 }
 0x671   : > { %v1665_v55 = vpop.f32.mrf.mxu0  ;;  %v1694_v20 = vpop.f32.mrf.mxu1 }
 0x672   : > { %1738 = vmatpush.bf16.msrb.mxu0 %v1726_v26  ;;  %1787 = vmatpush.bf16.msrb.mxu1 %v1727_v5  ;;  %v1666_v58 = vadd.f32 %v4464_v2, %v1665_v55  ;;  %v1695_v16 = vadd.f32 %v4470_v31, %v1694_v20  ;;  %v4538_v26 = vld [vmem:[%s5108_s6 + $0x30] sm:$0xff]  ;;  %v4547_v5 = vld [vmem:[%s5108_s6 + $0x38] sm:$0xff] }
 0x673   : > { %5157 = vst [vmem:[#allocation17_spill] sm:$0xff] %v4538_v26 }
 0x674   : > { %v1708_v39 = vpack.c.bf16 %v1695_v16, %v1666_v58  ;;  %5158 = vst [vmem:[#allocation18_spill] sm:$0xff] %v4547_v5 }
 0x676   : > { %1739 = vmatpush.bf16.msrb.mxu0 %v1724_v49  ;;  %1788 = vmatpush.bf16.msrb.mxu1 %v1725_v60  ;;  %v2090_v13 = vunpack.c.l.b16 %v1708_v39  ;;  %v2091_v19 = vunpack.c.h.b16 %v1708_v39 }
 0x679   : > { %2980 = vmatmul.msk.bf16.vlgmr.msrb.gmra.mxu0 %vm673_vm2, %v4428_v29  ;;  %2988 = vmatmul.msk.bf16.vlgmr.msrb.gmra.mxu1 %vm673_vm2, %v4428_v29  ;;  %v1667_v22 = vpop.f32.mrf.mxu0  ;;  %v1696_v38 = vpop.f32.mrf.mxu1 }
 0x67a   : > { %v1668_v15 = vadd.f32 %v4476_v57, %v1667_v22  ;;  %v1697_v18 = vadd.f32 %v4482_v52, %v1696_v38 }
 0x67c   : > { %v1709_v17 = vpack.c.bf16 %v1697_v18, %v1668_v15 }
 0x67e   : > { %v2092_v30 = vunpack.c.l.b16 %v1709_v17  ;;  %v2093_v1 = vunpack.c.h.b16 %v1709_v17 }
 0x680   : > { %v4485_v63 = vpack.c.b16 %v2092_v30, %v2090_v13  ;;  %v4487_v54 = vpack.c.b16 %v2093_v1, %v2091_v19 }
 0x681   : > { %v1670_v12 = vpop.f32.mrf.mxu0  ;;  %v1699_v42 = vpop.f32.mrf.mxu1 }
 0x682   : > { %v1671_v43 = vadd.f32 %v4501_v24, %v1670_v12  ;;  %v1700_v46 = vadd.f32 %v4507_v53, %v1699_v42 }
 0x684   : > { %v1710_v7 = vpack.c.bf16 %v1700_v46, %v1671_v43 }
 0x686   : > { %v2094_v34 = vunpack.c.l.b16 %v1710_v7  ;;  %v2095_v45 = vunpack.c.h.b16 %v1710_v7 }
 0x689   : > { %2981 = vmatmul.msk.bf16.gmra.mxu0 %vm673_vm2, %v4437_v50  ;;  %2989 = vmatmul.msk.bf16.gmra.mxu1 %vm673_vm2, %v4437_v50  ;;  %v1672_v62 = vpop.f32.mrf.mxu0  ;;  %v1701_v33 = vpop.f32.mrf.mxu1 }
 0x68a   : > { %v1673_v48 = vadd.f32 %v4513_v0, %v1672_v62  ;;  %v1702_v36 = vadd.f32 %v4519_v56, %v1701_v33 }
 0x68c   : > { %v1711_v8 = vpack.c.bf16 %v1702_v36, %v1673_v48 }
 0x68e   : > { %v2096_v41 = vunpack.c.l.b16 %v1711_v8  ;;  %v2097_v28 = vunpack.c.h.b16 %v1711_v8 }
 0x690   : > { %v4531_v9 = vpack.c.b16 %v2096_v41, %v2094_v34  ;;  %v4533_v32 = vpack.c.b16 %v2097_v28, %v2095_v45 }
 0x699   : > { %2982 = vmatmul.msk.bf16.gmra.mxu0 %vm673_vm2, %v4446_v6  ;;  %2990 = vmatmul.msk.bf16.gmra.mxu1 %vm673_vm2, %v4446_v6 }
 0x6a9   : > { %2983 = vmatmul.msk.bf16.gmra.mxu0 %vm673_vm2, %v4455_v25  ;;  %2991 = vmatmul.msk.bf16.gmra.mxu1 %vm673_vm2, %v4455_v25 }
 0x6b9   : > { %2984 = vmatmul.msk.bf16.gmra.mxu0 %vm673_vm2, %v4492_v47  ;;  %2992 = vmatmul.msk.bf16.gmra.mxu1 %vm673_vm2, %v4492_v47 }
 0x6c9   : > { %2985 = vmatmul.msk.bf16.gmra.mxu0 %vm673_vm2, %v4525_v11  ;;  %2993 = vmatmul.msk.bf16.gmra.mxu1 %vm673_vm2, %v4525_v11 }
 0x6d9   : > { %2986 = vmatmul.msk.bf16.gmra.mxu0 %vm673_vm2, %v4538_v26  ;;  %2994 = vmatmul.msk.bf16.gmra.mxu1 %vm673_vm2, %v4538_v26 }
 0x6e9   : > { %2987 = vmatmul.msk.bf16.gmra.mxu0 %vm673_vm2, %v4547_v5  ;;  %2995 = vmatmul.msk.bf16.gmra.mxu1 %vm673_vm2, %v4547_v5 }
 0x6f6   : > { %v4553_v3 = vpop.f32.mrf.mxu0  ;;  %v4555_v35 = vpop.f32.mrf.mxu1 }
 0x6fe   : > { %v4557_v49 = vpop.f32.mrf.mxu0  ;;  %v4559_v60 = vpop.f32.mrf.mxu1 }
 0x706   : > { %v4561_v55 = vpop.f32.mrf.mxu0  ;;  %v4563_v20 = vpop.f32.mrf.mxu1 }
 0x70e   : > { %v4565_v58 = vpop.f32.mrf.mxu0  ;;  %v4567_v16 = vpop.f32.mrf.mxu1 }
 0x716   : > { %v4569_v39 = vpop.f32.mrf.mxu0  ;;  %v4571_v22 = vpop.f32.mrf.mxu1 }
 0x71e   : > { %v4573_v38 = vpop.f32.mrf.mxu0  ;;  %v4575_v15 = vpop.f32.mrf.mxu1 }
 0x71f   : > { %v1845_v53 = vmax.f32 %v4573_v38, %v4575_v15 }
 0x726   : > { %v4577_v18 = vpop.f32.mrf.mxu0  ;;  %v4579_v13 = vpop.f32.mrf.mxu1 }
 0x727   : > { %v1848_v5 = vmax.f32 %v4577_v18, %v4579_v13 }
 0x72e   : > { %v4581_v19 = vpop.f32.mrf.mxu0  ;;  %v4583_v17 = vpop.f32.mrf.mxu1 }
 0x736   : > { %v4585_v30 = vpop.f32.mrf.mxu0  ;;  %v4587_v1 = vpop.f32.mrf.mxu1 }
 0x73e   : > { %v4589_v12 = vpop.f32.mrf.mxu0  ;;  %v4591_v42 = vpop.f32.mrf.mxu1 }
 0x746   : > { %v4593_v43 = vpop.f32.mrf.mxu0  ;;  %v4595_v46 = vpop.f32.mrf.mxu1 }
 0x747   : > { %v1860_v11 = vmax.f32 %v4593_v43, %v4595_v46 }
 0x74e   : > { %v4597_v7 = vpop.f32.mrf.mxu0  ;;  %v4599_v62 = vpop.f32.mrf.mxu1 }
 0x74f   : > { %v1863_v45 = vmax.f32 %v4597_v7, %v4599_v62 }
 0x756   : > { %v1771_v33 = vpop.f32.mrf.mxu0  ;;  %v4601_v48 = vpop.f32.mrf.mxu1 }
 0x757   : > { %v1866_v36 = vmax.f32 %v1771_v33, %v4601_v48 }
 0x759   : > { %1867 = vmax.xlane.f32.xlu0 %v1866_v36 }
 0x75e   : > { %v1773_v8 = vpop.f32.mrf.mxu0  ;;  %v1822_v34 = vpop.f32.mrf.mxu1 }
 0x75f   : > { %v1869_v36 = vmax.f32 %v1773_v8, %v1822_v34 }
 0x761   : > { %1864 = vmax.xlane.f32.xlu0 %v1863_v45  ;;  %v1854_v45 = vmax.f32 %v4585_v30, %v4587_v1 }
 0x766   : > { %v1776_v41 = vpop.f32.mrf.mxu0  ;;  %v1825_v28 = vpop.f32.mrf.mxu1 }
 0x767   : > { %v1872_v26 = vmax.f32 %v1776_v41, %v1825_v28 }
 0x769   : > { %1849 = vmax.xlane.f32.xlu0 %v1848_v5  ;;  %1873 = vmax.xlane.f32.xlu1 %v1872_v26  ;;  %v1851_v26 = vmax.f32 %v4581_v19, %v4583_v17  ;;  %v1857_v5 = vmax.f32 %v4589_v12, %v4591_v42 }
 0x76e   : > { %v1778_v56 = vpop.f32.mrf.mxu0  ;;  %v1827_v0 = vpop.f32.mrf.mxu1 }
 0x76f   : > { %v1875_v24 = vmax.f32 %v1778_v56, %v1827_v0 }
 0x771   : > { %1846 = vmax.xlane.f32.xlu0 %v1845_v53  ;;  %1870 = vmax.xlane.f32.xlu1 %v1869_v36  ;;  %v1836_v53 = vmax.f32 %v4561_v55, %v4563_v20  ;;  %v1839_v36 = vmax.f32 %v4565_v58, %v4567_v16 }
 0x772   : > { %1876 = vmax.xlane.f32.xlu2 %v1875_v24  ;;  %v1842_v24 = vmax.f32 %v4569_v39, %v4571_v22 }
 0x779   : > { %1855 = vmax.xlane.f32.xlu1 %v1854_v45 }
 0x77a   : > { %1861 = vmax.xlane.f32.xlu2 %v1860_v11  ;;  %v1830_v11 = vmax.f32 %v4553_v3, %v4555_v35 }
 0x781   : > { %1852 = vmax.xlane.f32.xlu1 %v1851_v26 }
 0x782   : > { %1858 = vmax.xlane.f32.xlu2 %v1857_v5 }
 0x789   : > { %1837 = vmax.xlane.f32.xlu1 %v1836_v53 }
 0x78a   : > { %1843 = vmax.xlane.f32.xlu2 %v1842_v24 }
 0x792   : > { %1840 = vmax.xlane.f32.xlu2 %v1839_v36 }
 0x79a   : > { %1831 = vmax.xlane.f32.xlu2 %v1830_v11 }
 0x7cc   : > { %v1868_v57 = vpop.xlane.xlu0 %1867 }
 0x7cd   : > { %v1902_v50 = vsub.f32 %v1771_v33, %v1868_v57  ;;  %v1903_v29 = vsub.f32 %v4601_v48, %v1868_v57 }
 0x7dc   : > { %v1874_v45 = vpop.xlane.xlu1 %1873 }
 0x7dd   : > { %v1906_v52 = vsub.f32 %v1776_v41, %v1874_v45  ;;  %v1907_v26 = vsub.f32 %v1825_v28, %v1874_v45 }
 0x7df   : > { %v1966_v5 = vmul.f32 1.442695, %v1906_v52  ;;  %v1968_v31 = vmul.f32 1.442695, %v1907_v26  ;;  %v1865_v52 = vpop.xlane.xlu0 %1864  ;;  %v1958_v26 = vmul.f32 1.442695, %v1902_v50 }
 0x7e0   : > { %v1900_v50 = vsub.f32 %v4597_v7, %v1865_v52 }
 0x7e1   : > { %3246 = vpow2.f32 %v1966_v5 }
 0x7e2   : > { %3248 = vpow2.f32 %v1968_v31  ;;  %v1960_v31 = vmul.f32 1.442695, %v1903_v29 }
 0x7e4   : > { %v1871_v2 = vpop.xlane.xlu1 %1870 }
 0x7e5   : > { %v1904_v47 = vsub.f32 %v1773_v8, %v1871_v2  ;;  %v1905_v53 = vsub.f32 %v1822_v34, %v1871_v2  ;;  %v1877_v24 = vpop.xlane.xlu2 %1876 }
 0x7e6   : > { %v1908_v25 = vsub.f32 %v1778_v56, %v1877_v24  ;;  %v1909_v6 = vsub.f32 %v1827_v0, %v1877_v24 }
 0x7e7   : > { %v1962_v36 = vmul.f32 1.442695, %v1904_v47  ;;  %v1964_v21 = vmul.f32 1.442695, %v1905_v53  ;;  %v4627_v11 = vpop.eup %3246  ;;  %v1850_v53 = vpop.xlane.xlu0 %1849 }
 0x7e8   : > { %v1970_v41 = vmul.f32 1.442695, %v1908_v25  ;;  %v4629_v28 = vpop.eup %3248  ;;  %v1972_v45 = vmul.f32 1.442695, %v1909_v6 }
 0x7e9   : > { %3250 = vpow2.f32 %v1962_v36  ;;  %v2016_v2 = vadd.f32 %v4629_v28, %v4627_v11 }
 0x7ea   : > { %3252 = vpow2.f32 %v1964_v21  ;;  %v1901_v21 = vsub.f32 %v4599_v62, %v1865_v52 }
 0x7eb   : > { %3254 = vpow2.f32 %v1970_v41  ;;  %2017 = vadd.xlane.f32.xlu0 %v2016_v2 }
 0x7ec   : > { %v1856_v0 = vpop.xlane.xlu1 %1855  ;;  %3256 = vpow2.f32 %v1972_v45  ;;  %v1956_v62 = vmul.f32 1.442695, %v1901_v21 }
 0x7ed   : > { %v1894_v57 = vsub.f32 %v4585_v30, %v1856_v0  ;;  %v1895_v47 = vsub.f32 %v4587_v1, %v1856_v0  ;;  %v1862_v56 = vpop.xlane.xlu2 %1861  ;;  %3258 = vpow2.f32 %v1958_v26 }
 0x7ee   : > { %v1898_v25 = vsub.f32 %v4593_v43, %v1862_v56  ;;  %v1899_v6 = vsub.f32 %v4595_v46, %v1862_v56  ;;  %3260 = vpow2.f32 %v1960_v31  ;;  %v1954_v43 = vmul.f32 1.442695, %v1900_v50 }
 0x7ef   : > { %v1942_v33 = vmul.f32 1.442695, %v1894_v57  ;;  %v1944_v48 = vmul.f32 1.442695, %v1895_v47  ;;  %v4639_v34 = vpop.eup %3250  ;;  %v1833_v46 = vmax.f32 %v4557_v49, %v4559_v60  ;;  %v1890_v47 = vsub.f32 %v4577_v18, %v1850_v53 }
 0x7f0   : > { %v1950_v29 = vmul.f32 1.442695, %v1898_v25  ;;  %v1952_v8 = vmul.f32 1.442695, %v1899_v6  ;;  %v4641_v30 = vpop.eup %3252 }
 0x7f1   : > { %3262 = vpow2.f32 %v1942_v33  ;;  %v4643_v1 = vpop.eup %3254  ;;  %v2013_v7 = vadd.f32 %v4641_v30, %v4639_v34  ;;  %v1934_v18 = vmul.f32 1.442695, %v1890_v47 }
 0x7f2   : > { %3264 = vpow2.f32 %v1944_v48  ;;  %v4649_v5 = vpop.eup %3256 }
 0x7f3   : > { %3266 = vpow2.f32 %v1950_v29  ;;  %v4651_v36 = vpop.eup %3258  ;;  %1834 = vmax.xlane.f32.xlu0 %v1833_v46  ;;  %2014 = vadd.xlane.f32.xlu2 %v2013_v7  ;;  %v2019_v41 = vadd.f32 %v4649_v5, %v4643_v1 }
 0x7f4   : > { %3268 = vpow2.f32 %v1952_v8  ;;  %v1853_v24 = vpop.xlane.xlu1 %1852  ;;  %v4657_v2 = vpop.eup %3260 }
 0x7f5   : > { %v1892_v52 = vsub.f32 %v4581_v19, %v1853_v24  ;;  %v1893_v45 = vsub.f32 %v4583_v17, %v1853_v24  ;;  %v1859_v26 = vpop.xlane.xlu2 %1858  ;;  %3270 = vpow2.f32 %v1954_v43  ;;  %2020 = vadd.xlane.f32.xlu1 %v2019_v41  ;;  %v1891_v19 = vsub.f32 %v4579_v13, %v1850_v53  ;;  %v1847_v53 = vpop.xlane.xlu0 %1846 }
 0x7f6   : > { %v1896_v31 = vsub.f32 %v4589_v12, %v1859_v26  ;;  %v1897_v0 = vsub.f32 %v4591_v42, %v1859_v26  ;;  %3272 = vpow2.f32 %v1956_v62  ;;  %v2010_v8 = vadd.f32 %v4657_v2, %v4651_v36 }
 0x7f7   : > { %v4661_v57 = vpop.eup %3262  ;;  %v1938_v56 = vmul.f32 1.442695, %v1892_v52  ;;  %v1940_v25 = vmul.f32 1.442695, %v1893_v45  ;;  %v1936_v21 = vmul.f32 1.442695, %v1891_v19  ;;  %v1888_v47 = vsub.f32 %v4573_v38, %v1847_v53 }
 0x7f8   : > { %v4664_v6 = vpop.eup %3264  ;;  %v1946_v17 = vmul.f32 1.442695, %v1896_v31  ;;  %v1948_v50 = vmul.f32 1.442695, %v1897_v0 }
 0x7f9   : > { %v4667_v33 = vpop.eup %3266  ;;  %3274 = vpow2.f32 %v1938_v56  ;;  %v1998_v12 = vadd.f32 %v4664_v6, %v4661_v57 }
 0x7fa   : > { %v4671_v42 = vpop.eup %3268  ;;  %3276 = vpow2.f32 %v1940_v25  ;;  %v1889_v25 = vsub.f32 %v4575_v15, %v1847_v53 }
 0x7fb   : > { %3278 = vpow2.f32 %v1946_v17  ;;  %v2004_v48 = vadd.f32 %v4671_v42, %v4667_v33  ;;  %v4675_v13 = vpop.eup %3270  ;;  %1999 = vadd.xlane.f32.xlu2 %v1998_v12  ;;  %v1930_v17 = vmul.f32 1.442695, %v1888_v47 }
 0x7fc   : > { %3280 = vpow2.f32 %v1948_v50  ;;  %v1838_v29 = vpop.xlane.xlu1 %1837  ;;  %v4681_v62 = vpop.eup %3272 }
 0x7fd   : > { %2005 = vadd.xlane.f32.xlu0 %v2004_v48  ;;  %v1882_v43 = vsub.f32 %v4561_v55, %v1838_v29  ;;  %v1883_v46 = vsub.f32 %v4563_v20, %v1838_v29  ;;  %v1844_v7 = vpop.xlane.xlu2 %1843  ;;  %3282 = vpow2.f32 %v1934_v18  ;;  %2011 = vadd.xlane.f32.xlu1 %v2010_v8  ;;  %v2007_v38 = vadd.f32 %v4681_v62, %v4675_v13 }
 0x7fe   : > { %v1886_v24 = vsub.f32 %v4569_v39, %v1844_v7  ;;  %v1887_v41 = vsub.f32 %v4571_v22, %v1844_v7  ;;  %3284 = vpow2.f32 %v1936_v21  ;;  %v1932_v29 = vmul.f32 1.442695, %v1889_v25 }
 0x7ff   : > { %v4685_v52 = vpop.eup %3274  ;;  %v1918_v45 = vmul.f32 1.442695, %v1882_v43  ;;  %v1920_v26 = vmul.f32 1.442695, %v1883_v46 }
 0x800   : > { %v4687_v31 = vpop.eup %3276  ;;  %v1926_v55 = vmul.f32 1.442695, %v1886_v24  ;;  %v1928_v0 = vmul.f32 1.442695, %v1887_v41 }
 0x801   : > { %v4689_v20 = vpop.eup %3278  ;;  %3286 = vpow2.f32 %v1918_v45  ;;  %v1995_v39 = vadd.f32 %v4687_v31, %v4685_v52 }
 0x802   : > { %v4694_v22 = vpop.eup %3280  ;;  %3288 = vpow2.f32 %v1920_v26 }
 0x803   : > { %3290 = vpow2.f32 %v1926_v55  ;;  %v2001_v56 = vadd.f32 %v4694_v22, %v4689_v20  ;;  %v4699_v19 = vpop.eup %3282  ;;  %1996 = vadd.xlane.f32.xlu2 %v1995_v39 }
 0x804   : > { %3292 = vpow2.f32 %v1928_v0  ;;  %v4703_v12 = vpop.eup %3284 }
 0x805   : > { %2002 = vadd.xlane.f32.xlu0 %v2001_v56  ;;  %v1841_v50 = vpop.xlane.xlu2 %1840  ;;  %2008 = vadd.xlane.f32.xlu1 %v2007_v38  ;;  %3294 = vpow2.f32 %v1930_v17 }
 0x806   : > { %v1884_v18 = vsub.f32 %v4565_v58, %v1841_v50  ;;  %v1885_v48 = vsub.f32 %v4567_v16, %v1841_v50  ;;  %v1992_v16 = vadd.f32 %v4703_v12, %v4699_v19 }
 0x807   : > { %v4707_v21 = vpop.eup %3286 }
 0x808   : > { %v4709_v15 = vpop.eup %3288  ;;  %v1922_v8 = vmul.f32 1.442695, %v1884_v18  ;;  %v1924_v43 = vmul.f32 1.442695, %v1885_v48 }
 0x809   : > { %v4711_v46 = vpop.eup %3290  ;;  %v1980_v7 = vadd.f32 %v4709_v15, %v4707_v21 }
 0x80a   : > { %v4715_v53 = vpop.eup %3292  ;;  %3296 = vpow2.f32 %v1922_v8 }
 0x80b   : > { %3298 = vpow2.f32 %v1924_v43  ;;  %v1986_v58 = vadd.f32 %v4715_v53, %v4711_v46  ;;  %1981 = vadd.xlane.f32.xlu2 %v1980_v7  ;;  %v4723_v26 = vpop.eup %3294 }
 0x80c   : > { %3300 = vpow2.f32 %v1932_v29 }
 0x80d   : > { %1987 = vadd.xlane.f32.xlu0 %v1986_v58  ;;  %v1832_v24 = vpop.xlane.xlu2 %1831  ;;  %1993 = vadd.xlane.f32.xlu1 %v1992_v16 }
 0x80e   : > { %v1878_v41 = vsub.f32 %v4553_v3, %v1832_v24  ;;  %v1879_v45 = vsub.f32 %v4555_v35, %v1832_v24 }
 0x810   : > { %v4725_v55 = vpop.eup %3296  ;;  %v1910_v0 = vmul.f32 1.442695, %v1878_v41  ;;  %v1912_v47 = vmul.f32 1.442695, %v1879_v45 }
 0x811   : > { %v4727_v39 = vpop.eup %3298 }
 0x812   : > { %v4729_v56 = vpop.eup %3300  ;;  %3302 = vpow2.f32 %v1910_v0  ;;  %v1983_v25 = vadd.f32 %v4727_v39, %v4725_v55 }
 0x813   : > { %3304 = vpow2.f32 %v1912_v47  ;;  %v1989_v3 = vadd.f32 %v4729_v56, %v4723_v26 }
 0x815   : > { %1984 = vadd.xlane.f32.xlu0 %v1983_v25  ;;  %1990 = vadd.xlane.f32.xlu1 %v1989_v3 }
 0x818   : > { %v4735_v35 = vpop.eup %3302 }
 0x819   : > { %v4737_v17 = vpop.eup %3304 }
 0x81a   : > { %v1974_v38 = vadd.f32 %v4737_v17, %v4735_v35 }
 0x81d   : > { %1975 = vadd.xlane.f32.xlu1 %v1974_v38 }
 0x85e   : > { %v2018_v50 = vpop.xlane.xlu0 %2017 }
 0x85f   : > { %3306 = vrcp.f32 %v2018_v50 }
 0x865   : > { %v3307_v16 = vpop.eup %3306 }
 0x866   : > { %v1835_v18 = vpop.xlane.xlu0 %1834  ;;  %v2015_v58 = vpop.xlane.xlu2 %2014  ;;  %v2066_v41 = vmul.f32 %v3307_v16, %v4627_v11  ;;  %v2067_v45 = vmul.f32 %v3307_v16, %v4629_v28 }
 0x867   : > { %v1880_v48 = vsub.f32 %v4557_v49, %v1835_v18  ;;  %v1881_v29 = vsub.f32 %v4559_v60, %v1835_v18 }
 0x868   : > { %v2021_v8 = vpop.xlane.xlu1 %2020 }
 0x869   : > { %v1914_v43 = vmul.f32 1.442695, %v1880_v48  ;;  %v1916_v7 = vmul.f32 1.442695, %v1881_v29  ;;  %3308 = vrcp.f32 %v2021_v8 }
 0x86b   : > { %3310 = vpow2.f32 %v1914_v43 }
 0x86c   : > { %3312 = vpow2.f32 %v1916_v7 }
 0x86d   : > { %3314 = vrcp.f32 %v2015_v58 }
 0x86e   : > { %v2000_v43 = vpop.xlane.xlu2 %1999 }
 0x86f   : > { %v3309_v24 = vpop.eup %3308 }
 0x870   : > { %v2068_v0 = vmul.f32 %v3309_v24, %v4643_v1  ;;  %v2069_v49 = vmul.f32 %v3309_v24, %v4649_v5  ;;  %v2012_v47 = vpop.xlane.xlu1 %2011  ;;  %v2006_v60 = vpop.xlane.xlu0 %2005 }
 0x871   : > { %v4747_v25 = vpop.eup %3310  ;;  %3316 = vrcp.f32 %v2012_v47 }
 0x872   : > { %v4749_v3 = vpop.eup %3312  ;;  %v2084_v38 = vpack.c.bf16 %v2068_v0, %v2066_v41  ;;  %v2085_v50 = vpack.c.bf16 %v2069_v49, %v2067_v45  ;;  %3318 = vrcp.f32 %v2006_v60 }
 0x873   : > { %v1977_v18 = vadd.f32 %v4749_v3, %v4747_v25  ;;  %v3315_v11 = vpop.eup %3314 }
 0x874   : > { %2106 = vmatpush.bf16.xpose.msrb.mxu2 %v2084_v38  ;;  %2125 = vmatpush.bf16.xpose.msrb.mxu3 %v2085_v50  ;;  %v2064_v48 = vmul.f32 %v3315_v11, %v4639_v34  ;;  %v2065_v8 = vmul.f32 %v3315_v11, %v4641_v30 }
 0x875   : > { %1978 = vadd.xlane.f32.xlu2 %v1977_v18 }
 0x876   : > { %v1997_v60 = vpop.xlane.xlu2 %1996 }
 0x877   : > { %v3317_v28 = vpop.eup %3316 }
 0x878   : > { %v2009_v1 = vpop.xlane.xlu1 %2008  ;;  %v2062_v5 = vmul.f32 %v3317_v28, %v4651_v36  ;;  %v2063_v29 = vmul.f32 %v3317_v28, %v4657_v2  ;;  %v2003_v7 = vpop.xlane.xlu0 %2002 }
 0x879   : > { %3320 = vrcp.f32 %v2009_v1  ;;  %v3319_v24 = vpop.eup %3318 }
 0x87a   : > { %v2082_v58 = vpack.c.bf16 %v2064_v48, %v2062_v5  ;;  %v2083_v16 = vpack.c.bf16 %v2065_v8, %v2063_v29  ;;  %3322 = vrcp.f32 %v2003_v7  ;;  %v2058_v36 = vmul.f32 %v3319_v24, %v4667_v33 }
 0x87b   : > { %3324 = vrcp.f32 %v2000_v43  ;;  %v2059_v2 = vmul.f32 %v3319_v24, %v4671_v42 }
 0x87c   : > { %2107 = vmatpush.bf16.xpose.msrb.mxu2 %v2082_v58  ;;  %2126 = vmatpush.bf16.xpose.msrb.mxu3 %v2083_v16 }
 0x87e   : > { %v1982_v7 = vpop.xlane.xlu2 %1981 }
 0x87f   : > { %v3321_v41 = vpop.eup %3320 }
 0x880   : > { %v1994_v45 = vpop.xlane.xlu1 %1993  ;;  %v2060_v34 = vmul.f32 %v3321_v41, %v4675_v13  ;;  %v2061_v30 = vmul.f32 %v3321_v41, %v4681_v62  ;;  %v3323_v47 = vpop.eup %3322 }
 0x881   : > { %v3325_v38 = vpop.eup %3324  ;;  %3326 = vrcp.f32 %v1994_v45  ;;  %v2056_v50 = vmul.f32 %v3323_v47, %v4689_v20  ;;  %v2057_v18 = vmul.f32 %v3323_v47, %v4694_v22  ;;  %v1988_v33 = vpop.xlane.xlu0 %1987 }
 0x882   : > { %v2080_v0 = vpack.c.bf16 %v2060_v34, %v2058_v36  ;;  %v2081_v49 = vpack.c.bf16 %v2061_v30, %v2059_v2  ;;  %3328 = vrcp.f32 %v1997_v60  ;;  %v2054_v13 = vmul.f32 %v3325_v38, %v4661_v57 }
 0x883   : > { %v2055_v42 = vmul.f32 %v3325_v38, %v4664_v6 }
 0x884   : > { %2108 = vmatpush.bf16.xpose.msrb.mxu2 %v2080_v0  ;;  %2127 = vmatpush.bf16.xpose.msrb.mxu3 %v2081_v49  ;;  %v2078_v62 = vpack.c.bf16 %v2056_v50, %v2054_v13  ;;  %v2151_v0 = vld.sshfl [vmem:[#allocation1] sm:$0xff pattern:$0x75316420]  ;;  %v2152_v49 = vld.sshfl [vmem:[#allocation1 + $0x8] sm:$0xff pattern:$0x75316420] }
 0x885   : > { %v2079_v28 = vpack.c.bf16 %v2057_v18, %v2055_v42  ;;  %v2155_v60 = vpack.c.bf16 %v2151_v0, %v2151_v0  ;;  %v2156_v38 = vpack.c.bf16 %v2152_v49, %v2152_v49  ;;  %v5164_v49 = vld [vmem:[#allocation11_spill] sm:$0xff] }
 0x887   : > { %v3327_v1 = vpop.eup %3326  ;;  %v2158_v13 = vsel %vm540_vm0, %v2155_v60, 0  ;;  %v2161_v42 = vsel %vm540_vm0, %v2156_v38, 0  ;;  %v5166_v38 = vld [vmem:[#allocation8_spill] sm:$0xff] }
 0x888   : > { %v1991_v11 = vpop.xlane.xlu1 %1990  ;;  %v3329_v5 = vpop.eup %3328  ;;  %v2050_v48 = vmul.f32 %v3327_v1, %v4699_v19  ;;  %v2051_v20 = vmul.f32 %v3327_v1, %v4703_v12 }
 0x889   : > { %3330 = vrcp.f32 %v1991_v11  ;;  %v2052_v22 = vmul.f32 %v3329_v5, %v4685_v52  ;;  %v2053_v29 = vmul.f32 %v3329_v5, %v4687_v31  ;;  %v1985_v57 = vpop.xlane.xlu0 %1984 }
 0x88a   : > { %3332 = vrcp.f32 %v1988_v33 }
 0x88b   : > { %v2076_v8 = vpack.c.bf16 %v2052_v22, %v2050_v48  ;;  %v2077_v6 = vpack.c.bf16 %v2053_v29, %v2051_v20  ;;  %3334 = vrcp.f32 %v1985_v57 }
 0x88c   : > { %2109 = vmatpush.bf16.xpose.msrb.mxu2 %v2078_v62  ;;  %2128 = vmatpush.bf16.xpose.msrb.mxu3 %v2079_v28  ;;  %3336 = vrcp.f32 %v1982_v7 }
 0x88f   : > { %v3331_v43 = vpop.eup %3330 }
 0x890   : > { %v3333_v58 = vpop.eup %3332  ;;  %v2048_v16 = vmul.f32 %v3331_v43, %v4723_v26  ;;  %v2049_v19 = vmul.f32 %v3331_v43, %v4729_v56 }
 0x891   : > { %v2046_v12 = vmul.f32 %v3333_v58, %v4711_v46  ;;  %v2047_v52 = vmul.f32 %v3333_v58, %v4715_v53  ;;  %v3335_v41 = vpop.eup %3334  ;;  %v1976_v46 = vpop.xlane.xlu1 %1975 }
 0x892   : > { %v3337_v45 = vpop.eup %3336  ;;  %v2044_v36 = vmul.f32 %v3335_v41, %v4725_v55  ;;  %v2045_v34 = vmul.f32 %v3335_v41, %v4727_v39  ;;  %3338 = vrcp.f32 %v1976_v46  ;;  %v5163_v46 = vld [vmem:[#allocation6_spill] sm:$0xff] }
 0x893   : > { %v2074_v24 = vpack.c.bf16 %v2048_v16, %v2046_v12  ;;  %v2075_v31 = vpack.c.bf16 %v2049_v19, %v2047_v52  ;;  %v2042_v2 = vmul.f32 %v3337_v45, %v4707_v21  ;;  %v2043_v26 = vmul.f32 %v3337_v45, %v4709_v15  ;;  %v5159_v19 = vld [vmem:[#allocation2_spill] sm:$0xff] }
 0x894   : > { %2110 = vmatpush.bf16.xpose.msrb.mxu2 %v2076_v8  ;;  %2129 = vmatpush.bf16.xpose.msrb.mxu3 %v2077_v6 }
 0x895   : > { %v2072_v56 = vpack.c.bf16 %v2044_v36, %v2042_v2  ;;  %v2073_v30 = vpack.c.bf16 %v2045_v34, %v2043_v26 }
 0x898   : > { %v3339_v47 = vpop.eup %3338 }
 0x899   : > { %v2038_v39 = vmul.f32 %v3339_v47, %v4735_v35  ;;  %v2039_v15 = vmul.f32 %v3339_v47, %v4737_v17  ;;  %v5165_v47 = vld [vmem:[#allocation7_spill] sm:$0xff] }
 0x89c   : > { %2111 = vmatpush.bf16.xpose.msrb.mxu2 %v2074_v24  ;;  %2130 = vmatpush.bf16.xpose.msrb.mxu3 %v2075_v31 }
 0x8a4   : > { %2112 = vmatpush.bf16.xpose.msrb.mxu2 %v2072_v56  ;;  %2131 = vmatpush.bf16.xpose.msrb.mxu3 %v2073_v30  ;;  %v5161_v56 = vld [vmem:[#allocation4_spill] sm:$0xff]  ;;  %v5162_v30 = vld [vmem:[#allocation5_spill] sm:$0xff] }
 0x8e8   : > { %v1979_v53 = vpop.xlane.xlu2 %1978 }
 0x8e9   : > { %3340 = vrcp.f32 %v1979_v53 }
 0x8ef   : > { %v3341_v55 = vpop.eup %3340 }
 0x8f0   : > { %v2040_v21 = vmul.f32 %v3341_v55, %v4747_v25  ;;  %v2041_v50 = vmul.f32 %v3341_v55, %v4749_v3 }
 0x8f2   : > { %v2070_v18 = vpack.c.bf16 %v2040_v21, %v2038_v39  ;;  %v2071_v33 = vpack.c.bf16 %v2041_v50, %v2039_v15  ;;  %v5167_v50 = vld [vmem:[#allocation9_spill] sm:$0xff] }
 0x8f4   : > { %2113 = vmatpush.bf16.xpose.msrb.mxu2 %v2070_v18  ;;  %2132 = vmatpush.bf16.xpose.msrb.mxu3 %v2071_v33  ;;  %v5168_v33 = vld [vmem:[#allocation10_spill] sm:$0xff] }
 0x8fb   : > { %2114 = vmatmul.bf16.vlgmr.msrb.gmra.mxu2 %v4485_v63  ;;  %2133 = vmatmul.bf16.vlgmr.msrb.gmra.mxu3 %v4487_v54 }
 0x8fc   : > { %2170 = vmatpush.bf16.msra.mxu2 %v2158_v13  ;;  %2199 = vmatpush.bf16.msra.mxu3 %v2161_v42 }
 0x90b   : > { %2119 = vmatmul.bf16.gmra.mxu2 %v4531_v9  ;;  %2138 = vmatmul.bf16.gmra.mxu3 %v4533_v32 }
 0x91b   : > { %2996 = vmatmul.msk.bf16.vlgmr.msra.gmra.mxu2 %vm527_vm1, %v4340_v27  ;;  %3000 = vmatmul.msk.bf16.vlgmr.msra.gmra.mxu3 %vm527_vm1, %v4340_v27 }
 0x92b   : > { %2997 = vmatmul.msk.bf16.gmra.mxu2 %vm527_vm1, %v4349_v51  ;;  %3001 = vmatmul.msk.bf16.gmra.mxu3 %vm527_vm1, %v4349_v51 }
 0x93b   : > { %2998 = vmatmul.msk.bf16.gmra.mxu2 %vm527_vm1, %v4358_v44  ;;  %3002 = vmatmul.msk.bf16.gmra.mxu3 %vm527_vm1, %v4358_v44 }
 0x94b   : > { %2999 = vmatmul.msk.bf16.gmra.mxu2 %vm527_vm1, %v4367_v10  ;;  %3003 = vmatmul.msk.bf16.gmra.mxu3 %vm527_vm1, %v4367_v10 }
 0x97e   : > { %v2115_v63 = vpop.f32.mrf.mxu2  ;;  %v2134_v27 = vpop.f32.mrf.mxu3 }
 0x97f   : > { %v2135_v54 = vadd.f32 %v2134_v27, %v2115_v63 }
 0x981   : > { %2144 = vst [vmem:[%s451_s25] sm:$0xff] %v2135_v54 }
 0x986   : > { %v2117_v51 = vpop.f32.mrf.mxu2  ;;  %v2136_v9 = vpop.f32.mrf.mxu3 }
 0x987   : > { %v2137_v32 = vadd.f32 %v2136_v9, %v2117_v51 }
 0x989   : > { %2145 = vst [vmem:[%s451_s25 + $0x8] sm:$0xff] %v2137_v32 }
 0x98e   : > { %v2120_v35 = vpop.f32.mrf.mxu2  ;;  %v2139_v44 = vpop.f32.mrf.mxu3 }
 0x98f   : > { %v2140_v17 = vadd.f32 %v2139_v44, %v2120_v35 }
 0x991   : > { %2146 = vst [vmem:[%s451_s25 + $0x10] sm:$0xff] %v2140_v17  ;;  %v5169_v17 = vld [vmem:[#allocation16_spill] sm:$0xff] }
 0x996   : > { %v2122_v25 = vpop.f32.mrf.mxu2  ;;  %v2141_v3 = vpop.f32.mrf.mxu3 }
 0x997   : > { %v2142_v11 = vadd.f32 %v2141_v3, %v2122_v25  ;;  %v5170_v25 = vld [vmem:[#allocation12_spill] sm:$0xff] }
 0x999   : > { %2147 = vst [vmem:[%s451_s25 + $0x18] sm:$0xff] %v2142_v11  ;;  %v5171_v11 = vld [vmem:[#allocation13_spill] sm:$0xff] }
 0x99e   : > { %v2172_v10 = vpop.f32.mrf.mxu2  ;;  %v2201_v62 = vpop.f32.mrf.mxu3 }
 0x99f   : > { %v2173_v8 = vadd.f32 %v4404_v59, %v2172_v10  ;;  %v2202_v6 = vadd.f32 %v4410_v40, %v2201_v62 }
 0x9a6   : > { %v2174_v28 = vpop.f32.mrf.mxu2  ;;  %v2203_v1 = vpop.f32.mrf.mxu3 }
 0x9a7   : > { %v2175_v29 = vadd.f32 %v4392_v23, %v2174_v28  ;;  %v2204_v57 = vadd.f32 %v4398_v4, %v2203_v1 }
 0x9a9   : > { %v2222_v52 = vpack.c.bf16 %v2204_v57, %v2175_v29 }
 0x9ab   : > { %v2235_v45 = vunpack.c.l.b16 %v2222_v52  ;;  %v2236_v4 = vunpack.c.h.b16 %v2222_v52 }
 0x9ae   : > { %v2177_v5 = vpop.f32.mrf.mxu2  ;;  %v2206_v48 = vpop.f32.mrf.mxu3 }
 0x9af   : > { %v2178_v20 = vadd.f32 %v4380_v37, %v2177_v5  ;;  %v2207_v22 = vadd.f32 %v4386_v61, %v2206_v48  ;;  %v2221_v37 = vpack.c.bf16 %v2202_v6, %v2173_v8  ;;  %v5172_v5 = vld [vmem:[#allocation14_spill] sm:$0xff] }
 0x9b1   : > { %v2223_v58 = vpack.c.bf16 %v2207_v22, %v2178_v20  ;;  %v2233_v34 = vunpack.c.l.b16 %v2221_v37  ;;  %v2234_v40 = vunpack.c.h.b16 %v2221_v37  ;;  %v5173_v20 = vld [vmem:[#allocation15_spill] sm:$0xff] }
 0x9b3   : > { %v2237_v31 = vunpack.c.l.b16 %v2223_v58  ;;  %v2238_v61 = vunpack.c.h.b16 %v2223_v58  ;;  %v2241_v2 = vpack.c.b16 %v2235_v45, %v2233_v34  ;;  %v2242_v26 = vpack.c.b16 %v2236_v4, %v2234_v40 }
 0x9b6   : > { %v2179_v43 = vpop.f32.mrf.mxu2  ;;  %v2208_v7 = vpop.f32.mrf.mxu3 }
 0x9b7   : > { %v2180_v16 = vadd.f32 %v4416_v14, %v2179_v43  ;;  %v2209_v12 = vadd.f32 %v5159_v19, %v2208_v7  ;;  %v5160_v14 = vld [vmem:[#allocation3_spill] sm:$0xff]  ;;  %v5175_v19 = vld [vmem:[#allocation18_spill] sm:$0xff] }
 0x9b9   : > { %v2224_v24 = vpack.c.bf16 %v2209_v12, %v2180_v16  ;;  %v5174_v16 = vld [vmem:[#allocation17_spill] sm:$0xff] }
 0x9bb   : > { %v2239_v41 = vunpack.c.l.b16 %v2224_v24  ;;  %v2240_v23 = vunpack.c.h.b16 %v2224_v24 }
 0x9bd   : > { %v2243_v36 = vpack.c.b16 %v2239_v41, %v2237_v31  ;;  %v2244_v59 = vpack.c.b16 %v2240_v23, %v2238_v61 }
 0x9be   : > { %v2182_v53 = vpop.f32.mrf.mxu2  ;;  %v2211_v0 = vpop.f32.mrf.mxu3 }
 0x9bf   : > { %2255 = vmatpush.bf16.msrb.mxu2 %v2243_v36  ;;  %2304 = vmatpush.bf16.msrb.mxu3 %v2244_v59  ;;  %v2183_v60 = vadd.f32 %v5165_v47, %v2182_v53  ;;  %v2212_v55 = vadd.f32 %v5166_v38, %v2211_v0 }
 0x9c1   : > { %v2225_v39 = vpack.c.bf16 %v2212_v55, %v2183_v60 }
 0x9c3   : > { %2256 = vmatpush.bf16.msrb.mxu2 %v2241_v2  ;;  %2305 = vmatpush.bf16.msrb.mxu3 %v2242_v26  ;;  %v2607_v42 = vunpack.c.l.b16 %v2225_v39  ;;  %v2608_v63 = vunpack.c.h.b16 %v2225_v39 }
 0x9c6   : > { %3004 = vmatmul.msk.bf16.vlgmr.msrb.gmra.mxu2 %vm673_vm2, %v5160_v14  ;;  %3012 = vmatmul.msk.bf16.vlgmr.msrb.gmra.mxu3 %vm673_vm2, %v5160_v14  ;;  %v2184_v21 = vpop.f32.mrf.mxu2  ;;  %v2213_v15 = vpop.f32.mrf.mxu3 }
 0x9c7   : > { %v2185_v18 = vadd.f32 %v5167_v50, %v2184_v21  ;;  %v2214_v13 = vadd.f32 %v5168_v33, %v2213_v15 }
 0x9c9   : > { %v2226_v27 = vpack.c.bf16 %v2214_v13, %v2185_v18 }
 0x9cb   : > { %v2609_v54 = vunpack.c.l.b16 %v2226_v27  ;;  %v2610_v51 = vunpack.c.h.b16 %v2226_v27 }
 0x9cd   : > { %v4839_v9 = vpack.c.b16 %v2609_v54, %v2607_v42  ;;  %v4841_v32 = vpack.c.b16 %v2610_v51, %v2608_v63 }
 0x9ce   : > { %v2187_v35 = vpop.f32.mrf.mxu2  ;;  %v2216_v44 = vpop.f32.mrf.mxu3 }
 0x9cf   : > { %v2188_v3 = vadd.f32 %v5170_v25, %v2187_v35  ;;  %v2217_v10 = vadd.f32 %v5171_v11, %v2216_v44 }
 0x9d1   : > { %v2227_v62 = vpack.c.bf16 %v2217_v10, %v2188_v3 }
 0x9d3   : > { %v2611_v57 = vunpack.c.l.b16 %v2227_v62  ;;  %v2612_v8 = vunpack.c.h.b16 %v2227_v62 }
 0x9d6   : > { %3005 = vmatmul.msk.bf16.gmra.mxu2 %vm673_vm2, %v5161_v56  ;;  %3013 = vmatmul.msk.bf16.gmra.mxu3 %vm673_vm2, %v5161_v56  ;;  %v2189_v28 = vpop.f32.mrf.mxu2  ;;  %v2218_v1 = vpop.f32.mrf.mxu3 }
 0x9d7   : > { %v2190_v48 = vadd.f32 %v5172_v5, %v2189_v28  ;;  %v2219_v22 = vadd.f32 %v5173_v20, %v2218_v1 }
 0x9d9   : > { %v2228_v29 = vpack.c.bf16 %v2219_v22, %v2190_v48 }
 0x9db   : > { %v2613_v6 = vunpack.c.l.b16 %v2228_v29  ;;  %v2614_v43 = vunpack.c.h.b16 %v2228_v29 }
 0x9dd   : > { %v4851_v7 = vpack.c.b16 %v2613_v6, %v2611_v57  ;;  %v4853_v58 = vpack.c.b16 %v2614_v43, %v2612_v8 }
 0x9e6   : > { %3006 = vmatmul.msk.bf16.gmra.mxu2 %vm673_vm2, %v5162_v30  ;;  %3014 = vmatmul.msk.bf16.gmra.mxu3 %vm673_vm2, %v5162_v30 }
 0x9f6   : > { %3007 = vmatmul.msk.bf16.gmra.mxu2 %vm673_vm2, %v5163_v46  ;;  %3015 = vmatmul.msk.bf16.gmra.mxu3 %vm673_vm2, %v5163_v46 }
 0xa06   : > { %3008 = vmatmul.msk.bf16.gmra.mxu2 %vm673_vm2, %v5164_v49  ;;  %3016 = vmatmul.msk.bf16.gmra.mxu3 %vm673_vm2, %v5164_v49 }
 0xa16   : > { %3009 = vmatmul.msk.bf16.gmra.mxu2 %vm673_vm2, %v5169_v17  ;;  %3017 = vmatmul.msk.bf16.gmra.mxu3 %vm673_vm2, %v5169_v17 }
 0xa26   : > { %3010 = vmatmul.msk.bf16.gmra.mxu2 %vm673_vm2, %v5174_v16  ;;  %3018 = vmatmul.msk.bf16.gmra.mxu3 %vm673_vm2, %v5174_v16 }
 0xa36   : > { %3011 = vmatmul.msk.bf16.gmra.mxu2 %vm673_vm2, %v5175_v19  ;;  %3019 = vmatmul.msk.bf16.gmra.mxu3 %vm673_vm2, %v5175_v19 }
 0xa49   : > { %v4863_v12 = vpop.f32.mrf.mxu2  ;;  %v4865_v52 = vpop.f32.mrf.mxu3 }
 0xa4a   : > { %v2347_v62 = vmax.f32 %v4863_v12, %v4865_v52 }
 0xa51   : > { %v4867_v24 = vpop.f32.mrf.mxu2  ;;  %v4869_v37 = vpop.f32.mrf.mxu3 }
 0xa59   : > { %v4871_v31 = vpop.f32.mrf.mxu2  ;;  %v4873_v61 = vpop.f32.mrf.mxu3 }
 0xa5a   : > { %v2353_v3 = vmax.f32 %v4871_v31, %v4873_v61 }
 0xa61   : > { %v4875_v41 = vpop.f32.mrf.mxu2  ;;  %v4877_v23 = vpop.f32.mrf.mxu3 }
 0xa62   : > { %v2356_v10 = vmax.f32 %v4875_v41, %v4877_v23 }
 0xa69   : > { %v4879_v45 = vpop.f32.mrf.mxu2  ;;  %v4881_v4 = vpop.f32.mrf.mxu3 }
 0xa6a   : > { %v2359_v11 = vmax.f32 %v4879_v45, %v4881_v4 }
 0xa71   : > { %v4883_v36 = vpop.f32.mrf.mxu2  ;;  %v4885_v59 = vpop.f32.mrf.mxu3 }
 0xa72   : > { %v2362_v54 = vmax.f32 %v4883_v36, %v4885_v59 }
 0xa79   : > { %v4887_v34 = vpop.f32.mrf.mxu2  ;;  %v4889_v40 = vpop.f32.mrf.mxu3 }
 0xa7a   : > { %v2365_v33 = vmax.f32 %v4887_v34, %v4889_v40 }
 0xa81   : > { %v4891_v2 = vpop.f32.mrf.mxu2  ;;  %v4893_v26 = vpop.f32.mrf.mxu3 }
 0xa82   : > { %v2368_v17 = vmax.f32 %v4891_v2, %v4893_v26 }
 0xa89   : > { %v4895_v14 = vpop.f32.mrf.mxu2  ;;  %v4897_v56 = vpop.f32.mrf.mxu3 }
 0xa8a   : > { %v2371_v35 = vmax.f32 %v4895_v14, %v4897_v56 }
 0xa91   : > { %v4899_v30 = vpop.f32.mrf.mxu2  ;;  %v4901_v46 = vpop.f32.mrf.mxu3 }
 0xa92   : > { %v2374_v25 = vmax.f32 %v4899_v30, %v4901_v46 }
 0xa99   : > { %v4903_v53 = vpop.f32.mrf.mxu2  ;;  %v4905_v0 = vpop.f32.mrf.mxu3 }
 0xa9a   : > { %v2377_v44 = vmax.f32 %v4903_v53, %v4905_v0 }
 0xaa1   : > { %v4907_v49 = vpop.f32.mrf.mxu2  ;;  %v4909_v47 = vpop.f32.mrf.mxu3 }
 0xaa2   : > { %v2380_v15 = vmax.f32 %v4907_v49, %v4909_v47 }
 0xaa9   : > { %v2288_v60 = vpop.f32.mrf.mxu2  ;;  %v4911_v38 = vpop.f32.mrf.mxu3 }
 0xaaa   : > { %v2383_v55 = vmax.f32 %v2288_v60, %v4911_v38 }
 0xaac   : > { %2384 = vmax.xlane.f32.xlu2 %v2383_v55 }
 0xab1   : > { %v2290_v39 = vpop.f32.mrf.mxu2  ;;  %v2339_v21 = vpop.f32.mrf.mxu3 }
 0xab2   : > { %v2386_v51 = vmax.f32 %v2290_v39, %v2339_v21 }
 0xab4   : > { %2381 = vmax.xlane.f32.xlu2 %v2380_v15 }
 0xab9   : > { %v2293_v50 = vpop.f32.mrf.mxu2  ;;  %v2342_v18 = vpop.f32.mrf.mxu3 }
 0xaba   : > { %v2389_v13 = vmax.f32 %v2293_v50, %v2342_v18 }
 0xabc   : > { %2366 = vmax.xlane.f32.xlu2 %v2365_v33  ;;  %2390 = vmax.xlane.f32.xlu0 %v2389_v13 }
 0xac1   : > { %v2295_v42 = vpop.f32.mrf.mxu2  ;;  %v2344_v63 = vpop.f32.mrf.mxu3 }
 0xac2   : > { %v2392_v27 = vmax.f32 %v2295_v42, %v2344_v63 }
 0xac4   : > { %2363 = vmax.xlane.f32.xlu2 %v2362_v54  ;;  %2387 = vmax.xlane.f32.xlu0 %v2386_v51 }
 0xac5   : > { %2393 = vmax.xlane.f32.xlu1 %v2392_v27 }
 0xacc   : > { %2372 = vmax.xlane.f32.xlu0 %v2371_v35 }
 0xacd   : > { %2378 = vmax.xlane.f32.xlu1 %v2377_v44 }
 0xad4   : > { %2369 = vmax.xlane.f32.xlu0 %v2368_v17 }
 0xad5   : > { %2375 = vmax.xlane.f32.xlu1 %v2374_v25 }
 0xadc   : > { %2354 = vmax.xlane.f32.xlu0 %v2353_v3 }
 0xadd   : > { %2360 = vmax.xlane.f32.xlu1 %v2359_v11 }
 0xae5   : > { %2357 = vmax.xlane.f32.xlu1 %v2356_v10 }
 0xaed   : > { %2348 = vmax.xlane.f32.xlu1 %v2347_v62 }
 0xb1f   : > { %v2385_v20 = vpop.xlane.xlu2 %2384 }
 0xb20   : > { %v2419_v19 = vsub.f32 %v2288_v60, %v2385_v20  ;;  %v2420_v15 = vsub.f32 %v4911_v38, %v2385_v20 }
 0xb22   : > { %v2475_v51 = vmul.f32 1.442695, %v2419_v19 }
 0xb27   : > { %v2382_v27 = vpop.xlane.xlu2 %2381 }
 0xb28   : > { %v2417_v17 = vsub.f32 %v4907_v49, %v2382_v27  ;;  %v2418_v11 = vsub.f32 %v4909_v47, %v2382_v27 }
 0xb2a   : > { %v2473_v47 = vmul.f32 1.442695, %v2418_v11 }
 0xb2f   : > { %v2391_v28 = vpop.xlane.xlu0 %2390 }
 0xb30   : > { %v2423_v1 = vsub.f32 %v2293_v50, %v2391_v28  ;;  %v2424_v5 = vsub.f32 %v2342_v18, %v2391_v28 }
 0xb32   : > { %v2483_v48 = vmul.f32 1.442695, %v2423_v1  ;;  %v2485_v22 = vmul.f32 1.442695, %v2424_v5  ;;  %v2367_v5 = vpop.xlane.xlu2 %2366 }
 0xb34   : > { %3342 = vpow2.f32 %v2483_v48 }
 0xb35   : > { %3344 = vpow2.f32 %v2485_v22 }
 0xb37   : > { %v2388_v29 = vpop.xlane.xlu0 %2387 }
 0xb38   : > { %v2421_v57 = vsub.f32 %v2290_v39, %v2388_v29  ;;  %v2422_v8 = vsub.f32 %v2339_v21, %v2388_v29  ;;  %v2394_v6 = vpop.xlane.xlu1 %2393  ;;  %v2477_v21 = vmul.f32 1.442695, %v2420_v15 }
 0xb39   : > { %v2425_v43 = vsub.f32 %v2295_v42, %v2394_v6  ;;  %v2426_v16 = vsub.f32 %v2344_v63, %v2394_v6 }
 0xb3a   : > { %v2479_v55 = vmul.f32 1.442695, %v2421_v57  ;;  %v2481_v33 = vmul.f32 1.442695, %v2422_v8  ;;  %v4937_v13 = vpop.eup %3342 }
 0xb3b   : > { %v2487_v50 = vmul.f32 1.442695, %v2425_v43  ;;  %v4939_v18 = vpop.eup %3344  ;;  %v2489_v54 = vmul.f32 1.442695, %v2426_v16 }
 0xb3c   : > { %3346 = vpow2.f32 %v2479_v55  ;;  %v2533_v39 = vadd.f32 %v4939_v18, %v4937_v13  ;;  %v2407_v55 = vsub.f32 %v4887_v34, %v2367_v5 }
 0xb3d   : > { %3348 = vpow2.f32 %v2481_v33 }
 0xb3e   : > { %3350 = vpow2.f32 %v2487_v50  ;;  %2534 = vadd.xlane.f32.xlu2 %v2533_v39  ;;  %v2451_v34 = vmul.f32 1.442695, %v2407_v55 }
 0xb3f   : > { %v2373_v42 = vpop.xlane.xlu0 %2372  ;;  %3352 = vpow2.f32 %v2489_v54 }
 0xb40   : > { %v2411_v60 = vsub.f32 %v4895_v14, %v2373_v42  ;;  %v2412_v38 = vsub.f32 %v4897_v56, %v2373_v42  ;;  %v2379_v63 = vpop.xlane.xlu1 %2378  ;;  %3354 = vpow2.f32 %v2475_v51 }
 0xb41   : > { %v2415_v35 = vsub.f32 %v4903_v53, %v2379_v63  ;;  %v2416_v44 = vsub.f32 %v4905_v0, %v2379_v63  ;;  %3356 = vpow2.f32 %v2477_v21  ;;  %v2471_v53 = vmul.f32 1.442695, %v2417_v17 }
 0xb42   : > { %v2459_v25 = vmul.f32 1.442695, %v2411_v60  ;;  %v2461_v3 = vmul.f32 1.442695, %v2412_v38  ;;  %v4949_v28 = vpop.eup %3346  ;;  %v2350_v0 = vmax.f32 %v4867_v24, %v4869_v37 }
 0xb43   : > { %v2467_v10 = vmul.f32 1.442695, %v2415_v35  ;;  %v2469_v62 = vmul.f32 1.442695, %v2416_v44  ;;  %v4951_v14 = vpop.eup %3348  ;;  %v2364_v44 = vpop.xlane.xlu2 %2363 }
 0xb44   : > { %3358 = vpow2.f32 %v2459_v25  ;;  %v4953_v56 = vpop.eup %3350  ;;  %v2530_v49 = vadd.f32 %v4951_v14, %v4949_v28 }
 0xb45   : > { %3360 = vpow2.f32 %v2461_v3  ;;  %v4959_v1 = vpop.eup %3352 }
 0xb46   : > { %3362 = vpow2.f32 %v2467_v10  ;;  %v4961_v20 = vpop.eup %3354  ;;  %2351 = vmax.xlane.f32.xlu2 %v2350_v0  ;;  %2531 = vadd.xlane.f32.xlu1 %v2530_v49  ;;  %v2536_v22 = vadd.f32 %v4959_v1, %v4953_v56  ;;  %v2405_v0 = vsub.f32 %v4883_v36, %v2364_v44 }
 0xb47   : > { %3364 = vpow2.f32 %v2469_v62  ;;  %v2370_v48 = vpop.xlane.xlu0 %2369  ;;  %v4967_v6 = vpop.eup %3356 }
 0xb48   : > { %v2409_v29 = vsub.f32 %v4891_v2, %v2370_v48  ;;  %v2410_v57 = vsub.f32 %v4893_v26, %v2370_v48  ;;  %v2376_v8 = vpop.xlane.xlu1 %2375  ;;  %3366 = vpow2.f32 %v2471_v53  ;;  %2537 = vadd.xlane.f32.xlu0 %v2536_v22  ;;  %v2408_v2 = vsub.f32 %v4889_v40, %v2367_v5 }
 0xb49   : > { %v2413_v43 = vsub.f32 %v4899_v30, %v2376_v8  ;;  %v2414_v16 = vsub.f32 %v4901_v46, %v2376_v8  ;;  %3368 = vpow2.f32 %v2473_v47  ;;  %v2527_v42 = vadd.f32 %v4967_v6, %v4961_v20 }
 0xb4a   : > { %v4971_v19 = vpop.eup %3358  ;;  %v2455_v15 = vmul.f32 1.442695, %v2409_v29  ;;  %v2457_v33 = vmul.f32 1.442695, %v2410_v57  ;;  %v2453_v39 = vmul.f32 1.442695, %v2408_v2  ;;  %v2406_v47 = vsub.f32 %v4885_v59, %v2364_v44 }
 0xb4b   : > { %v4974_v50 = vpop.eup %3360  ;;  %v2463_v26 = vmul.f32 1.442695, %v2413_v43  ;;  %v2465_v27 = vmul.f32 1.442695, %v2414_v16  ;;  %v2447_v48 = vmul.f32 1.442695, %v2405_v0 }
 0xb4c   : > { %v4977_v54 = vpop.eup %3362  ;;  %3370 = vpow2.f32 %v2455_v15  ;;  %v2515_v30 = vadd.f32 %v4974_v50, %v4971_v19  ;;  %v2449_v16 = vmul.f32 1.442695, %v2406_v47 }
 0xb4d   : > { %v4981_v46 = vpop.eup %3364  ;;  %3372 = vpow2.f32 %v2457_v33 }
 0xb4e   : > { %3374 = vpow2.f32 %v2463_v26  ;;  %v2521_v51 = vadd.f32 %v4981_v46, %v4977_v54  ;;  %v4985_v40 = vpop.eup %3366  ;;  %2516 = vadd.xlane.f32.xlu1 %v2515_v30 }
 0xb4f   : > { %3376 = vpow2.f32 %v2465_v27  ;;  %v2355_v21 = vpop.xlane.xlu0 %2354  ;;  %v4991_v35 = vpop.eup %3368 }
 0xb50   : > { %2522 = vadd.xlane.f32.xlu2 %v2521_v51  ;;  %v2399_v60 = vsub.f32 %v4871_v31, %v2355_v21  ;;  %v2400_v38 = vsub.f32 %v4873_v61, %v2355_v21  ;;  %v2361_v63 = vpop.xlane.xlu1 %2360  ;;  %3378 = vpow2.f32 %v2451_v34  ;;  %2528 = vadd.xlane.f32.xlu0 %v2527_v42  ;;  %v2524_v36 = vadd.f32 %v4991_v35, %v4985_v40 }
 0xb51   : > { %v2403_v17 = vsub.f32 %v4879_v45, %v2361_v63  ;;  %v2404_v25 = vsub.f32 %v4881_v4, %v2361_v63  ;;  %3380 = vpow2.f32 %v2453_v39 }
 0xb52   : > { %v4995_v3 = vpop.eup %3370  ;;  %v2435_v11 = vmul.f32 1.442695, %v2399_v60  ;;  %v2437_v10 = vmul.f32 1.442695, %v2400_v38 }
 0xb53   : > { %v4997_v62 = vpop.eup %3372  ;;  %v2443_v31 = vmul.f32 1.442695, %v2403_v17  ;;  %v2445_v53 = vmul.f32 1.442695, %v2404_v25 }
 0xb54   : > { %v4999_v61 = vpop.eup %3374  ;;  %3382 = vpow2.f32 %v2435_v11  ;;  %v2512_v45 = vadd.f32 %v4997_v62, %v4995_v3 }
 0xb55   : > { %v5004_v4 = vpop.eup %3376  ;;  %3384 = vpow2.f32 %v2437_v10 }
 0xb56   : > { %3386 = vpow2.f32 %v2443_v31  ;;  %v2518_v49 = vadd.f32 %v5004_v4, %v4999_v61  ;;  %v5009_v5 = vpop.eup %3378  ;;  %2513 = vadd.xlane.f32.xlu1 %v2512_v45 }
 0xb57   : > { %3388 = vpow2.f32 %v2445_v53  ;;  %v5013_v29 = vpop.eup %3380 }
 0xb58   : > { %2519 = vadd.xlane.f32.xlu2 %v2518_v49  ;;  %v2358_v22 = vpop.xlane.xlu1 %2357  ;;  %2525 = vadd.xlane.f32.xlu0 %v2524_v36  ;;  %3390 = vpow2.f32 %v2447_v48 }
 0xb59   : > { %v2401_v57 = vsub.f32 %v4875_v41, %v2358_v22  ;;  %v2402_v8 = vsub.f32 %v4877_v23, %v2358_v22  ;;  %v2509_v23 = vadd.f32 %v5013_v29, %v5009_v5 }
 0xb5a   : > { %v5017_v43 = vpop.eup %3382 }
 0xb5b   : > { %v5019_v59 = vpop.eup %3384  ;;  %v2439_v55 = vmul.f32 1.442695, %v2401_v57  ;;  %v2441_v15 = vmul.f32 1.442695, %v2402_v8 }
 0xb5c   : > { %v5021_v33 = vpop.eup %3386  ;;  %v2497_v2 = vadd.f32 %v5019_v59, %v5017_v43 }
 0xb5d   : > { %v5025_v26 = vpop.eup %3388  ;;  %3392 = vpow2.f32 %v2439_v55 }
 0xb5e   : > { %3394 = vpow2.f32 %v2441_v15  ;;  %v2503_v41 = vadd.f32 %v5025_v26, %v5021_v33  ;;  %2498 = vadd.xlane.f32.xlu1 %v2497_v2  ;;  %v5033_v51 = vpop.eup %3390 }
 0xb5f   : > { %3396 = vpow2.f32 %v2449_v16 }
 0xb60   : > { %2504 = vadd.xlane.f32.xlu2 %v2503_v41  ;;  %v2349_v27 = vpop.xlane.xlu1 %2348  ;;  %2510 = vadd.xlane.f32.xlu0 %v2509_v23 }
 0xb61   : > { %v2395_v30 = vsub.f32 %v4863_v12, %v2349_v27  ;;  %v2396_v34 = vsub.f32 %v4865_v52, %v2349_v27 }
 0xb63   : > { %v5035_v39 = vpop.eup %3392  ;;  %v2427_v21 = vmul.f32 1.442695, %v2395_v30  ;;  %v2429_v42 = vmul.f32 1.442695, %v2396_v34 }
 0xb64   : > { %v5037_v60 = vpop.eup %3394 }
 0xb65   : > { %v5039_v38 = vpop.eup %3396  ;;  %3398 = vpow2.f32 %v2427_v21  ;;  %v2500_v63 = vadd.f32 %v5037_v60, %v5035_v39 }
 0xb66   : > { %3400 = vpow2.f32 %v2429_v42  ;;  %v2506_v12 = vadd.f32 %v5039_v38, %v5033_v51 }
 0xb68   : > { %2501 = vadd.xlane.f32.xlu2 %v2500_v63  ;;  %2507 = vadd.xlane.f32.xlu0 %v2506_v12 }
 0xb6b   : > { %v5045_v52 = vpop.eup %3398 }
 0xb6c   : > { %v5047_v44 = vpop.eup %3400 }
 0xb6d   : > { %v2491_v17 = vadd.f32 %v5047_v44, %v5045_v52 }
 0xb70   : > { %2492 = vadd.xlane.f32.xlu0 %v2491_v17 }
 0xbb1   : > { %v2535_v25 = vpop.xlane.xlu2 %2534 }
 0xbb2   : > { %3402 = vrcp.f32 %v2535_v25 }
 0xbb8   : > { %v3403_v47 = vpop.eup %3402 }
 0xbb9   : > { %v2352_v11 = vpop.xlane.xlu2 %2351  ;;  %v2532_v49 = vpop.xlane.xlu1 %2531  ;;  %v2583_v36 = vmul.f32 %v3403_v47, %v4937_v13  ;;  %v2584_v22 = vmul.f32 %v3403_v47, %v4939_v18 }
 0xbba   : > { %v2397_v10 = vsub.f32 %v4867_v24, %v2352_v11  ;;  %v2398_v31 = vsub.f32 %v4869_v37, %v2352_v11 }
 0xbbb   : > { %v2538_v53 = vpop.xlane.xlu0 %2537 }
 0xbbc   : > { %v2431_v0 = vmul.f32 1.442695, %v2397_v10  ;;  %v2433_v45 = vmul.f32 1.442695, %v2398_v31  ;;  %3404 = vrcp.f32 %v2538_v53 }
 0xbbe   : > { %3406 = vpow2.f32 %v2431_v0 }
 0xbbf   : > { %3408 = vpow2.f32 %v2433_v45 }
 0xbc0   : > { %3410 = vrcp.f32 %v2532_v49 }
 0xbc1   : > { %v2517_v34 = vpop.xlane.xlu1 %2516 }
 0xbc2   : > { %v3405_v48 = vpop.eup %3404 }
 0xbc3   : > { %v2585_v57 = vmul.f32 %v3405_v48, %v4953_v56  ;;  %v2586_v24 = vmul.f32 %v3405_v48, %v4959_v1  ;;  %v2529_v8 = vpop.xlane.xlu0 %2528  ;;  %v2523_v37 = vpop.xlane.xlu2 %2522 }
 0xbc4   : > { %v5057_v16 = vpop.eup %3406  ;;  %3412 = vrcp.f32 %v2529_v8 }
 0xbc5   : > { %v5059_v55 = vpop.eup %3408  ;;  %v2601_v15 = vpack.c.bf16 %v2585_v57, %v2583_v36  ;;  %v2602_v2 = vpack.c.bf16 %v2586_v24, %v2584_v22  ;;  %3414 = vrcp.f32 %v2523_v37 }
 0xbc6   : > { %v2494_v41 = vadd.f32 %v5059_v55, %v5057_v16  ;;  %v3411_v13 = vpop.eup %3410 }
 0xbc7   : > { %2623 = vmatpush.bf16.xpose.msra.mxu0 %v2601_v15  ;;  %2642 = vmatpush.bf16.xpose.msra.mxu1 %v2602_v2  ;;  %v2581_v23 = vmul.f32 %v3411_v13, %v4949_v28  ;;  %v2582_v30 = vmul.f32 %v3411_v13, %v4951_v14 }
 0xbc8   : > { %2495 = vadd.xlane.f32.xlu1 %v2494_v41 }
 0xbc9   : > { %v2514_v53 = vpop.xlane.xlu1 %2513 }
 0xbca   : > { %v3413_v18 = vpop.eup %3412 }
 0xbcb   : > { %v2526_v56 = vpop.xlane.xlu0 %2525  ;;  %v2579_v1 = vmul.f32 %v3413_v18, %v4961_v20  ;;  %v2580_v27 = vmul.f32 %v3413_v18, %v4967_v6  ;;  %v2520_v21 = vpop.xlane.xlu2 %2519 }
 0xbcc   : > { %3416 = vrcp.f32 %v2526_v56  ;;  %v3415_v12 = vpop.eup %3414 }
 0xbcd   : > { %v2599_v42 = vpack.c.bf16 %v2581_v23, %v2579_v1  ;;  %v2600_v63 = vpack.c.bf16 %v2582_v30, %v2580_v27  ;;  %3418 = vrcp.f32 %v2520_v21  ;;  %v2575_v20 = vmul.f32 %v3415_v12, %v4977_v54 }
 0xbce   : > { %3420 = vrcp.f32 %v2517_v34  ;;  %v2576_v6 = vmul.f32 %v3415_v12, %v4981_v46 }
 0xbcf   : > { %2624 = vmatpush.bf16.xpose.msra.mxu0 %v2599_v42  ;;  %2643 = vmatpush.bf16.xpose.msra.mxu1 %v2600_v63 }
 0xbd1   : > { %v2499_v15 = vpop.xlane.xlu1 %2498 }
 0xbd2   : > { %v3417_v17 = vpop.eup %3416 }
 0xbd3   : > { %v2511_v25 = vpop.xlane.xlu0 %2510  ;;  %v2577_v28 = vmul.f32 %v3417_v17, %v4985_v40  ;;  %v2578_v14 = vmul.f32 %v3417_v17, %v4991_v35  ;;  %v3419_v31 = vpop.eup %3418 }
 0xbd4   : > { %v3421_v0 = vpop.eup %3420  ;;  %3422 = vrcp.f32 %v2511_v25  ;;  %v2573_v45 = vmul.f32 %v3419_v31, %v4999_v61  ;;  %v2574_v49 = vmul.f32 %v3419_v31, %v5004_v4  ;;  %v2505_v54 = vpop.xlane.xlu2 %2504 }
 0xbd5   : > { %v2597_v11 = vpack.c.bf16 %v2577_v28, %v2575_v20  ;;  %v2598_v10 = vpack.c.bf16 %v2578_v14, %v2576_v6  ;;  %3424 = vrcp.f32 %v2514_v53  ;;  %v2571_v40 = vmul.f32 %v3421_v0, %v4971_v19 }
 0xbd6   : > { %v2572_v46 = vmul.f32 %v3421_v0, %v4974_v50 }
 0xbd7   : > { %2625 = vmatpush.bf16.xpose.msra.mxu0 %v2597_v11  ;;  %2644 = vmatpush.bf16.xpose.msra.mxu1 %v2598_v10  ;;  %v2595_v35 = vpack.c.bf16 %v2573_v45, %v2571_v40 }
 0xbd8   : > { %v2596_v48 = vpack.c.bf16 %v2574_v49, %v2572_v46 }
 0xbda   : > { %v3423_v36 = vpop.eup %3422 }
 0xbdb   : > { %v2508_v47 = vpop.xlane.xlu0 %2507  ;;  %v3425_v22 = vpop.eup %3424  ;;  %v2567_v57 = vmul.f32 %v3423_v36, %v5009_v5  ;;  %v2568_v61 = vmul.f32 %v3423_v36, %v5013_v29 }
 0xbdc   : > { %3426 = vrcp.f32 %v2508_v47  ;;  %v2569_v4 = vmul.f32 %v3425_v22, %v4995_v3  ;;  %v2570_v24 = vmul.f32 %v3425_v22, %v4997_v62  ;;  %v2502_v19 = vpop.xlane.xlu2 %2501 }
 0xbdd   : > { %3428 = vrcp.f32 %v2505_v54 }
 0xbde   : > { %v2593_v8 = vpack.c.bf16 %v2569_v4, %v2567_v57  ;;  %v2594_v50 = vpack.c.bf16 %v2570_v24, %v2568_v61  ;;  %3430 = vrcp.f32 %v2502_v19 }
 0xbdf   : > { %2626 = vmatpush.bf16.xpose.msra.mxu0 %v2595_v35  ;;  %2645 = vmatpush.bf16.xpose.msra.mxu1 %v2596_v48  ;;  %3432 = vrcp.f32 %v2499_v15 }
 0xbe2   : > { %v3427_v37 = vpop.eup %3426 }
 0xbe3   : > { %v3429_v2 = vpop.eup %3428  ;;  %v2565_v41 = vmul.f32 %v3427_v37, %v5033_v51  ;;  %v2566_v5 = vmul.f32 %v3427_v37, %v5039_v38 }
 0xbe4   : > { %v2563_v29 = vmul.f32 %v3429_v2, %v5021_v33  ;;  %v2564_v3 = vmul.f32 %v3429_v2, %v5025_v26  ;;  %v3431_v18 = vpop.eup %3430  ;;  %v2493_v33 = vpop.xlane.xlu0 %2492 }
 0xbe5   : > { %v3433_v56 = vpop.eup %3432  ;;  %v2561_v1 = vmul.f32 %v3431_v18, %v5035_v39  ;;  %v2562_v23 = vmul.f32 %v3431_v18, %v5037_v60  ;;  %3434 = vrcp.f32 %v2493_v33 }
 0xbe6   : > { %v2591_v13 = vpack.c.bf16 %v2565_v41, %v2563_v29  ;;  %v2592_v62 = vpack.c.bf16 %v2566_v5, %v2564_v3  ;;  %v2559_v27 = vmul.f32 %v3433_v56, %v5017_v43  ;;  %v2560_v51 = vmul.f32 %v3433_v56, %v5019_v59 }
 0xbe7   : > { %2627 = vmatpush.bf16.xpose.msra.mxu0 %v2593_v8  ;;  %2646 = vmatpush.bf16.xpose.msra.mxu1 %v2594_v50 }
 0xbe8   : > { %v2589_v38 = vpack.c.bf16 %v2561_v1, %v2559_v27  ;;  %v2590_v30 = vpack.c.bf16 %v2562_v23, %v2560_v51 }
 0xbeb   : > { %v3435_v34 = vpop.eup %3434 }
 0xbec   : > { %v2555_v42 = vmul.f32 %v3435_v34, %v5045_v52  ;;  %v2556_v60 = vmul.f32 %v3435_v34, %v5047_v44 }
 0xbef   : > { %2628 = vmatpush.bf16.xpose.msra.mxu0 %v2591_v13  ;;  %2647 = vmatpush.bf16.xpose.msra.mxu1 %v2592_v62 }
 0xbf7   : > { %2629 = vmatpush.bf16.xpose.msra.mxu0 %v2589_v38  ;;  %2648 = vmatpush.bf16.xpose.msra.mxu1 %v2590_v30 }
 0xc3b   : > { %v2496_v26 = vpop.xlane.xlu1 %2495 }
 0xc3c   : > { %3436 = vrcp.f32 %v2496_v26 }
 0xc42   : > { %v3437_v21 = vpop.eup %3436 }
 0xc43   : > { %v2557_v39 = vmul.f32 %v3437_v21, %v5057_v16  ;;  %v2558_v43 = vmul.f32 %v3437_v21, %v5059_v55 }
 0xc45   : > { %v2587_v59 = vpack.c.bf16 %v2557_v39, %v2555_v42  ;;  %v2588_v63 = vpack.c.bf16 %v2558_v43, %v2556_v60 }
 0xc47   : > { %2630 = vmatpush.bf16.xpose.msra.mxu0 %v2587_v59  ;;  %2649 = vmatpush.bf16.xpose.msra.mxu1 %v2588_v63 }
 0xc4e   : > { %2631 = vmatmul.bf16.vlgmr.msra.gmra.mxu0 %v4839_v9  ;;  %2650 = vmatmul.bf16.vlgmr.msra.gmra.mxu1 %v4841_v32 }
 0xc5e   : > { %2636 = vmatmul.bf16.gmra.mxu0 %v4851_v7  ;;  %2655 = vmatmul.bf16.gmra.mxu1 %v4853_v58 }
 0xccb   : > { %v2632_v12 = vpop.f32.mrf.mxu0  ;;  %v2651_v52 = vpop.f32.mrf.mxu1 }
 0xccc   : > { %v2652_v44 = vadd.f32 %v2651_v52, %v2632_v12 }
 0xcce   : > { %2661 = vst [vmem:[%s456_s28] sm:$0xff] %v2652_v44 }
 0xcd3   : > { %v2634_v16 = vpop.f32.mrf.mxu0  ;;  %v2653_v55 = vpop.f32.mrf.mxu1 }
 0xcd4   : > { %v2654_v17 = vadd.f32 %v2653_v55, %v2634_v16 }
 0xcd6   : > { %2662 = vst [vmem:[%s456_s28 + $0x8] sm:$0xff] %v2654_v17 }
 0xcdb   : > { %v2637_v25 = vpop.f32.mrf.mxu0  ;;  %v2656_v9 = vpop.f32.mrf.mxu1 }
 0xcdc   : > { %v2657_v20 = vadd.f32 %v2656_v9, %v2637_v25 }
 0xcde   : > { %2663 = vst [vmem:[%s456_s28 + $0x10] sm:$0xff] %v2657_v20 }
 0xce3   : > { %v2639_v32 = vpop.f32.mrf.mxu0  ;;  %v2658_v7 = vpop.f32.mrf.mxu1 }
 0xce4   : > { %v2659_v28 = vadd.f32 %v2658_v7, %v2639_v32 }
 0xce6   : > { %2664 = vst [vmem:[%s456_s28 + $0x18] sm:$0xff] %v2659_v28 }
 0xce7 PF: > { %s21_s13 = sadd.s32 1, %s3472_s13  }
 0xce8   : > { %p18_p4 = scmp.ge.s32.totalorder %s21_s13, 4  }
 0xcea   :  { %20 = sbr.rel (!%p18_p4) target bundleno = 1 (0x1), region = 123 }

</bundles_post_ra>
